<compile_context>
chip_gen: v5e
topology: v5e:2x2
jax: 0.10.0
libtpu: 0.0.40
codegen_flags: <defaults>
</compile_context>

<pallas_src>
import functools
import itertools

import numpy as np
import jax
import jax.numpy as jnp
from jax.experimental import pallas as pl
from jax.experimental.pallas import tpu as pltpu

GRID_H = GRID_W = 4
SPAN = 0.9
IMG_H = IMG_W = 28
NCTRL = GRID_H * GRID_W        # 16 control points -> fc2 has 32 outputs
TB = 32                        # batch images per grid step (multiple of 8)
assert TB % 8 == 0


# ----------------------------------------------------------------------------
# Fused Pallas kernel: conv1+pool+relu -> conv2+pool+relu -> fc1+relu -> fc2
# In-kernel row layout: rows = (spatial_row, batch) with batch fastest (TB per
# row-block, sublane-tile aligned); lanes = (output_column, channel), odd conv
# output columns packed at lane offset 128.
# ----------------------------------------------------------------------------
def _locnet_kernel(x_ref, w1_ref, b1_ref, w2_ref, b2_ref,
                   f1w_ref, f1b_ref, f2w_ref, f2b_ref, o_ref, *, tb):
    f32 = jnp.float32
    cdt = w1_ref.dtype                              # MXU input dtype (bf16)

    x = x_ref[0]                                    # (24*tb, 140): lanes = (tap, col)

    # ---- conv1 (1->10, k5): taps folded into K -> single K=140 MXU dot -------
    # Even output columns land in lanes 0..119, odd in 128..247.
    z1 = jnp.dot(x, w1_ref[...], preferred_element_type=f32)         # (24*tb, 256)
    m1 = jnp.maximum(z1[:, :128], z1[:, 128:])                       # horizontal 2x pool
    m1 = m1.reshape(12, 2 * tb, 128)                                 # tile-aligned row split
    p1 = jnp.maximum(m1[:, :tb, :], m1[:, tb:, :]).reshape(12 * tb, 128)  # vertical 2x pool
    p1 = jnp.maximum(p1 + b1_ref[...], 0.0)                          # bias + relu (f32, VPU)
    p1c = p1.astype(cdt)

    # ---- conv2 (10->20, k5): 5 row taps, contraction over (width-window x 10ch)
    z2 = jnp.zeros((8 * tb, 256), f32)
    for ki in range(5):
        z2 = z2 + jnp.dot(p1c[ki * tb:(ki + 8) * tb, :], w2_ref[ki],
                          preferred_element_type=f32)
    m2 = jnp.maximum(z2[:, :128], z2[:, 128:])
    m2 = m2.reshape(4, 2 * tb, 128)
    p2 = jnp.maximum(m2[:, :tb, :], m2[:, tb:, :]).reshape(4 * tb, 128)
    p2 = jnp.maximum(p2 + b2_ref[...], 0.0)
    p2c = p2.astype(cdt)

    # ---- fc1 (320->50): 4 accumulated dots over the pooled-row blocks --------
    # (torch's x.view(-1, 320) channel-major order is folded into f1w host-side)
    y = jnp.zeros((tb, 50), f32)
    for i3 in range(4):
        y = y + jnp.dot(p2c[i3 * tb:(i3 + 1) * tb, :], f1w_ref[i3],
                        preferred_element_type=f32)
    y = jnp.maximum(y + f1b_ref[...], 0.0)

    # ---- fc2 (50->32); UnBoundedGridLocNet: no tanh; dropout = identity (eval)
    out = jnp.dot(y.astype(cdt), f2w_ref[...], preferred_element_type=f32) + f2b_ref[...]
    o_ref[0] = out.astype(o_ref.dtype)


def _const_index_map(ndim):
    def im(i):
        return (0,) * ndim
    return im


@jax.jit
def unbounded_grid_locnet_forward(x, kparams):
    """x: (B, 1, 28, 28) float32 -> (B, NCTRL, 2) control points."""
    b = x.shape[0]
    x = x.reshape(b, IMG_H, IMG_W).astype(jnp.float32)
    b_pad = ((b + TB - 1) // TB) * TB
    if b_pad != b:
        x = jnp.pad(x, ((0, b_pad - b), (0, 0), (0, 0)))
    nb = b_pad // TB

    # Host-side layout prep (tiny): fold conv1's 5 row taps into the lane axis
    # (lane = ki*28 + col) and order rows (out_row, batch) with batch fastest.
    xs = jnp.concatenate([x[:, ki:ki + 24, :] for ki in range(5)], axis=-1)  # (b_pad,24,140)
    xk = xs.reshape(nb, TB, 24, 5 * IMG_W).transpose(0, 2, 1, 3)
    xk = xk.reshape(nb, 24 * TB, 5 * IMG_W).astype(kparams[0].dtype)

    in_specs = [pl.BlockSpec((1, 24 * TB, 5 * IMG_W), lambda i: (i, 0, 0))]
    # Constant (weight) operands: whole array, same block every step, VMEM-resident.
    # (pl.Buffered(1) would halve their buffering but total weight VMEM is <0.5 MB
    #  in bf16, so it is not worth the extra constraint.)
    in_specs += [pl.BlockSpec(p.shape, _const_index_map(p.ndim)) for p in kparams]

    out = pl.pallas_call(
        functools.partial(_locnet_kernel, tb=TB),
        grid=(nb,),
        in_specs=in_specs,
        out_specs=pl.BlockSpec((1, TB, NCTRL * 2), lambda i: (i, 0, 0)),
        out_shape=jax.ShapeDtypeStruct((nb, TB, NCTRL * 2), jnp.float32),
        # On v7x, switch to pltpu.CORE_PARALLEL if a profile shows one idle core.
        compiler_params=pltpu.CompilerParams(dimension_semantics=("parallel",)),
    )(xk, *kparams)

    pts = out.reshape(b_pad, NCTRL * 2)[:b]
    return pts.reshape(b, NCTRL, 2)


# ----------------------------------------------------------------------------
# Host-side constants / parameter preparation (torch layout -> kernel layout)
# ----------------------------------------------------------------------------
def _target_control_points():
    ys = np.linspace(-SPAN, SPAN, GRID_H)
    xs = np.linspace(-SPAN, SPAN, GRID_W)
    return np.array(list(itertools.product(ys, xs)), dtype=np.float32)  # (16, 2)


def init_torch_params(key, zero_fc2_weight=True):
    """Parameters in PyTorch layout; fc2 init follows UnBoundedGridLocNet."""
    ks = jax.random.split(key, 8)
    s = 0.1
    rnd = lambda k, shp: s * jax.random.normal(k, shp, jnp.float32)
    fc2_w = (jnp.zeros((NCTRL * 2, 50), jnp.float32) if zero_fc2_weight
             else rnd(ks[6], (NCTRL * 2, 50)))
    return {
        "conv1_w": rnd(ks[0], (10, 1, 5, 5)), "conv1_b": rnd(ks[1], (10,)),
        "conv2_w": rnd(ks[2], (20, 10, 5, 5)), "conv2_b": rnd(ks[3], (20,)),
        "fc1_w": rnd(ks[4], (50, 320)), "fc1_b": rnd(ks[5], (50,)),
        "fc2_w": fc2_w,
        "fc2_b": jnp.asarray(_target_control_points().reshape(-1)),
    }


def prep_kernel_params(tp, dtype=jnp.bfloat16):
    w1 = np.asarray(tp["conv1_w"], np.float32)      # (10, 1, 5, 5)
    w2 = np.asarray(tp["conv2_w"], np.float32)      # (20, 10, 5, 5)
    f1 = np.asarray(tp["fc1_w"], np.float32)        # (50, 320)
    f2 = np.asarray(tp["fc2_w"], np.float32)        # (32, 50)

    # conv1: taps folded into K (row = ki*28 + input_col); even output cols in
    # lanes 0..119, odd in 128..247 -> horizontal pool is max(z[:,:128], z[:,128:]).
    w1c = np.zeros((5 * IMG_W, 256), np.float32)
    for ki in range(5):
        for j in range(12):
            for kj in range(5):
                w1c[ki * IMG_W + 2 * j + kj, j * 10:(j + 1) * 10] = w1[:, 0, ki, kj]
                w1c[ki * IMG_W + 2 * j + 1 + kj,
                    128 + j * 10:128 + (j + 1) * 10] = w1[:, 0, ki, kj]

    # conv2 banded weights, merged even/odd: (5, 128, 256); contraction rows are
    # p1's (col*10 + ch) layout, rows 120..127 are zero (p1's lane padding).
    w2c = np.zeros((5, 128, 256), np.float32)
    for ki in range(5):
        for j2 in range(4):
            for kj in range(5):
                blk = w2[:, :, ki, kj].T             # (ci, co)
                xe, xo = 2 * j2 + kj, 2 * j2 + 1 + kj
                w2c[ki, xe * 10:(xe + 1) * 10, j2 * 20:(j2 + 1) * 20] = blk
                w2c[ki, xo * 10:(xo + 1) * 10,
                    128 + j2 * 20:128 + (j2 + 1) * 20] = blk

    # fc1 split per pooled spatial row i3; torch flatten index = co*16 + i3*4 + j3.
    # Rows 80..127 zero (p2's lane padding).
    f1blk = np.zeros((4, 128, 50), np.float32)
    for i3 in range(4):
        for j3 in range(4):
            for co in range(20):
                f1blk[i3, j3 * 20 + co, :] = f1[:, co * 16 + i3 * 4 + j3]

    b1 = np.zeros((1, 128), np.float32)
    b1[0, :120] = np.tile(np.asarray(tp["conv1_b"], np.float32), 12)
    b2 = np.zeros((1, 128), np.float32)
    b2[0, :80] = np.tile(np.asarray(tp["conv2_b"], np.float32), 4)
    f1b = np.asarray(tp["fc1_b"], np.float32)[None, :]                    # (1,50)
    f2w = f2.T.copy()                                                     # (50,32)
    f2b = np.asarray(tp["fc2_b"], np.float32)[None, :]                    # (1,32)

    w1j, w2j, f1j, f2wj = (jnp.asarray(a, dtype) for a in (w1c, w2c, f1blk, f2w))
    b1j, b2j, f1bj, f2bj = (jnp.asarray(a, jnp.float32) for a in (b1, b2, f1b, f2b))
    return [w1j, b1j, w2j, b2j, f1j, f1bj, f2wj, f2bj]


# ----------------------------------------------------------------------------
# Pure-JAX reference (for validation). compute_dtype=bfloat16 emulates the
# kernel's bf16 MXU inputs (weights + dot LHS quantized, f32 accumulate).
# ----------------------------------------------------------------------------
def _ref_pool_relu(z):
    b, c, h, w = z.shape
    z = z.reshape(b, c, h // 2, 2, w // 2, 2).max(axis=(3, 5))
    return jnp.maximum(z, 0.0)


def ref_forward(x, tp, compute_dtype=jnp.float32):
    q = lambda a: a.astype(compute_dtype).astype(jnp.float32)
    dn = ("NCHW", "OIHW", "NCHW")
    hp = jax.lax.Precision.HIGHEST
    z = jax.lax.conv_general_dilated(q(x), q(tp["conv1_w"]), (1, 1), "VALID",
                                     dimension_numbers=dn, precision=hp)
    z = _ref_pool_relu(z + tp["conv1_b"].reshape(1, -1, 1, 1))
    z = jax.lax.conv_general_dilated(q(z), q(tp["conv2_w"]), (1, 1), "VALID",
                                     dimension_numbers=dn, precision=hp)
    z = _ref_pool_relu(z + tp["conv2_b"].reshape(1, -1, 1, 1))
    z = z.reshape(z.shape[0], 320)
    z = jnp.maximum(jnp.dot(q(z), q(tp["fc1_w"]).T, precision=hp) + tp["fc1_b"], 0.0)
    z = jnp.dot(q(z), q(tp["fc2_w"]).T, precision=hp) + tp["fc2_b"]
    return z.reshape(z.shape[0], NCTRL, 2)


if __name__ == "__main__":
    x = jax.random.normal(jax.random.PRNGKey(0), (2, 1, IMG_H, IMG_W), jnp.float32)

    # 1) Faithful UnBoundedGridLocNet init: fc2.weight = 0 -> output is exactly the
    #    target control points for every image (bias-only path, exact even in bf16).
    tp = init_torch_params(jax.random.PRNGKey(42), zero_fc2_weight=True)
    pts = jax.block_until_ready(unbounded_grid_locnet_forward(x, prep_kernel_params(tp)))
    assert pts.shape == (2, NCTRL, 2)
    assert bool(jnp.all(jnp.isfinite(pts)))
    tcp = jnp.asarray(_target_control_points())
    assert float(jnp.max(jnp.abs(pts - tcp[None]))) < 1e-5

    # 2) Random fc2 weight so conv/fc path matters:
    #    (a) tight structural check vs bf16-quantized reference (same rounding points)
    #    (b) sanity check vs full-f32 reference (gap = bf16 MXU quantization only).
    tp2 = init_torch_params(jax.random.PRNGKey(7), zero_fc2_weight=False)
    got = jax.block_until_ready(unbounded_grid_locnet_forward(x, prep_kernel_params(tp2)))
    want_q = jax.block_until_ready(ref_forward(x, tp2, compute_dtype=jnp.bfloat16))
    err_q = float(jnp.max(jnp.abs(got - want_q)))
    assert err_q < 1e-3, f"kernel vs bf16-quantized reference mismatch: {err_q}"
    want = jax.block_until_ready(ref_forward(x, tp2))
    err = float(jnp.max(jnp.abs(got - want)))
    assert err < 3e-2, f"kernel vs f32 reference mismatch: {err}"

    print("KERNEL_OK")
</pallas_src>

<mosaic_0001>
module attributes {stable_mosaic.version = 11 : i64} {
  func.func @_locnet_kernel(%arg0: i32, %arg1: memref<1x768x140xbf16, #tpu.memory_space<vmem>>, %arg2: memref<140x256xbf16, #tpu.memory_space<vmem>>, %arg3: memref<1x128xf32, #tpu.memory_space<vmem>>, %arg4: memref<5x128x256xbf16, #tpu.memory_space<vmem>>, %arg5: memref<1x128xf32, #tpu.memory_space<vmem>>, %arg6: memref<4x128x50xbf16, #tpu.memory_space<vmem>>, %arg7: memref<1x50xf32, #tpu.memory_space<vmem>>, %arg8: memref<50x32xbf16, #tpu.memory_space<vmem>>, %arg9: memref<1x32xf32, #tpu.memory_space<vmem>>, %arg10: memref<1x32x32xf32, #tpu.memory_space<vmem>>) attributes {dimension_semantics = [#tpu.dimension_semantics<parallel>], iteration_bounds = array<i64: 1>, scalar_prefetch = 0 : i64, scratch_operands = 0 : i64, tpu.core_type = #tpu.core_type<tc>, window_params = [{transform_indices = @transform_0, window_bounds = array<i64: 1, 768, 140>}, {pipeline_mode = #tpu.pipeline_mode<synchronous>, transform_indices = @transform_1, window_bounds = array<i64: 140, 256>}, {pipeline_mode = #tpu.pipeline_mode<synchronous>, transform_indices = @transform_2, window_bounds = array<i64: 1, 128>}, {pipeline_mode = #tpu.pipeline_mode<synchronous>, transform_indices = @transform_3, window_bounds = array<i64: 5, 128, 256>}, {pipeline_mode = #tpu.pipeline_mode<synchronous>, transform_indices = @transform_4, window_bounds = array<i64: 1, 128>}, {pipeline_mode = #tpu.pipeline_mode<synchronous>, transform_indices = @transform_5, window_bounds = array<i64: 4, 128, 50>}, {pipeline_mode = #tpu.pipeline_mode<synchronous>, transform_indices = @transform_6, window_bounds = array<i64: 1, 50>}, {pipeline_mode = #tpu.pipeline_mode<synchronous>, transform_indices = @transform_7, window_bounds = array<i64: 50, 32>}, {pipeline_mode = #tpu.pipeline_mode<synchronous>, transform_indices = @transform_8, window_bounds = array<i64: 1, 32>}, {transform_indices = @transform_9, window_bounds = array<i64: 1, 32, 32>}]} {
    %c0 = arith.constant 0 : index
    %c0_0 = arith.constant 0 : index
    %c0_1 = arith.constant 0 : index
    %0 = vector.load %arg1[%c0, %c0_0, %c0_1] : memref<1x768x140xbf16, #tpu.memory_space<vmem>>, vector<1x768x140xbf16>
    %1 = vector.shape_cast %0 : vector<1x768x140xbf16> to vector<768x140xbf16>
    %c0_2 = arith.constant 0 : index
    %c0_3 = arith.constant 0 : index
    %2 = vector.load %arg2[%c0_2, %c0_3] : memref<140x256xbf16, #tpu.memory_space<vmem>>, vector<140x256xbf16>
    %cst = arith.constant dense<0.000000e+00> : vector<768x256xf32>
    %3 = tpu.matmul %1, %2, %cst {dimension_numbers = #tpu.dot_dimension_numbers<[1], [0], [0], [1], [0, 0, 1, 1], [], []>} : vector<768x140xbf16>, vector<140x256xbf16>, vector<768x256xf32> -> vector<768x256xf32>
    %4 = vector.extract_strided_slice %3 {offsets = [0, 0], sizes = [768, 128], strides = [1, 1]} : vector<768x256xf32> to vector<768x128xf32>
    %5 = vector.extract_strided_slice %3 {offsets = [0, 128], sizes = [768, 128], strides = [1, 1]} : vector<768x256xf32> to vector<768x128xf32>
    %6 = arith.maximumf %4, %5 : vector<768x128xf32>
    %7 = vector.shape_cast %6 : vector<768x128xf32> to vector<12x64x128xf32>
    %8 = vector.extract_strided_slice %7 {offsets = [0, 0, 0], sizes = [12, 32, 128], strides = [1, 1, 1]} : vector<12x64x128xf32> to vector<12x32x128xf32>
    %9 = vector.extract_strided_slice %7 {offsets = [0, 32, 0], sizes = [12, 32, 128], strides = [1, 1, 1]} : vector<12x64x128xf32> to vector<12x32x128xf32>
    %10 = arith.maximumf %8, %9 : vector<12x32x128xf32>
    %11 = vector.shape_cast %10 : vector<12x32x128xf32> to vector<384x128xf32>
    %c0_4 = arith.constant 0 : index
    %c0_5 = arith.constant 0 : index
    %12 = vector.load %arg3[%c0_4, %c0_5] : memref<1x128xf32, #tpu.memory_space<vmem>>, vector<1x128xf32>
    %13 = vector.broadcast %12 : vector<1x128xf32> to vector<384x128xf32>
    %14 = arith.addf %11, %13 : vector<384x128xf32>
    %cst_6 = arith.constant 0.000000e+00 : f32
    %15 = vector.broadcast %cst_6 : f32 to vector<384x128xf32>
    %16 = arith.maximumf %14, %15 : vector<384x128xf32>
    %17 = arith.truncf %16 : vector<384x128xf32> to vector<384x128xbf16>
    %cst_7 = arith.constant 0.000000e+00 : f32
    %18 = vector.broadcast %cst_7 : f32 to vector<256x256xf32>
    %19 = vector.extract_strided_slice %17 {offsets = [0, 0], sizes = [256, 128], strides = [1, 1]} : vector<384x128xbf16> to vector<256x128xbf16>
    %c0_8 = arith.constant 0 : index
    %c0_9 = arith.constant 0 : index
    %c0_10 = arith.constant 0 : index
    %20 = vector.load %arg4[%c0_8, %c0_9, %c0_10] : memref<5x128x256xbf16, #tpu.memory_space<vmem>>, vector<1x128x256xbf16>
    %21 = vector.shape_cast %20 : vector<1x128x256xbf16> to vector<128x256xbf16>
    %cst_11 = arith.constant dense<0.000000e+00> : vector<256x256xf32>
    %22 = tpu.matmul %19, %21, %cst_11 {dimension_numbers = #tpu.dot_dimension_numbers<[1], [0], [0], [1], [0, 0, 1, 1], [], []>} : vector<256x128xbf16>, vector<128x256xbf16>, vector<256x256xf32> -> vector<256x256xf32>
    %23 = arith.addf %18, %22 : vector<256x256xf32>
    %24 = vector.extract_strided_slice %17 {offsets = [32, 0], sizes = [256, 128], strides = [1, 1]} : vector<384x128xbf16> to vector<256x128xbf16>
    %c1 = arith.constant 1 : index
    %c0_12 = arith.constant 0 : index
    %c0_13 = arith.constant 0 : index
    %25 = vector.load %arg4[%c1, %c0_12, %c0_13] : memref<5x128x256xbf16, #tpu.memory_space<vmem>>, vector<1x128x256xbf16>
    %26 = vector.shape_cast %25 : vector<1x128x256xbf16> to vector<128x256xbf16>
    %cst_14 = arith.constant dense<0.000000e+00> : vector<256x256xf32>
    %27 = tpu.matmul %24, %26, %cst_14 {dimension_numbers = #tpu.dot_dimension_numbers<[1], [0], [0], [1], [0, 0, 1, 1], [], []>} : vector<256x128xbf16>, vector<128x256xbf16>, vector<256x256xf32> -> vector<256x256xf32>
    %28 = arith.addf %23, %27 : vector<256x256xf32>
    %29 = vector.extract_strided_slice %17 {offsets = [64, 0], sizes = [256, 128], strides = [1, 1]} : vector<384x128xbf16> to vector<256x128xbf16>
    %c2 = arith.constant 2 : index
    %c0_15 = arith.constant 0 : index
    %c0_16 = arith.constant 0 : index
    %30 = vector.load %arg4[%c2, %c0_15, %c0_16] : memref<5x128x256xbf16, #tpu.memory_space<vmem>>, vector<1x128x256xbf16>
    %31 = vector.shape_cast %30 : vector<1x128x256xbf16> to vector<128x256xbf16>
    %cst_17 = arith.constant dense<0.000000e+00> : vector<256x256xf32>
    %32 = tpu.matmul %29, %31, %cst_17 {dimension_numbers = #tpu.dot_dimension_numbers<[1], [0], [0], [1], [0, 0, 1, 1], [], []>} : vector<256x128xbf16>, vector<128x256xbf16>, vector<256x256xf32> -> vector<256x256xf32>
    %33 = arith.addf %28, %32 : vector<256x256xf32>
    %34 = vector.extract_strided_slice %17 {offsets = [96, 0], sizes = [256, 128], strides = [1, 1]} : vector<384x128xbf16> to vector<256x128xbf16>
    %c3 = arith.constant 3 : index
    %c0_18 = arith.constant 0 : index
    %c0_19 = arith.constant 0 : index
    %35 = vector.load %arg4[%c3, %c0_18, %c0_19] : memref<5x128x256xbf16, #tpu.memory_space<vmem>>, vector<1x128x256xbf16>
    %36 = vector.shape_cast %35 : vector<1x128x256xbf16> to vector<128x256xbf16>
    %cst_20 = arith.constant dense<0.000000e+00> : vector<256x256xf32>
    %37 = tpu.matmul %34, %36, %cst_20 {dimension_numbers = #tpu.dot_dimension_numbers<[1], [0], [0], [1], [0, 0, 1, 1], [], []>} : vector<256x128xbf16>, vector<128x256xbf16>, vector<256x256xf32> -> vector<256x256xf32>
    %38 = arith.addf %33, %37 : vector<256x256xf32>
    %39 = vector.extract_strided_slice %17 {offsets = [128, 0], sizes = [256, 128], strides = [1, 1]} : vector<384x128xbf16> to vector<256x128xbf16>
    %c4 = arith.constant 4 : index
    %c0_21 = arith.constant 0 : index
    %c0_22 = arith.constant 0 : index
    %40 = vector.load %arg4[%c4, %c0_21, %c0_22] : memref<5x128x256xbf16, #tpu.memory_space<vmem>>, vector<1x128x256xbf16>
    %41 = vector.shape_cast %40 : vector<1x128x256xbf16> to vector<128x256xbf16>
    %cst_23 = arith.constant dense<0.000000e+00> : vector<256x256xf32>
    %42 = tpu.matmul %39, %41, %cst_23 {dimension_numbers = #tpu.dot_dimension_numbers<[1], [0], [0], [1], [0, 0, 1, 1], [], []>} : vector<256x128xbf16>, vector<128x256xbf16>, vector<256x256xf32> -> vector<256x256xf32>
    %43 = arith.addf %38, %42 : vector<256x256xf32>
    %44 = vector.extract_strided_slice %43 {offsets = [0, 0], sizes = [256, 128], strides = [1, 1]} : vector<256x256xf32> to vector<256x128xf32>
    %45 = vector.extract_strided_slice %43 {offsets = [0, 128], sizes = [256, 128], strides = [1, 1]} : vector<256x256xf32> to vector<256x128xf32>
    %46 = arith.maximumf %44, %45 : vector<256x128xf32>
    %47 = vector.shape_cast %46 : vector<256x128xf32> to vector<4x64x128xf32>
    %48 = vector.extract_strided_slice %47 {offsets = [0, 0, 0], sizes = [4, 32, 128], strides = [1, 1, 1]} : vector<4x64x128xf32> to vector<4x32x128xf32>
    %49 = vector.extract_strided_slice %47 {offsets = [0, 32, 0], sizes = [4, 32, 128], strides = [1, 1, 1]} : vector<4x64x128xf32> to vector<4x32x128xf32>
    %50 = arith.maximumf %48, %49 : vector<4x32x128xf32>
    %51 = vector.shape_cast %50 : vector<4x32x128xf32> to vector<128x128xf32>
    %c0_24 = arith.constant 0 : index
    %c0_25 = arith.constant 0 : index
    %52 = vector.load %arg5[%c0_24, %c0_25] : memref<1x128xf32, #tpu.memory_space<vmem>>, vector<1x128xf32>
    %53 = vector.broadcast %52 : vector<1x128xf32> to vector<128x128xf32>
    %54 = arith.addf %51, %53 : vector<128x128xf32>
    %cst_26 = arith.constant 0.000000e+00 : f32
    %55 = vector.broadcast %cst_26 : f32 to vector<128x128xf32>
    %56 = arith.maximumf %54, %55 : vector<128x128xf32>
    %57 = arith.truncf %56 : vector<128x128xf32> to vector<128x128xbf16>
    %cst_27 = arith.constant 0.000000e+00 : f32
    %58 = vector.broadcast %cst_27 : f32 to vector<32x50xf32>
    %59 = vector.extract_strided_slice %57 {offsets = [0, 0], sizes = [32, 128], strides = [1, 1]} : vector<128x128xbf16> to vector<32x128xbf16>
    %c0_28 = arith.constant 0 : index
    %c0_29 = arith.constant 0 : index
    %c0_30 = arith.constant 0 : index
    %60 = vector.load %arg6[%c0_28, %c0_29, %c0_30] : memref<4x128x50xbf16, #tpu.memory_space<vmem>>, vector<1x128x50xbf16>
    %61 = vector.shape_cast %60 : vector<1x128x50xbf16> to vector<128x50xbf16>
    %cst_31 = arith.constant dense<0.000000e+00> : vector<32x50xf32>
    %62 = tpu.matmul %59, %61, %cst_31 {dimension_numbers = #tpu.dot_dimension_numbers<[1], [0], [0], [1], [0, 0, 1, 1], [], []>} : vector<32x128xbf16>, vector<128x50xbf16>, vector<32x50xf32> -> vector<32x50xf32>
    %63 = arith.addf %58, %62 : vector<32x50xf32>
    %64 = vector.extract_strided_slice %57 {offsets = [32, 0], sizes = [32, 128], strides = [1, 1]} : vector<128x128xbf16> to vector<32x128xbf16>
    %c1_32 = arith.constant 1 : index
    %c0_33 = arith.constant 0 : index
    %c0_34 = arith.constant 0 : index
    %65 = vector.load %arg6[%c1_32, %c0_33, %c0_34] : memref<4x128x50xbf16, #tpu.memory_space<vmem>>, vector<1x128x50xbf16>
    %66 = vector.shape_cast %65 : vector<1x128x50xbf16> to vector<128x50xbf16>
    %cst_35 = arith.constant dense<0.000000e+00> : vector<32x50xf32>
    %67 = tpu.matmul %64, %66, %cst_35 {dimension_numbers = #tpu.dot_dimension_numbers<[1], [0], [0], [1], [0, 0, 1, 1], [], []>} : vector<32x128xbf16>, vector<128x50xbf16>, vector<32x50xf32> -> vector<32x50xf32>
    %68 = arith.addf %63, %67 : vector<32x50xf32>
    %69 = vector.extract_strided_slice %57 {offsets = [64, 0], sizes = [32, 128], strides = [1, 1]} : vector<128x128xbf16> to vector<32x128xbf16>
    %c2_36 = arith.constant 2 : index
    %c0_37 = arith.constant 0 : index
    %c0_38 = arith.constant 0 : index
    %70 = vector.load %arg6[%c2_36, %c0_37, %c0_38] : memref<4x128x50xbf16, #tpu.memory_space<vmem>>, vector<1x128x50xbf16>
    %71 = vector.shape_cast %70 : vector<1x128x50xbf16> to vector<128x50xbf16>
    %cst_39 = arith.constant dense<0.000000e+00> : vector<32x50xf32>
    %72 = tpu.matmul %69, %71, %cst_39 {dimension_numbers = #tpu.dot_dimension_numbers<[1], [0], [0], [1], [0, 0, 1, 1], [], []>} : vector<32x128xbf16>, vector<128x50xbf16>, vector<32x50xf32> -> vector<32x50xf32>
    %73 = arith.addf %68, %72 : vector<32x50xf32>
    %74 = vector.extract_strided_slice %57 {offsets = [96, 0], sizes = [32, 128], strides = [1, 1]} : vector<128x128xbf16> to vector<32x128xbf16>
    %c3_40 = arith.constant 3 : index
    %c0_41 = arith.constant 0 : index
    %c0_42 = arith.constant 0 : index
    %75 = vector.load %arg6[%c3_40, %c0_41, %c0_42] : memref<4x128x50xbf16, #tpu.memory_space<vmem>>, vector<1x128x50xbf16>
    %76 = vector.shape_cast %75 : vector<1x128x50xbf16> to vector<128x50xbf16>
    %cst_43 = arith.constant dense<0.000000e+00> : vector<32x50xf32>
    %77 = tpu.matmul %74, %76, %cst_43 {dimension_numbers = #tpu.dot_dimension_numbers<[1], [0], [0], [1], [0, 0, 1, 1], [], []>} : vector<32x128xbf16>, vector<128x50xbf16>, vector<32x50xf32> -> vector<32x50xf32>
    %78 = arith.addf %73, %77 : vector<32x50xf32>
    %c0_44 = arith.constant 0 : index
    %c0_45 = arith.constant 0 : index
    %79 = vector.load %arg7[%c0_44, %c0_45] : memref<1x50xf32, #tpu.memory_space<vmem>>, vector<1x50xf32>
    %80 = vector.broadcast %79 : vector<1x50xf32> to vector<32x50xf32>
    %81 = arith.addf %78, %80 : vector<32x50xf32>
    %cst_46 = arith.constant 0.000000e+00 : f32
    %82 = vector.broadcast %cst_46 : f32 to vector<32x50xf32>
    %83 = arith.maximumf %81, %82 : vector<32x50xf32>
    %84 = arith.truncf %83 : vector<32x50xf32> to vector<32x50xbf16>
    %c0_47 = arith.constant 0 : index
    %c0_48 = arith.constant 0 : index
    %85 = vector.load %arg8[%c0_47, %c0_48] : memref<50x32xbf16, #tpu.memory_space<vmem>>, vector<50x32xbf16>
    %cst_49 = arith.constant dense<0.000000e+00> : vector<32x32xf32>
    %86 = tpu.matmul %84, %85, %cst_49 {dimension_numbers = #tpu.dot_dimension_numbers<[1], [0], [0], [1], [0, 0, 1, 1], [], []>} : vector<32x50xbf16>, vector<50x32xbf16>, vector<32x32xf32> -> vector<32x32xf32>
    %c0_50 = arith.constant 0 : index
    %c0_51 = arith.constant 0 : index
    %87 = vector.load %arg9[%c0_50, %c0_51] : memref<1x32xf32, #tpu.memory_space<vmem>>, vector<1x32xf32>
    %88 = vector.broadcast %87 : vector<1x32xf32> to vector<32x32xf32>
    %89 = arith.addf %86, %88 : vector<32x32xf32>
    %c0_52 = arith.constant 0 : index
    %c0_53 = arith.constant 0 : index
    %c0_54 = arith.constant 0 : index
    %90 = vector.load %arg10[%c0_52, %c0_53, %c0_54] : memref<1x32x32xf32, #tpu.memory_space<vmem>>, vector<1x32x32xf32>
    %91 = vector.shape_cast %90 : vector<1x32x32xf32> to vector<32x32xf32>
    %92 = vector.shape_cast %89 : vector<32x32xf32> to vector<1x32x32xf32>
    tpu.vector_store %arg10[%c0_52, %c0_53, %c0_54], %92 {strides = array<i32>} : memref<1x32x32xf32, #tpu.memory_space<vmem>>, vector<1x32x32xf32>,
    return
  }
  func.func @transform_0(%arg0: i32) -> (i32, i32, i32) {
    %c0_i32 = arith.constant 0 : i32
    %c0_i32_0 = arith.constant 0 : i32
    %c0_i32_1 = arith.constant 0 : i32
    return %arg0, %c0_i32, %c0_i32_0 : i32, i32, i32
  }
  func.func @transform_1(%arg0: i32) -> (i32, i32) {
    %c0_i32 = arith.constant 0 : i32
    %c0_i32_0 = arith.constant 0 : i32
    %c0_i32_1 = arith.constant 0 : i32
    return %c0_i32, %c0_i32_0 : i32, i32
  }
  func.func @transform_2(%arg0: i32) -> (i32, i32) {
    %c0_i32 = arith.constant 0 : i32
    %c0_i32_0 = arith.constant 0 : i32
    %c0_i32_1 = arith.constant 0 : i32
    return %c0_i32, %c0_i32_0 : i32, i32
  }
  func.func @transform_3(%arg0: i32) -> (i32, i32, i32) {
    %c0_i32 = arith.constant 0 : i32
    %c0_i32_0 = arith.constant 0 : i32
    %c0_i32_1 = arith.constant 0 : i32
    %c0_i32_2 = arith.constant 0 : i32
    return %c0_i32, %c0_i32_0, %c0_i32_1 : i32, i32, i32
  }
  func.func @transform_4(%arg0: i32) -> (i32, i32) {
    %c0_i32 = arith.constant 0 : i32
    %c0_i32_0 = arith.constant 0 : i32
    %c0_i32_1 = arith.constant 0 : i32
    return %c0_i32, %c0_i32_0 : i32, i32
  }
  func.func @transform_5(%arg0: i32) -> (i32, i32, i32) {
    %c0_i32 = arith.constant 0 : i32
    %c0_i32_0 = arith.constant 0 : i32
    %c0_i32_1 = arith.constant 0 : i32
    %c0_i32_2 = arith.constant 0 : i32
    return %c0_i32, %c0_i32_0, %c0_i32_1 : i32, i32, i32
  }
  func.func @transform_6(%arg0: i32) -> (i32, i32) {
    %c0_i32 = arith.constant 0 : i32
    %c0_i32_0 = arith.constant 0 : i32
    %c0_i32_1 = arith.constant 0 : i32
    return %c0_i32, %c0_i32_0 : i32, i32
  }
  func.func @transform_7(%arg0: i32) -> (i32, i32) {
    %c0_i32 = arith.constant 0 : i32
    %c0_i32_0 = arith.constant 0 : i32
    %c0_i32_1 = arith.constant 0 : i32
    return %c0_i32, %c0_i32_0 : i32, i32
  }
  func.func @transform_8(%arg0: i32) -> (i32, i32) {
    %c0_i32 = arith.constant 0 : i32
    %c0_i32_0 = arith.constant 0 : i32
    %c0_i32_1 = arith.constant 0 : i32
    return %c0_i32, %c0_i32_0 : i32, i32
  }
  func.func @transform_9(%arg0: i32) -> (i32, i32, i32) {
    %c0_i32 = arith.constant 0 : i32
    %c0_i32_0 = arith.constant 0 : i32
    %c0_i32_1 = arith.constant 0 : i32
    return %arg0, %c0_i32, %c0_i32_0 : i32, i32, i32
  }
}

</mosaic_0001>

<bundles_post_ra>
// kernel: unbounded_grid_locnet_forward.1
= control target key start
LH: loop header
LB: loop body
LE: loop exit
PB: predicated region body
PF: predicated region fallthrough
CT: control target
= control target key end

     0   :  { %vm812_vm0 = vcmask 1045504   ;;  %vm667_vm1 = vcmask 97280   ;;  %vm4361_vm2 = vcmask 1040384   ;;  %vm4354_vm3 = vcmask 408576   ;;  %s8777_s1 = inlined_call_operand.vmem [shape: bf16[140,256], index: 1, kind: input, shape index: {}]   ;;  %s8778_s0 = inlined_call_operand.vmem [shape: bf16[1,768,140], index: 0, kind: input, shape index: {}]   ;;  %s8779_s2 = inlined_call_operand.vmem [shape: f32[1,128], index: 2, kind: input, shape index: {}]   ;;  %s8780_s3 = inlined_call_operand.vmem [shape: bf16[5,128,256], index: 3, kind: input, shape index: {}]   ;;  %s8781_s5 = inlined_call_operand.vmem [shape: bf16[4,128,50], index: 5, kind: input, shape index: {}]   ;;  %s8782_s4 = inlined_call_operand.vmem [shape: f32[1,128], index: 4, kind: input, shape index: {}]   ;;  %s8783_s6 = inlined_call_operand.vmem [shape: f32[1,50], index: 6, kind: input, shape index: {}]   ;;  %s8784_s8 = inlined_call_operand.vmem [shape: f32[1,32], index: 8, kind: input, shape index: {}]   ;;  %s8785_s7 = inlined_call_operand.vmem [shape: bf16[50,32], index: 7, kind: input, shape index: {}]   ;;  %s8786_s9 = inlined_call_operand.vmem [shape: f32[1,32,32], index: 9, kind: output, shape index: {}]  }
   0x1   :  { %v4835_v0 = vld [vmem:[%s8777_s1 + $0x70] sm:$0xf]  ;;  %v5630_v1 = vld [vmem:[%s8777_s1 + $0x74] sm:$0xf0]  ;;  %v4843_v2 = vld [vmem:[%s8777_s1 + $0x80] sm:$0xf] }
   0x2   :  { %v4836_v3 = vor.u32 %v5630_v1, %v4835_v0  ;;  %v5632_v4 = vld [vmem:[%s8777_s1 + $0x84] sm:$0x30]  ;;  %v4827_v5 = vld [vmem:[%s8777_s1 + $0x60] sm:$0xf]  ;;  %v5605_v8 = vld [vmem:[%s8778_s0 + $0x2b4] sm:$0xf] }
   0x3   :  { %v5628_v6 = vld [vmem:[%s8777_s1 + $0x64] sm:$0xf0]  ;;  %v4844_v7 = vor.u32 %v5632_v4, %v4843_v2  ;;  %v4741_v9 = vld [vmem:[%s8778_s0 + $0x2b8] sm:$0xf0]  ;;  %v4819_v13 = vld [vmem:[%s8777_s1 + $0x50] sm:$0xf] }
   0x4   :  { %819 = vmatpush.bf16.msra.mxu0 %v4836_v3  ;;  %v4828_v10 = vor.u32 %v5628_v6, %v4827_v5  ;;  %v5832_v12 = vor.u32 %v5605_v8, %v4741_v9  ;;  %v5626_v14 = vld [vmem:[%s8777_s1 + $0x54] sm:$0xf0]  ;;  %v4811_v16 = vld [vmem:[%s8777_s1 + $0x40] sm:$0xf]  ;;  %v5624_v17 = vld [vmem:[%s8777_s1 + $0x44] sm:$0xf0] }
   0x5   :  { %v814_v11 = vsel %vm812_vm0, %v4844_v7, 0  ;;  %v4820_v15 = vor.u32 %v5626_v14, %v4819_v13  ;;  %v5519_v18 = vld [vmem:[%s8778_s0 + $0x4] sm:$0xf]  ;;  %v4397_v19 = vld [vmem:[%s8778_s0 + $0x8] sm:$0xf0]  ;;  %v4812_v24 = vor.u32 %v5624_v17, %v4811_v16  ;;  %vm4384_vm4 = vcmask 261120  }
   0x6   :  { %5748 = vmatpush.bf16.msra.mxu2 %v814_v11  ;;  %1075 = vmatpush.bf16.msra.mxu1 %v814_v11  ;;  %v5854_v20 = vor.u32 %v5519_v18, %v4397_v19  ;;  %v5631_v21 = vld [vmem:[%s8777_s1 + $0x84] sm:$0xf]  ;;  %v4845_v22 = vld [vmem:[%s8777_s1 + $0x88] sm:$0x30]  ;;  %v4803_v25 = vld [vmem:[%s8777_s1 + $0x30] sm:$0xf] }
   0x7   :  { %v4848_v23 = vor.u32 %v5631_v21, %v4845_v22  ;;  %v5622_v26 = vld [vmem:[%s8777_s1 + $0x34] sm:$0xf0]  ;;  %v4795_v29 = vld [vmem:[%s8777_s1 + $0x20] sm:$0xf]  ;;  %v5620_v30 = vld [vmem:[%s8777_s1 + $0x24] sm:$0xf0] }
   0x8   :  { %820 = vmatpush.bf16.msra.mxu0 %v4828_v10  ;;  %v4804_v28 = vor.u32 %v5622_v26, %v4803_v25  ;;  %v5607_v31 = vld [vmem:[%s8778_s0 + $0x2c4] sm:$0xf]  ;;  %v4749_v32 = vld [vmem:[%s8778_s0 + $0x2c8] sm:$0xf0]  ;;  %v4796_v33 = vor.u32 %v5620_v30, %v4795_v29  ;;  %v4787_v34 = vld [vmem:[%s8777_s1 + $0x10] sm:$0xf] }
   0x9   :  { %4892 = vmatmul.msk.bf16.vlgmr.msra.gmra.mxu2 %vm667_vm1, %v5832_v12  ;;  %4849 = vmatmul.msk.bf16.vlgmr.msra.gmra.mxu1 %vm667_vm1, %v5854_v20  ;;  %v817_v27 = vsel %vm812_vm0, %v4848_v23, 0  ;;  %v5886_v35 = vor.u32 %v5607_v31, %v4749_v32  ;;  %v5618_v36 = vld [vmem:[%s8777_s1 + $0x14] sm:$0xf0]  ;;  %v5521_v37 = vld [vmem:[%s8778_s0 + $0x14] sm:$0xf] }
   0xa   :  { %5749 = vmatpush.bf16.msra.mxu3 %v817_v27  ;;  %v4405_v38 = vld [vmem:[%s8778_s0 + $0x18] sm:$0xf0]  ;;  %v5629_v39 = vld [vmem:[%s8777_s1 + $0x74] sm:$0xf]  ;;  %v4788_v41 = vor.u32 %v5618_v36, %v4787_v34  ;;  %v4779_v42 = vld [vmem:[%s8777_s1] sm:$0xf] }
   0xb   :  { %v4837_v40 = vld [vmem:[%s8777_s1 + $0x78] sm:$0xf0]  ;;  %v5906_v43 = vor.u32 %v5521_v37, %v4405_v38  ;;  %v5616_v45 = vld [vmem:[%s8777_s1 + $0x4] sm:$0xf0]  ;;  %v5627_v46 = vld [vmem:[%s8777_s1 + $0x64] sm:$0xf] }
   0xc   :  { %821 = vmatpush.bf16.msra.mxu0 %v4820_v15  ;;  %v4840_v44 = vor.u32 %v5629_v39, %v4837_v40  ;;  %v4829_v47 = vld [vmem:[%s8777_s1 + $0x68] sm:$0xf0]  ;;  %v5625_v49 = vld [vmem:[%s8777_s1 + $0x54] sm:$0xf]  ;;  %v4821_v50 = vld [vmem:[%s8777_s1 + $0x58] sm:$0xf0]  ;;  %v4780_v51 = vor.u32 %v5616_v45, %v4779_v42 }
   0xd   :  { %v4832_v48 = vor.u32 %v5627_v46, %v4829_v47  ;;  %v4395_v52 = vld [vmem:[%s8778_s0] sm:$0xf]  ;;  %v5520_v53 = vld [vmem:[%s8778_s0 + $0x4] sm:$0xf0]  ;;  %v4824_v54 = vor.u32 %v5625_v49, %v4821_v50  ;;  %v5609_v56 = vld [vmem:[%s8778_s0 + $0x2d4] sm:$0xf] }
   0xe   :  { %1317 = vmatpush.bf16.msrb.mxu2 %v4840_v44  ;;  %v5933_v55 = vor.u32 %v5520_v53, %v4395_v52  ;;  %v4757_v57 = vld [vmem:[%s8778_s0 + $0x2d8] sm:$0xf0]  ;;  %v5623_v58 = vld [vmem:[%s8777_s1 + $0x44] sm:$0xf]  ;;  %v4813_v59 = vld [vmem:[%s8777_s1 + $0x48] sm:$0xf0] }
   0xf   :  { %v4816_v60 = vor.u32 %v5623_v58, %v4813_v59  ;;  %v5948_v61 = vor.u32 %v5609_v56, %v4757_v57  ;;  %v5523_v62 = vld [vmem:[%s8778_s0 + $0x24] sm:$0xf]  ;;  %v4413_v63 = vld [vmem:[%s8778_s0 + $0x28] sm:$0xf0]  ;;  %v5621_v0 = vld [vmem:[%s8777_s1 + $0x34] sm:$0xf] }
  0x10   :  { %822 = vmatpush.bf16.msra.mxu0 %v4812_v24  ;;  %v4805_v1 = vld [vmem:[%s8777_s1 + $0x38] sm:$0xf0]  ;;  %v5962_v2 = vor.u32 %v5523_v62, %v4413_v63  ;;  %v5619_v4 = vld [vmem:[%s8777_s1 + $0x24] sm:$0xf]  ;;  %v4797_v5 = vld [vmem:[%s8777_s1 + $0x28] sm:$0xf0] }
  0x11   :  { %v4808_v3 = vor.u32 %v5621_v0, %v4805_v1  ;;  %v4800_v6 = vor.u32 %v5619_v4, %v4797_v5  ;;  %v5617_v7 = vld [vmem:[%s8777_s1 + $0x14] sm:$0xf]  ;;  %v4789_v8 = vld [vmem:[%s8777_s1 + $0x18] sm:$0xf0]  ;;  %v4403_v9 = vld [vmem:[%s8778_s0 + $0x10] sm:$0xf] }
  0x12   :  { %1318 = vmatpush.bf16.msrb.mxu2 %v4832_v48  ;;  %v5522_v10 = vld [vmem:[%s8778_s0 + $0x14] sm:$0xf0]  ;;  %v4792_v11 = vor.u32 %v5617_v7, %v4789_v8  ;;  %v5611_v14 = vld [vmem:[%s8778_s0 + $0x2e4] sm:$0xf]  ;;  %v4765_v15 = vld [vmem:[%s8778_s0 + $0x2e8] sm:$0xf0] }
  0x13   :  { %v4404_v13 = vor.u32 %v5522_v10, %v4403_v9  ;;  %v5615_v16 = vld [vmem:[%s8777_s1 + $0x4] sm:$0xf]  ;;  %v4781_v17 = vld [vmem:[%s8777_s1 + $0x8] sm:$0xf0]  ;;  %v5998_v19 = vor.u32 %v5611_v14, %v4765_v15  ;;  %v5525_v21 = vld [vmem:[%s8778_s0 + $0x34] sm:$0xf] }
  0x14   :  { %823 = vmatpush.bf16.msra.mxu0 %v4804_v28  ;;  %v4784_v18 = vor.u32 %v5615_v16, %v4781_v17  ;;  %v4421_v22 = vld [vmem:[%s8778_s0 + $0x38] sm:$0xf0]  ;;  %v4411_v24 = vld [vmem:[%s8778_s0 + $0x20] sm:$0xf]  ;;  %v5524_v25 = vld [vmem:[%s8778_s0 + $0x24] sm:$0xf0] }
  0x15   :  { %v6006_v23 = vor.u32 %v5525_v21, %v4421_v22  ;;  %v4412_v26 = vor.u32 %v5524_v25, %v4411_v24  ;;  %v4773_v28 = vld [vmem:[%s8778_s0 + $0x2f8] sm:$0xf0]  ;;  %v5527_v30 = vld [vmem:[%s8778_s0 + $0x44] sm:$0xf]  ;;  %v4429_v31 = vld [vmem:[%s8778_s0 + $0x48] sm:$0xf0] }
  0x16   :  { %1319 = vmatpush.bf16.msrb.mxu2 %v4824_v54  ;;  %v6032_v32 = vor.u32 %v5527_v30, %v4429_v31  ;;  %v5526_v34 = vld [vmem:[%s8778_s0 + $0x34] sm:$0xf0]  ;;  %v5529_v37 = vld [vmem:[%s8778_s0 + $0x54] sm:$0xf]  ;;  %v4437_v38 = vld [vmem:[%s8778_s0 + $0x58] sm:$0xf0] }
  0x17   :  { %v4440_v39 = vor.u32 %v5529_v37, %v4437_v38  ;;  %v4427_v40 = vld [vmem:[%s8778_s0 + $0x40] sm:$0xf]  ;;  %v5531_v44 = vld [vmem:[%s8778_s0 + $0x64] sm:$0xf]  ;;  %v4445_v45 = vld [vmem:[%s8778_s0 + $0x68] sm:$0xf0] }
  0x18   :  { %824 = vmatpush.bf16.msra.mxu0 %v4796_v33  ;;  %v4419_v33 = vld [vmem:[%s8778_s0 + $0x30] sm:$0xf]  ;;  %v4448_v46 = vor.u32 %v5531_v44, %v4445_v45  ;;  %v5530_v48 = vld [vmem:[%s8778_s0 + $0x54] sm:$0xf0]  ;;  %v5533_v50 = vld [vmem:[%s8778_s0 + $0x74] sm:$0xf] }
  0x19   :  { %4893 = vmatmul.msk.bf16.gmra.mxu2 %vm667_vm1, %v5886_v35  ;;  %4850 = vmatmul.msk.bf16.gmra.mxu1 %vm667_vm1, %v5906_v43  ;;  %v4420_v36 = vor.u32 %v5526_v34, %v4419_v33  ;;  %v4435_v47 = vld [vmem:[%s8778_s0 + $0x50] sm:$0xf]  ;;  %v4443_v53 = vld [vmem:[%s8778_s0 + $0x60] sm:$0xf]  ;;  %v5532_v54 = vld [vmem:[%s8778_s0 + $0x64] sm:$0xf0] }
  0x1a   :  { %1320 = vmatpush.bf16.msrb.mxu2 %v4816_v60  ;;  %4902 = vmatmul.msk.bf16.vlgmr.msra.gmra.mxu3 %vm667_vm1, %v4440_v39  ;;  %v4436_v49 = vor.u32 %v5530_v48, %v4435_v47  ;;  %v5535_v56 = vld [vmem:[%s8778_s0 + $0x84] sm:$0xf]  ;;  %v4461_v57 = vld [vmem:[%s8778_s0 + $0x88] sm:$0xf0]  ;;  %v4451_v62 = vld [vmem:[%s8778_s0 + $0x70] sm:$0xf] }
  0x1b   :  { %v4464_v58 = vor.u32 %v5535_v56, %v4461_v57  ;;  %v5534_v63 = vld [vmem:[%s8778_s0 + $0x74] sm:$0xf0]  ;;  %v4469_v4 = vld [vmem:[%s8778_s0 + $0x98] sm:$0xf0]  ;;  %v4459_v9 = vld [vmem:[%s8778_s0 + $0x80] sm:$0xf] }
  0x1c   :  { %825 = vmatpush.bf16.msra.mxu0 %v4788_v41  ;;  %v5528_v41 = vld [vmem:[%s8778_s0 + $0x44] sm:$0xf0]  ;;  %v4452_v0 = vor.u32 %v5534_v63, %v4451_v62  ;;  %v5539_v16 = vld [vmem:[%s8778_s0 + $0xa4] sm:$0xf]  ;;  %v4477_v17 = vld [vmem:[%s8778_s0 + $0xa8] sm:$0xf0] }
  0x1d   :  { %v4428_v42 = vor.u32 %v5528_v41, %v4427_v40  ;;  %v5536_v10 = vld [vmem:[%s8778_s0 + $0x84] sm:$0xf0]  ;;  %v4485_v37 = vld [vmem:[%s8778_s0 + $0xb8] sm:$0xf0]  ;;  %v4475_v45 = vld [vmem:[%s8778_s0 + $0xa0] sm:$0xf] }
  0x1e   :  { %1321 = vmatpush.bf16.msrb.mxu2 %v4808_v3  ;;  %v5537_v3 = vld [vmem:[%s8778_s0 + $0x94] sm:$0xf]  ;;  %v5542_v62 = vld [vmem:[%s8778_s0 + $0xb4] sm:$0xf0] }
  0x1f   :  { %v4472_v5 = vor.u32 %v5537_v3, %v4469_v4 }
  0x20   :  { %826 = vmatpush.bf16.msra.mxu0 %v4780_v51  ;;  %v4453_v51 = vld [vmem:[%s8778_s0 + $0x78] sm:$0xf0] }
  0x21   :  { %v4456_v52 = vor.u32 %v5533_v50, %v4453_v51  ;;  %v5543_v51 = vld [vmem:[%s8778_s0 + $0xc4] sm:$0xf] }
  0x22   :  { %1322 = vmatpush.bf16.msrb.mxu2 %v4800_v6 }
  0x23   :  { %827 = vmatmul.bf16.vlgmr.msra.gmra.mxu0 %v5933_v55 }
  0x24   :  { %1573 = vmatpush.bf16.msrb.mxu0 %v817_v27  ;;  %v5613_v27 = vld [vmem:[%s8778_s0 + $0x2f4] sm:$0xf] }
  0x25   :  { %v6024_v29 = vor.u32 %v5613_v27, %v4773_v28  ;;  %v4467_v27 = vld [vmem:[%s8778_s0 + $0x90] sm:$0xf]  ;;  %v5538_v28 = vld [vmem:[%s8778_s0 + $0x94] sm:$0xf0] }
  0x26   :  { %1323 = vmatpush.bf16.msrb.mxu2 %v4792_v11  ;;  %v6121_v11 = vor.u32 %v5536_v10, %v4459_v9  ;;  %v6146_v30 = vor.u32 %v5538_v28, %v4467_v27 }
  0x29   :  { %4894 = vmatmul.msk.bf16.gmra.mxu2 %vm667_vm1, %v5948_v61  ;;  %4851 = vmatmul.msk.bf16.gmra.mxu1 %vm667_vm1, %v5962_v2 }
  0x2a   :  { %1324 = vmatpush.bf16.msrb.mxu2 %v4784_v18  ;;  %4903 = vmatmul.msk.bf16.gmra.mxu3 %vm667_vm1, %v4448_v46  ;;  %v4480_v18 = vor.u32 %v5539_v16, %v4477_v17  ;;  %v4491_v17 = vld [vmem:[%s8778_s0 + $0xc0] sm:$0xf] }
  0x33   :  { %832 = vmatmul.bf16.gmra.mxu0 %v4404_v13 }
  0x39   :  { %4895 = vmatmul.msk.bf16.gmra.mxu2 %vm667_vm1, %v5998_v19  ;;  %4852 = vmatmul.msk.bf16.gmra.mxu1 %vm667_vm1, %v6006_v23 }
  0x3a   :  { %4904 = vmatmul.msk.bf16.gmra.mxu3 %vm667_vm1, %v4456_v52 }
  0x43   :  { %837 = vmatmul.bf16.gmra.mxu0 %v4412_v26 }
  0x49   :  { %4896 = vmatmul.msk.bf16.gmra.mxu2 %vm667_vm1, %v6024_v29  ;;  %4853 = vmatmul.msk.bf16.gmra.mxu1 %vm667_vm1, %v6032_v32 }
  0x4a   :  { %4905 = vmatmul.msk.bf16.gmra.mxu3 %vm667_vm1, %v4464_v58 }
  0x53   :  { %842 = vmatmul.bf16.gmra.mxu0 %v4420_v36 }
  0x59   :  { %1325 = vmatmul.bf16.vlgmr.msrb.gmra.mxu2 %v5933_v55  ;;  %4854 = vmatmul.msk.bf16.gmra.mxu1 %vm667_vm1, %v4440_v39  ;;  %v4444_v55 = vor.u32 %v5532_v54, %v4443_v53 }
  0x5a   :  { %4906 = vmatmul.msk.bf16.gmra.mxu3 %vm667_vm1, %v4472_v5 }
  0x63   :  { %847 = vmatmul.bf16.gmra.mxu0 %v4428_v42 }
  0x69   :  { %1330 = vmatmul.bf16.gmra.mxu2 %v4404_v13  ;;  %4855 = vmatmul.msk.bf16.gmra.mxu1 %vm667_vm1, %v4448_v46  ;;  %v5540_v46 = vld [vmem:[%s8778_s0 + $0xa4] sm:$0xf0] }
  0x6a   :  { %4907 = vmatmul.msk.bf16.gmra.mxu3 %vm667_vm1, %v4480_v18  ;;  %v6171_v47 = vor.u32 %v5540_v46, %v4475_v45  ;;  %v4499_v45 = vld [vmem:[%s8778_s0 + $0xd0] sm:$0xf]  ;;  %v5546_v46 = vld [vmem:[%s8778_s0 + $0xd4] sm:$0xf0] }
  0x73   :  { %852 = vmatmul.bf16.gmra.mxu0 %v4436_v49 }
  0x79   :  { %1335 = vmatmul.bf16.gmra.mxu2 %v4412_v26  ;;  %4856 = vmatmul.msk.bf16.gmra.mxu1 %vm667_vm1, %v4456_v52  ;;  %v4493_v52 = vld [vmem:[%s8778_s0 + $0xc8] sm:$0xf0] }
  0x7a   :  { %v4496_v53 = vor.u32 %v5543_v51, %v4493_v52 }
  0x83   :  { %857 = vmatmul.bf16.gmra.mxu0 %v4444_v55 }
  0x86   :  { %v1077_v59 = vpop.f32.mrf.mxu1 }
  0x89   :  { %1340 = vmatmul.bf16.gmra.mxu2 %v4420_v36  ;;  %4857 = vmatmul.msk.bf16.gmra.mxu1 %vm667_vm1, %v4464_v58  ;;  %v5541_v36 = vld [vmem:[%s8778_s0 + $0xb4] sm:$0xf] }
  0x8a   :  { %v4488_v38 = vor.u32 %v5541_v36, %v4485_v37 }
  0x8c   :  { %v6094_v60 = vpop.f32.mrf.mxu2  ;;  %4908 = vmatmul.msk.bf16.gmra.mxu3 %vm667_vm1, %v4488_v38 }
  0x8e   :  { %v1079_v1 = vpop.f32.mrf.mxu1 }
  0x93   :  { %862 = vmatmul.bf16.gmra.mxu0 %v4452_v0 }
  0x94   :  { %v6109_v6 = vpop.f32.mrf.mxu2 }
  0x95   :  { %8801 = vst [vmem:[#allocation2_spill] sm:$0xff] %v6109_v6 }
  0x96   :  { %v1082_v7 = vpop.f32.mrf.mxu1 }
  0x99   :  { %1345 = vmatmul.bf16.gmra.mxu2 %v4428_v42  ;;  %4858 = vmatmul.msk.bf16.gmra.mxu1 %vm667_vm1, %v4472_v5  ;;  %v4501_v5 = vld [vmem:[%s8778_s0 + $0xd8] sm:$0xf0] }
  0x9c   :  { %v6112_v8 = vpop.f32.mrf.mxu2  ;;  %4909 = vmatmul.msk.bf16.gmra.mxu3 %vm667_vm1, %v4496_v53 }
  0x9e   :  { %v1084_v15 = vpop.f32.mrf.mxu1 }
  0xa0   :  { %v828_v13 = vpop.f32.mrf.mxu0 }
  0xa1   :  { %v6123_v14 = vadd.f32 %v1077_v59, %v828_v13  ;;  %v4483_v59 = vld [vmem:[%s8778_s0 + $0xb0] sm:$0xf] }
  0xa2   :  { %v6196_v63 = vor.u32 %v5542_v62, %v4483_v59 }
  0xa3   :  { %867 = vmatmul.bf16.gmra.mxu0 %v6121_v11 }
  0xa4   :  { %v6132_v21 = vpop.f32.mrf.mxu2 }
  0xa5   :  { %8802 = vst [vmem:[#allocation3_spill] sm:$0xff] %v6132_v21  ;;  %v4531_v21 = vld [vmem:[%s8778_s0 + $0x110] sm:$0xf] }
  0xa6   :  { %v1087_v25 = vpop.f32.mrf.mxu1 }
  0xa8   :  { %v830_v22 = vpop.f32.mrf.mxu0 }
  0xa9   :  { %v6135_v24 = vadd.f32 %v1079_v1, %v830_v22  ;;  %1350 = vmatmul.bf16.gmra.mxu2 %v4436_v49  ;;  %4859 = vmatmul.msk.bf16.gmra.mxu1 %vm667_vm1, %v4480_v18  ;;  %v5544_v18 = vld [vmem:[%s8778_s0 + $0xc4] sm:$0xf0] }
  0xaa   :  { %v6222_v22 = vor.u32 %v5544_v18, %v4491_v17  ;;  %v4525_v18 = vld [vmem:[%s8778_s0 + $0x108] sm:$0xf0] }
  0xac   :  { %v6137_v26 = vpop.f32.mrf.mxu2 }
  0xae   :  { %v1089_v34 = vpop.f32.mrf.mxu1 }
  0xb0   :  { %v833_v31 = vpop.f32.mrf.mxu0 }
  0xb1   :  { %v6148_v33 = vadd.f32 %v1082_v7, %v833_v31  ;;  %v4509_v31 = vld [vmem:[%s8778_s0 + $0xe8] sm:$0xf0] }
  0xb3   :  { %8803 = vst [vmem:[#allocation4_spill] sm:$0xff] %v6148_v33  ;;  %872 = vmatmul.bf16.gmra.mxu0 %v6146_v30  ;;  %v4589_v33 = vld [vmem:[%s8778_s0 + $0x188] sm:$0xf0] }
  0xb4   :  { %v6157_v39 = vpop.f32.mrf.mxu2 }
  0xb5   :  { %8804 = vst [vmem:[#allocation5_spill] sm:$0xff] %v6157_v39 }
  0xb6   :  { %v1092_v42 = vpop.f32.mrf.mxu1 }
  0xb8   :  { %v835_v40 = vpop.f32.mrf.mxu0 }
  0xb9   :  { %v6160_v41 = vadd.f32 %v1084_v15, %v835_v40  ;;  %1355 = vmatmul.bf16.gmra.mxu2 %v4444_v55  ;;  %4860 = vmatmul.msk.bf16.gmra.mxu1 %vm667_vm1, %v4488_v38 }
  0xbb   :  { %8805 = vst [vmem:[#allocation6_spill] sm:$0xff] %v6160_v41 }
  0xbc   :  { %v6162_v44 = vpop.f32.mrf.mxu2 }
  0xbe   :  { %v1094_v50 = vpop.f32.mrf.mxu1 }
  0xc0   :  { %v838_v48 = vpop.f32.mrf.mxu0 }
  0xc1   :  { %v6173_v49 = vadd.f32 %v1087_v25, %v838_v48  ;;  %v6248_v48 = vor.u32 %v5546_v46, %v4499_v45  ;;  %v5550_v45 = vld [vmem:[%s8778_s0 + $0xf4] sm:$0xf0]  ;;  %v1600_v46 = vpop.f32.mrf.mxu3 }
  0xc3   :  { %877 = vmatmul.bf16.gmra.mxu0 %v6171_v47 }
  0xc4   :  { %v6182_v54 = vpop.f32.mrf.mxu2 }
  0xc5   :  { %8806 = vst [vmem:[#allocation7_spill] sm:$0xff] %v6182_v54 }
  0xc6   :  { %v1097_v57 = vpop.f32.mrf.mxu1 }
  0xc8   :  { %v840_v55 = vpop.f32.mrf.mxu0 }
  0xc9   :  { %v6185_v56 = vadd.f32 %v1089_v34, %v840_v55  ;;  %1360 = vmatmul.bf16.gmra.mxu2 %v4452_v0  ;;  %4861 = vmatmul.msk.bf16.gmra.mxu1 %vm667_vm1, %v4496_v53  ;;  %v5545_v0 = vld [vmem:[%s8778_s0 + $0xd4] sm:$0xf]  ;;  %v4517_v53 = vld [vmem:[%s8778_s0 + $0xf8] sm:$0xf0] }
  0xca   :  { %v4504_v7 = vor.u32 %v5545_v0, %v4501_v5  ;;  %v4507_v0 = vld [vmem:[%s8778_s0 + $0xe0] sm:$0xf]  ;;  %v5548_v5 = vld [vmem:[%s8778_s0 + $0xe4] sm:$0xf0] }
  0xcb   :  { %8807 = vst [vmem:[#allocation8_spill] sm:$0xff] %v6185_v56 }
  0xcc   :  { %v6187_v58 = vpop.f32.mrf.mxu2  ;;  %4910 = vmatmul.msk.bf16.gmra.mxu3 %vm667_vm1, %v4504_v7 }
  0xcd   :  { %8808 = vst [vmem:[#allocation9_spill] sm:$0xff] %v6187_v58 }
  0xce   :  { %v1099_v4 = vpop.f32.mrf.mxu1 }
  0xd0   :  { %v843_v1 = vpop.f32.mrf.mxu0 }
  0xd1   :  { %v6198_v3 = vadd.f32 %v1092_v42, %v843_v1 }
  0xd3   :  { %8809 = vst [vmem:[#allocation10_spill] sm:$0xff] %v6198_v3  ;;  %882 = vmatmul.bf16.gmra.mxu0 %v6196_v63  ;;  %v5563_v3 = vld [vmem:[%s8778_s0 + $0x164] sm:$0xf] }
  0xd4   :  { %v6207_v9 = vpop.f32.mrf.mxu2 }
  0xd5   :  { %8810 = vst [vmem:[#allocation11_spill] sm:$0xff] %v6207_v9  ;;  %v5021_v9 = vld [vmem:[%s8780_s3 + $0xf8] sm:$0xf0] }
  0xd6   :  { %v1102_v15 = vpop.f32.mrf.mxu1 }
  0xd8   :  { %v845_v10 = vpop.f32.mrf.mxu0 }
  0xd9   :  { %v6210_v13 = vadd.f32 %v1094_v50, %v845_v10  ;;  %1365 = vmatmul.bf16.gmra.mxu2 %v6121_v11  ;;  %4862 = vmatmul.msk.bf16.gmra.mxu1 %vm667_vm1, %v4504_v7  ;;  %v5547_v11 = vld [vmem:[%s8778_s0 + $0xe4] sm:$0xf]  ;;  %v6274_v7 = vor.u32 %v5548_v5, %v4507_v0  ;;  %v1602_v5 = vpop.f32.mrf.mxu3 }
  0xda   :  { %v4512_v34 = vor.u32 %v5547_v11, %v4509_v31 }
  0xdb   :  { %8811 = vst [vmem:[#allocation12_spill] sm:$0xff] %v6210_v13 }
  0xdc   :  { %v6213_v16 = vpop.f32.mrf.mxu2  ;;  %4911 = vmatmul.msk.bf16.gmra.mxu3 %vm667_vm1, %v4512_v34 }
  0xde   :  { %v1104_v28 = vpop.f32.mrf.mxu1 }
  0xe0   :  { %v848_v25 = vpop.f32.mrf.mxu0 }
  0xe1   :  { %v6224_v27 = vadd.f32 %v1097_v57, %v848_v25 }
  0xe3   :  { %8812 = vst [vmem:[#allocation13_spill] sm:$0xff] %v6224_v27  ;;  %887 = vmatmul.bf16.gmra.mxu0 %v6222_v22  ;;  %v4549_v27 = vld [vmem:[%s8778_s0 + $0x138] sm:$0xf0] }
  0xe4   :  { %v6233_v36 = vpop.f32.mrf.mxu2 }
  0xe6   :  { %v1107_v40 = vpop.f32.mrf.mxu1 }
  0xe8   :  { %v850_v37 = vpop.f32.mrf.mxu0 }
  0xe9   :  { %v6236_v38 = vadd.f32 %v1099_v4, %v850_v37  ;;  %1370 = vmatmul.bf16.gmra.mxu2 %v6146_v30  ;;  %4863 = vmatmul.msk.bf16.gmra.mxu1 %vm667_vm1, %v4512_v34  ;;  %v5549_v30 = vld [vmem:[%s8778_s0 + $0xf4] sm:$0xf] }
  0xea   :  { %v4520_v55 = vor.u32 %v5549_v30, %v4517_v53  ;;  %v5553_v53 = vld [vmem:[%s8778_s0 + $0x114] sm:$0xf] }
  0xeb   :  { %8813 = vst [vmem:[#allocation14_spill] sm:$0xff] %v6236_v38 }
  0xec   :  { %v6239_v42 = vpop.f32.mrf.mxu2  ;;  %4912 = vmatmul.msk.bf16.gmra.mxu3 %vm667_vm1, %v4520_v55 }
  0xed   :  { %8814 = vst [vmem:[#allocation15_spill] sm:$0xff] %v6239_v42 }
  0xee   :  { %v1109_v52 = vpop.f32.mrf.mxu1 }
  0xf0   :  { %v853_v50 = vpop.f32.mrf.mxu0 }
  0xf1   :  { %v6250_v51 = vadd.f32 %v1102_v15, %v853_v50 }
  0xf3   :  { %892 = vmatmul.bf16.gmra.mxu0 %v6248_v48 }
  0xf4   :  { %v6259_v57 = vpop.f32.mrf.mxu2 }
  0xf5   :  { %8815 = vst [vmem:[#allocation16_spill] sm:$0xff] %v6259_v57 }
  0xf6   :  { %v1112_v1 = vpop.f32.mrf.mxu1 }
  0xf8   :  { %v855_v59 = vpop.f32.mrf.mxu0 }
  0xf9   :  { %v6262_v62 = vadd.f32 %v1104_v28, %v855_v59  ;;  %1375 = vmatmul.bf16.gmra.mxu2 %v6171_v47  ;;  %4864 = vmatmul.msk.bf16.gmra.mxu1 %vm667_vm1, %v4520_v55  ;;  %v5551_v47 = vld [vmem:[%s8778_s0 + $0x104] sm:$0xf]  ;;  %v4533_v55 = vld [vmem:[%s8778_s0 + $0x118] sm:$0xf0] }
  0xfa   :  { %v4528_v25 = vor.u32 %v5551_v47, %v4525_v18  ;;  %v4536_v59 = vor.u32 %v5553_v53, %v4533_v55  ;;  %v5555_v53 = vld [vmem:[%s8778_s0 + $0x124] sm:$0xf]  ;;  %v4541_v55 = vld [vmem:[%s8778_s0 + $0x128] sm:$0xf0] }
  0xfc   :  { %v6265_v4 = vpop.f32.mrf.mxu2  ;;  %4913 = vmatmul.msk.bf16.gmra.mxu3 %vm667_vm1, %v4528_v25 }
  0xfe   :  { %v1114_v17 = vpop.f32.mrf.mxu1 }
 0x100   :  { %v858_v10 = vpop.f32.mrf.mxu0 }
 0x101   :  { %v6276_v15 = vadd.f32 %v1107_v40, %v858_v10  ;;  %v4515_v40 = vld [vmem:[%s8778_s0 + $0xf0] sm:$0xf] }
 0x102   :  { %v6300_v50 = vor.u32 %v5550_v45, %v4515_v40  ;;  %v1605_v40 = vpop.f32.mrf.mxu3 }
 0x103   :  { %8816 = vst [vmem:[#allocation17_spill] sm:$0xff] %v6276_v15  ;;  %897 = vmatmul.bf16.gmra.mxu0 %v6274_v7 }
 0x104   :  { %v6285_v28 = vpop.f32.mrf.mxu2 }
 0x106   :  { %v1117_v34 = vpop.f32.mrf.mxu1 }
 0x108   :  { %v860_v11 = vpop.f32.mrf.mxu0 }
 0x109   :  { %v6288_v31 = vadd.f32 %v1109_v52, %v860_v11  ;;  %1380 = vmatmul.bf16.gmra.mxu2 %v6196_v63  ;;  %4865 = vmatmul.msk.bf16.gmra.mxu1 %vm667_vm1, %v4528_v25  ;;  %v4523_v25 = vld [vmem:[%s8778_s0 + $0x100] sm:$0xf]  ;;  %v5552_v11 = vld [vmem:[%s8778_s0 + $0x104] sm:$0xf0] }
 0x10a   :  { %v6326_v45 = vor.u32 %v5552_v11, %v4523_v25 }
 0x10b   :  { %8817 = vst [vmem:[#allocation18_spill] sm:$0xff] %v6288_v31 }
 0x10c   :  { %v6291_v37 = vpop.f32.mrf.mxu2  ;;  %4914 = vmatmul.msk.bf16.gmra.mxu3 %vm667_vm1, %v4536_v59 }
 0x10d   :  { %8818 = vst [vmem:[#allocation19_spill] sm:$0xff] %v6291_v37 }
 0x10e   :  { %v1119_v63 = vpop.f32.mrf.mxu1 }
 0x110   :  { %v863_v52 = vpop.f32.mrf.mxu0 }
 0x111   :  { %v6302_v30 = vadd.f32 %v1112_v1, %v863_v52 }
 0x113   :  { %902 = vmatmul.bf16.gmra.mxu0 %v6300_v50 }
 0x114   :  { %v6311_v0 = vpop.f32.mrf.mxu2 }
 0x115   :  { %8819 = vst [vmem:[#allocation20_spill] sm:$0xff] %v6311_v0 }
 0x116   :  { %v1122_v47 = vpop.f32.mrf.mxu1 }
 0x118   :  { %v865_v10 = vpop.f32.mrf.mxu0 }
 0x119   :  { %v6314_v1 = vadd.f32 %v1114_v17, %v865_v10  ;;  %1385 = vmatmul.bf16.gmra.mxu2 %v6222_v22  ;;  %4866 = vmatmul.msk.bf16.gmra.mxu1 %vm667_vm1, %v4536_v59  ;;  %v4544_v10 = vor.u32 %v5555_v53, %v4541_v55  ;;  %v1607_v59 = vpop.f32.mrf.mxu3 }
 0x11c   :  { %v6317_v18 = vpop.f32.mrf.mxu2  ;;  %4915 = vmatmul.msk.bf16.gmra.mxu3 %vm667_vm1, %v4544_v10 }
 0x11d   :  { %8820 = vst [vmem:[#allocation21_spill] sm:$0xff] %v6317_v18  ;;  %v5559_v18 = vld [vmem:[%s8778_s0 + $0x144] sm:$0xf] }
 0x11e   :  { %v1124_v22 = vpop.f32.mrf.mxu1 }
 0x120   :  { %v868_v17 = vpop.f32.mrf.mxu0 }
 0x121   :  { %v6328_v52 = vadd.f32 %v1117_v34, %v868_v17  ;;  %v5663_v17 = vld [vmem:[%s8780_s3 + $0xf4] sm:$0xf] }
 0x122   :  { %v5024_v53 = vor.u32 %v5663_v17, %v5021_v9 }
 0x123   :  { %907 = vmatmul.bf16.gmra.mxu0 %v6326_v45 }
 0x124   :  { %v6337_v39 = vpop.f32.mrf.mxu2  ;;  %2405 = vmatpush.bf16.msrb.mxu3 %v5024_v53 }
 0x125   :  { %8821 = vst [vmem:[#allocation22_spill] sm:$0xff] %v6337_v39  ;;  %v5557_v39 = vld [vmem:[%s8778_s0 + $0x134] sm:$0xf] }
 0x126   :  { %v1127_v11 = vpop.f32.mrf.mxu1 }
 0x128   :  { %v870_v25 = vpop.f32.mrf.mxu0 }
 0x129   :  { %v6340_v34 = vadd.f32 %v1119_v63, %v870_v25  ;;  %1390 = vmatmul.bf16.gmra.mxu2 %v6248_v48  ;;  %v5554_v63 = vld [vmem:[%s8778_s0 + $0x114] sm:$0xf0]  ;;  %4867 = vmatmul.msk.bf16.gmra.mxu1 %vm667_vm1, %v4544_v10  ;;  %v1610_v48 = vpop.f32.mrf.mxu3  ;;  %v4552_v10 = vor.u32 %v5557_v39, %v4549_v27 }
 0x12a   :  { %v6357_v6 = vor.u32 %v5554_v63, %v4531_v21  ;;  %v5664_v39 = vld [vmem:[%s8780_s3 + $0xf4] sm:$0xf0] }
 0x12c   :  { %v1351_v55 = vpop.f32.mrf.mxu2 }
 0x12d   :  { %v1601_v25 = vadd.f32 %v1600_v46, %v1351_v55  ;;  %v5019_v55 = vld [vmem:[%s8780_s3 + $0xf0] sm:$0xf] }
 0x12e   :  { %v1129_v17 = vpop.f32.mrf.mxu1  ;;  %v5020_v63 = vor.u32 %v5664_v39, %v5019_v55 }
 0x12f   :  { %v1825_v54 = vmax.f32 %v6250_v51, %v1601_v25 }
 0x130   :  { %v873_v38 = vpop.f32.mrf.mxu0  ;;  %2316 = vmatpush.bf16.msrb.mxu1 %v5020_v63 }
 0x131   :  { %v6359_v9 = vadd.f32 %v1122_v47, %v873_v38  ;;  %v1612_v53 = vpop.f32.mrf.mxu3  ;;  %4916 = vmatmul.msk.bf16.gmra.mxu3 %vm667_vm1, %v4552_v10 }
 0x133   :  { %912 = vmatmul.bf16.gmra.mxu0 %v6357_v6 }
 0x134   :  { %v1353_v46 = vpop.f32.mrf.mxu2 }
 0x135   :  { %v1603_v51 = vadd.f32 %v1602_v5, %v1353_v46 }
 0x136   :  { %v1132_v27 = vpop.f32.mrf.mxu1 }
 0x137   :  { %v1826_v21 = vmax.f32 %v6262_v62, %v1603_v51  ;;  %v4539_v62 = vld [vmem:[%s8778_s0 + $0x120] sm:$0xf] }
 0x138   :  { %v875_v38 = vpop.f32.mrf.mxu0 }
 0x139   :  { %v6370_v47 = vadd.f32 %v1124_v22, %v875_v38  ;;  %1395 = vmatmul.bf16.gmra.mxu2 %v6274_v7  ;;  %v5556_v22 = vld [vmem:[%s8778_s0 + $0x124] sm:$0xf0]  ;;  %v1615_v7 = vpop.f32.mrf.mxu3  ;;  %4868 = vmatmul.msk.bf16.gmra.mxu1 %vm667_vm1, %v4552_v10 }
 0x13a   :  { %v6390_v51 = vor.u32 %v5556_v22, %v4539_v62 }
 0x13c   :  { %v1356_v5 = vpop.f32.mrf.mxu2 }
 0x13d   :  { %v6385_v25 = vadd.f32 %v1605_v40, %v1356_v5  ;;  %v4557_v40 = vld [vmem:[%s8778_s0 + $0x148] sm:$0xf0] }
 0x13e   :  { %v1134_v39 = vpop.f32.mrf.mxu1  ;;  %v4560_v10 = vor.u32 %v5559_v18, %v4557_v40  ;;  %v4547_v18 = vld [vmem:[%s8778_s0 + $0x130] sm:$0xf] }
 0x13f   :  { %8822 = vst [vmem:[#allocation23_spill] sm:$0xff] %v6385_v25 }
 0x140   :  { %v878_v38 = vpop.f32.mrf.mxu0 }
 0x141   :  { %v6392_v55 = vadd.f32 %v1127_v11, %v878_v38  ;;  %v1617_v5 = vpop.f32.mrf.mxu3  ;;  %4917 = vmatmul.msk.bf16.gmra.mxu3 %vm667_vm1, %v4560_v10 }
 0x143   :  { %917 = vmatmul.bf16.gmra.mxu0 %v6390_v51 }
 0x144   :  { %v1358_v63 = vpop.f32.mrf.mxu2 }
 0x145   :  { %v6401_v46 = vadd.f32 %v1607_v59, %v1358_v63  ;;  %v5558_v59 = vld [vmem:[%s8778_s0 + $0x134] sm:$0xf0] }
 0x146   :  { %v1137_v38 = vpop.f32.mrf.mxu1 }
 0x147   :  { %8823 = vst [vmem:[#allocation24_spill] sm:$0xff] %v6401_v46  ;;  %v6422_v46 = vld [vmem:[%s8779_s2] ss:$0 sm:$0xff] }
 0x148   :  { %v880_v62 = vpop.f32.mrf.mxu0 }
 0x149   :  { %v6406_v22 = vadd.f32 %v1129_v17, %v880_v62  ;;  %1400 = vmatmul.bf16.gmra.mxu2 %v6300_v50  ;;  %v1620_v40 = vpop.f32.mrf.mxu3  ;;  %4869 = vmatmul.msk.bf16.gmra.mxu1 %vm667_vm1, %v4560_v10  ;;  %v6417_v17 = vor.u32 %v5558_v59, %v4547_v18 }
 0x14c   :  { %v1361_v25 = vpop.f32.mrf.mxu2 }
 0x14d   :  { %v1611_v63 = vadd.f32 %v1610_v48, %v1361_v25  ;;  %v5561_v48 = vld [vmem:[%s8778_s0 + $0x154] sm:$0xf] }
 0x14e   :  { %v1139_v15 = vpop.f32.mrf.mxu1 }
 0x14f   :  { %v1829_v11 = vmax.f32 %v6302_v30, %v1611_v63  ;;  %v4565_v30 = vld [vmem:[%s8778_s0 + $0x158] sm:$0xf0] }
 0x150   :  { %v883_v62 = vpop.f32.mrf.mxu0  ;;  %v4568_v25 = vor.u32 %v5561_v48, %v4565_v30 }
 0x151   :  { %v1917_v50 = vmax.f32 %v1825_v54, %v1829_v11  ;;  %v6424_v31 = vadd.f32 %v1132_v27, %v883_v62  ;;  %v1622_v10 = vpop.f32.mrf.mxu3 }
 0x152   :  { %4918 = vmatmul.msk.bf16.gmra.mxu3 %vm667_vm1, %v4568_v25 }
 0x153   :  { %922 = vmatmul.bf16.gmra.mxu0 %v6417_v17  ;;  %v1969_v11 = vadd.f32 %v6422_v46, %v1917_v50  ;;  %v4555_v50 = vld [vmem:[%s8778_s0 + $0x140] sm:$0xf] }
 0x154   :  { %v1363_v54 = vpop.f32.mrf.mxu2 }
 0x155   :  { %v1613_v18 = vadd.f32 %v1612_v53, %v1363_v54  ;;  %v2017_v63 = vmax.f32 %v1969_v11, 0.0  ;;  %v5560_v53 = vld [vmem:[%s8778_s0 + $0x144] sm:$0xf0] }
 0x156   :  { %v1142_v41 = vpop.f32.mrf.mxu1  ;;  %v6448_v11 = vor.u32 %v5560_v53, %v4555_v50 }
 0x157   :  { %v1830_v27 = vmax.f32 %v6314_v1, %v1613_v18  ;;  %v2065_v30 = vpack.c.bf16 %v2017_v63, %v2017_v63 }
 0x158   :  { %v885_v59 = vpop.f32.mrf.mxu0 }
 0x159   :  { %v1918_v62 = vmax.f32 %v1826_v21, %v1830_v27  ;;  %v6436_v13 = vadd.f32 %v1134_v39, %v885_v59  ;;  %1405 = vmatmul.bf16.gmra.mxu2 %v6326_v45  ;;  %v1625_v1 = vpop.f32.mrf.mxu3  ;;  %4870 = vmatmul.msk.bf16.gmra.mxu1 %vm667_vm1, %v4568_v25  ;;  %v2174_v27 = vunpack.c.l.b16 %v2065_v30 }
 0x15b   :  { %v1970_v0 = vadd.f32 %v6422_v46, %v1918_v62 }
 0x15c   :  { %v1366_v48 = vpop.f32.mrf.mxu2 }
 0x15d   :  { %v2018_v54 = vmax.f32 %v1970_v0, 0.0  ;;  %v1616_v21 = vadd.f32 %v1615_v7, %v1366_v48  ;;  %v4573_v0 = vld [vmem:[%s8778_s0 + $0x168] sm:$0xf0] }
 0x15e   :  { %v1144_v57 = vpop.f32.mrf.mxu1  ;;  %v4576_v7 = vor.u32 %v5563_v3, %v4573_v0  ;;  %v4563_v3 = vld [vmem:[%s8778_s0 + $0x150] sm:$0xf] }
 0x15f   :  { %v2066_v39 = vpack.c.bf16 %v2018_v54, %v2018_v54  ;;  %v1831_v45 = vmax.f32 %v6328_v52, %v1616_v21 }
 0x160   :  { %v888_v18 = vpop.f32.mrf.mxu0 }
 0x161   :  { %v2175_v59 = vunpack.c.l.b16 %v2066_v39  ;;  %v6450_v62 = vadd.f32 %v1137_v38, %v888_v18  ;;  %v1627_v63 = vpop.f32.mrf.mxu3 }
 0x162   :  { %4919 = vmatmul.msk.bf16.gmra.mxu3 %vm667_vm1, %v4576_v7 }
 0x163   :  { %927 = vmatmul.bf16.gmra.mxu0 %v6448_v11  ;;  %v6459_v52 = vpack.c.b16 %v2175_v59, %v2174_v27  ;;  %v5565_v59 = vld [vmem:[%s8778_s0 + $0x174] sm:$0xf] }
 0x164   :  { %v1368_v25 = vpop.f32.mrf.mxu2 }
 0x165   :  { %8824 = vst [vmem:[#allocation25_spill] sm:$0xff] %v6459_v52  ;;  %v6461_v48 = vadd.f32 %v1617_v5, %v1368_v25  ;;  %v5562_v5 = vld [vmem:[%s8778_s0 + $0x154] sm:$0xf0]  ;;  %v5567_v52 = vld [vmem:[%s8778_s0 + $0x184] sm:$0xf] }
 0x166   :  { %v1147_v30 = vpop.f32.mrf.mxu1 }
 0x167   :  { %v1832_v38 = vmax.f32 %v6340_v34, %v6461_v48 }
 0x168   :  { %v890_v50 = vpop.f32.mrf.mxu0 }
 0x169   :  { %v6466_v53 = vadd.f32 %v1139_v15, %v890_v50  ;;  %1410 = vmatmul.bf16.gmra.mxu2 %v6357_v6  ;;  %v6475_v21 = vpop.f32.mrf.mxu3  ;;  %4871 = vmatmul.msk.bf16.gmra.mxu1 %vm667_vm1, %v4576_v7  ;;  %v6482_v6 = vor.u32 %v5562_v5, %v4563_v3 }
 0x16c   :  { %v1371_v54 = vpop.f32.mrf.mxu2 }
 0x16d   :  { %v6477_v39 = vadd.f32 %v1620_v40, %v1371_v54  ;;  %v4581_v40 = vld [vmem:[%s8778_s0 + $0x178] sm:$0xf0] }
 0x16e   :  { %v1149_v27 = vpop.f32.mrf.mxu1  ;;  %v4584_v0 = vor.u32 %v5565_v59, %v4581_v40 }
 0x170   :  { %v893_v34 = vpop.f32.mrf.mxu0 }
 0x171   :  { %v6484_v18 = vadd.f32 %v1142_v41, %v893_v34  ;;  %v6493_v25 = vpop.f32.mrf.mxu3  ;;  %v4571_v34 = vld [vmem:[%s8778_s0 + $0x160] sm:$0xf] }
 0x172   :  { %4920 = vmatmul.msk.bf16.gmra.mxu3 %vm667_vm1, %v4584_v0 }
 0x173   :  { %932 = vmatmul.bf16.gmra.mxu0 %v6482_v6 }
 0x174   :  { %v1373_v7 = vpop.f32.mrf.mxu2 }
 0x175   :  { %v6495_v48 = vadd.f32 %v1622_v10, %v1373_v7  ;;  %v5564_v10 = vld [vmem:[%s8778_s0 + $0x164] sm:$0xf0] }
 0x176   :  { %v1152_v3 = vpop.f32.mrf.mxu1  ;;  %v6513_v7 = vor.u32 %v5564_v10, %v4571_v34 }
 0x178   :  { %v895_v50 = vpop.f32.mrf.mxu0 }
 0x179   :  { %v6500_v54 = vadd.f32 %v1144_v57, %v895_v50  ;;  %1415 = vmatmul.bf16.gmra.mxu2 %v6390_v51  ;;  %v6509_v59 = vpop.f32.mrf.mxu3  ;;  %4872 = vmatmul.msk.bf16.gmra.mxu1 %vm667_vm1, %v4584_v0 }
 0x17c   :  { %v1376_v5 = vpop.f32.mrf.mxu2 }
 0x17d   :  { %v1626_v40 = vadd.f32 %v1625_v1, %v1376_v5  ;;  %v5013_v1 = vld [vmem:[%s8780_s3 + $0xe8] sm:$0xf0] }
 0x17e   :  { %v1154_v15 = vpop.f32.mrf.mxu1 }
 0x17f   :  { %v1835_v57 = vmax.f32 %v6392_v55, %v1626_v40  ;;  %v5661_v55 = vld [vmem:[%s8780_s3 + $0xe4] sm:$0xf] }
 0x180   :  { %v898_v51 = vpop.f32.mrf.mxu0  ;;  %v5016_v0 = vor.u32 %v5661_v55, %v5013_v1 }
 0x181   :  { %v1919_v50 = vmax.f32 %v1831_v45, %v1835_v57  ;;  %v6515_v41 = vadd.f32 %v1147_v30, %v898_v51  ;;  %v4592_v45 = vor.u32 %v5567_v52, %v4589_v33  ;;  %v6530_v5 = vpop.f32.mrf.mxu3  ;;  %v5011_v57 = vld [vmem:[%s8780_s3 + $0xe0] sm:$0xf]  ;;  %v5662_v33 = vld [vmem:[%s8780_s3 + $0xe4] sm:$0xf0] }
 0x182   :  { %2406 = vmatpush.bf16.msrb.mxu3 %v5016_v0  ;;  %v5012_v51 = vor.u32 %v5662_v33, %v5011_v57  ;;  %v5566_v0 = vld [vmem:[%s8778_s0 + $0x174] sm:$0xf0] }
 0x183   :  { %937 = vmatmul.bf16.gmra.mxu0 %v6513_v7  ;;  %v1971_v34 = vadd.f32 %v6422_v46, %v1919_v50  ;;  %4921 = vmatmul.msk.bf16.gmra.mxu3 %vm667_vm1, %v4592_v45 }
 0x184   :  { %v1378_v30 = vpop.f32.mrf.mxu2  ;;  %2317 = vmatpush.bf16.msrb.mxu1 %v5012_v51 }
 0x185   :  { %v1628_v10 = vadd.f32 %v1627_v63, %v1378_v30  ;;  %v2019_v55 = vmax.f32 %v1971_v34, 0.0  ;;  %v4579_v30 = vld [vmem:[%s8778_s0 + $0x170] sm:$0xf] }
 0x186   :  { %v1157_v63 = vpop.f32.mrf.mxu1  ;;  %v6556_v57 = vor.u32 %v5566_v0, %v4579_v30 }
 0x187   :  { %v1836_v40 = vmax.f32 %v6406_v22, %v1628_v10 }
 0x188   :  { %v900_v52 = vpop.f32.mrf.mxu0 }
 0x189   :  { %v1920_v1 = vmax.f32 %v1832_v38, %v1836_v40  ;;  %v6541_v37 = vadd.f32 %v1149_v27, %v900_v52  ;;  %1420 = vmatmul.bf16.gmra.mxu2 %v6417_v17  ;;  %v6551_v10 = vpop.f32.mrf.mxu3  ;;  %v2067_v38 = vpack.c.bf16 %v2019_v55, %v2019_v55  ;;  %4873 = vmatmul.msk.bf16.gmra.mxu1 %vm667_vm1, %v4592_v45 }
 0x18b   :  { %v1972_v22 = vadd.f32 %v6422_v46, %v1920_v1  ;;  %v2176_v52 = vunpack.c.l.b16 %v2067_v38  ;;  %v8825_v1 = vmax.f32 %v6359_v9, %v6477_v39 }
 0x18c   :  { %v1381_v50 = vpop.f32.mrf.mxu2 }
 0x18d   :  { %v2020_v27 = vmax.f32 %v1972_v22, 0.0  ;;  %v1631_v34 = vadd.f32 %v6475_v21, %v1381_v50  ;;  %v5569_v21 = vld [vmem:[%s8778_s0 + $0x194] sm:$0xf] }
 0x18e   :  { %v1159_v55 = vpop.f32.mrf.mxu1 }
 0x18f   :  { %v2068_v17 = vpack.c.bf16 %v2020_v27, %v2020_v27  ;;  %v1837_v40 = vmax.f32 %v6424_v31, %v1631_v34  ;;  %v4597_v31 = vld [vmem:[%s8778_s0 + $0x198] sm:$0xf0]  ;;  %v8827_v27 = vmax.f32 %v6370_v47, %v6495_v48 }
 0x190   :  { %v903_v33 = vpop.f32.mrf.mxu0  ;;  %v4600_v22 = vor.u32 %v5569_v21, %v4597_v31 }
 0x191   :  { %v2177_v51 = vunpack.c.l.b16 %v2068_v17  ;;  %v1921_v42 = vmax.f32 %v8825_v1, %v1837_v40  ;;  %v6561_v58 = vadd.f32 %v1152_v3, %v903_v33  ;;  %v1642_v30 = vpop.f32.mrf.mxu3 }
 0x193   :  { %v6569_v45 = vpack.c.b16 %v2177_v51, %v2176_v52  ;;  %942 = vmatmul.bf16.gmra.mxu0 %v6556_v57  ;;  %v1973_v9 = vadd.f32 %v6422_v46, %v1921_v42  ;;  %4922 = vmatmul.msk.bf16.gmra.mxu3 %vm667_vm1, %v4600_v22 }
 0x194   :  { %v1383_v50 = vpop.f32.mrf.mxu2 }
 0x195   :  { %8826 = vst [vmem:[#allocation26_spill] sm:$0xff] %v6569_v45  ;;  %v1633_v39 = vadd.f32 %v6493_v25, %v1383_v50  ;;  %v2021_v38 = vmax.f32 %v1973_v9, 0.0  ;;  %v4587_v25 = vld [vmem:[%s8778_s0 + $0x180] sm:$0xf] }
 0x196   :  { %v1162_v40 = vpop.f32.mrf.mxu1 }
 0x197   :  { %v1838_v3 = vmax.f32 %v6436_v13, %v1633_v39  ;;  %v5568_v13 = vld [vmem:[%s8778_s0 + $0x184] sm:$0xf0]  ;;  %v2069_v51 = vpack.c.bf16 %v2021_v38, %v2021_v38 }
 0x198   :  { %v905_v0 = vpop.f32.mrf.mxu0  ;;  %v6592_v1 = vor.u32 %v5568_v13, %v4587_v25  ;;  %v4595_v13 = vld [vmem:[%s8778_s0 + $0x190] sm:$0xf] }
 0x199   :  { %v1922_v34 = vmax.f32 %v8827_v27, %v1838_v3  ;;  %v6579_v17 = vadd.f32 %v1154_v15, %v905_v0  ;;  %1425 = vmatmul.bf16.gmra.mxu2 %v6448_v11  ;;  %v1645_v52 = vpop.f32.mrf.mxu3  ;;  %4874 = vmatmul.msk.bf16.gmra.mxu1 %vm667_vm1, %v4600_v22  ;;  %v2178_v31 = vunpack.c.l.b16 %v2069_v51  ;;  %v5571_v3 = vld [vmem:[%s8778_s0 + $0x1a4] sm:$0xf]  ;;  %v5570_v51 = vld [vmem:[%s8778_s0 + $0x194] sm:$0xf0] }
 0x19b   :  { %v1974_v33 = vadd.f32 %v6422_v46, %v1922_v34 }
 0x19c   :  { %v1386_v42 = vpop.f32.mrf.mxu2 }
 0x19d   :  { %v2022_v47 = vmax.f32 %v1974_v33, 0.0  ;;  %v1636_v15 = vadd.f32 %v6509_v59, %v1386_v42  ;;  %v4605_v59 = vld [vmem:[%s8778_s0 + $0x1a8] sm:$0xf0] }
 0x19e   :  { %v1164_v39 = vpop.f32.mrf.mxu1 }
 0x19f   :  { %v2070_v11 = vpack.c.bf16 %v2022_v47, %v2022_v47  ;;  %v1839_v48 = vmax.f32 %v6450_v62, %v1636_v15  ;;  %v4608_v62 = vor.u32 %v5571_v3, %v4605_v59 }
 0x1a0   :  { %v908_v21 = vpop.f32.mrf.mxu0 }
 0x1a1   :  { %v2179_v50 = vunpack.c.l.b16 %v2070_v11  ;;  %v6594_v9 = vadd.f32 %v1157_v63, %v908_v21  ;;  %v1647_v38 = vpop.f32.mrf.mxu3  ;;  %v5573_v21 = vld [vmem:[%s8778_s0 + $0x1b4] sm:$0xf] }
 0x1a3   :  { %v6602_v22 = vpack.c.b16 %v2179_v50, %v2178_v31  ;;  %947 = vmatmul.bf16.gmra.mxu0 %v6592_v1  ;;  %4923 = vmatmul.msk.bf16.gmra.mxu3 %vm667_vm1, %v4608_v62 }
 0x1a4   :  { %v1388_v0 = vpop.f32.mrf.mxu2 }
 0x1a5   :  { %8828 = vst [vmem:[#allocation27_spill] sm:$0xff] %v6602_v22  ;;  %v1638_v27 = vadd.f32 %v6530_v5, %v1388_v0  ;;  %v5577_v22 = vld [vmem:[%s8778_s0 + $0x1d4] sm:$0xf] }
 0x1a6   :  { %v1167_v42 = vpop.f32.mrf.mxu1 }
 0x1a7   :  { %v1840_v63 = vmax.f32 %v6466_v53, %v1638_v27 }
 0x1a8   :  { %v910_v34 = vpop.f32.mrf.mxu0 }
 0x1a9   :  { %v6608_v33 = vadd.f32 %v1159_v55, %v910_v34  ;;  %1430 = vmatmul.bf16.gmra.mxu2 %v6482_v6  ;;  %v1650_v5 = vpop.f32.mrf.mxu3  ;;  %4875 = vmatmul.msk.bf16.gmra.mxu1 %vm667_vm1, %v4608_v62  ;;  %v6623_v6 = vor.u32 %v5570_v51, %v4595_v13  ;;  %v4603_v34 = vld [vmem:[%s8778_s0 + $0x1a0] sm:$0xf] }
 0x1ac   :  { %v1391_v25 = vpop.f32.mrf.mxu2 }
 0x1ad   :  { %v6618_v47 = vadd.f32 %v6551_v10, %v1391_v25  ;;  %v4613_v10 = vld [vmem:[%s8778_s0 + $0x1b8] sm:$0xf0] }
 0x1ae   :  { %v1169_v11 = vpop.f32.mrf.mxu1  ;;  %v4616_v31 = vor.u32 %v5573_v21, %v4613_v10  ;;  %v5575_v21 = vld [vmem:[%s8778_s0 + $0x1c4] sm:$0xf] }
 0x1af   :  { %v1841_v53 = vmax.f32 %v6484_v18, %v6618_v47 }
 0x1b0   :  { %v913_v55 = vpop.f32.mrf.mxu0 }
 0x1b1   :  { %v6625_v15 = vadd.f32 %v1162_v40, %v913_v55  ;;  %v1652_v3 = vpop.f32.mrf.mxu3 }
 0x1b3   :  { %952 = vmatmul.bf16.gmra.mxu0 %v6623_v6  ;;  %4924 = vmatmul.msk.bf16.gmra.mxu3 %vm667_vm1, %v4616_v31 }
 0x1b4   :  { %v1393_v50 = vpop.f32.mrf.mxu2 }
 0x1b5   :  { %v6634_v18 = vadd.f32 %v1642_v30, %v1393_v50  ;;  %v5572_v30 = vld [vmem:[%s8778_s0 + $0x1a4] sm:$0xf0]  ;;  %v4621_v50 = vld [vmem:[%s8778_s0 + $0x1c8] sm:$0xf0] }
 0x1b6   :  { %v1172_v0 = vpop.f32.mrf.mxu1  ;;  %v6652_v51 = vor.u32 %v5572_v30, %v4603_v34 }
 0x1b8   :  { %v915_v59 = vpop.f32.mrf.mxu0 }
 0x1b9   :  { %v6639_v62 = vadd.f32 %v1164_v39, %v915_v59  ;;  %1435 = vmatmul.bf16.gmra.mxu2 %v6513_v7  ;;  %v6648_v25 = vpop.f32.mrf.mxu3  ;;  %4876 = vmatmul.msk.bf16.gmra.mxu1 %vm667_vm1, %v4616_v31 }
 0x1bc   :  { %v1396_v27 = vpop.f32.mrf.mxu2 }
 0x1bd   :  { %v1646_v13 = vadd.f32 %v1645_v52, %v1396_v27  ;;  %v4624_v52 = vor.u32 %v5575_v21, %v4621_v50 }
 0x1be   :  { %v1174_v10 = vpop.f32.mrf.mxu1 }
 0x1bf   :  { %v1843_v39 = vmax.f32 %v6515_v41, %v1646_v13 }
 0x1c0   :  { %v918_v7 = vpop.f32.mrf.mxu0 }
 0x1c1   :  { %v1923_v47 = vmax.f32 %v1839_v48, %v1843_v39  ;;  %v6654_v55 = vadd.f32 %v1167_v42, %v918_v7  ;;  %v6663_v41 = vpop.f32.mrf.mxu3 }
 0x1c3   :  { %957 = vmatmul.bf16.gmra.mxu0 %v6652_v51  ;;  %v1975_v59 = vadd.f32 %v6422_v46, %v1923_v47  ;;  %4925 = vmatmul.msk.bf16.gmra.mxu3 %vm667_vm1, %v4624_v52  ;;  %v4611_v47 = vld [vmem:[%s8778_s0 + $0x1b0] sm:$0xf] }
 0x1c4   :  { %v1398_v31 = vpop.f32.mrf.mxu2 }
 0x1c5   :  { %v1648_v48 = vadd.f32 %v1647_v38, %v1398_v31  ;;  %v2023_v34 = vmax.f32 %v1975_v59, 0.0  ;;  %v5574_v38 = vld [vmem:[%s8778_s0 + $0x1b4] sm:$0xf0] }
 0x1c6   :  { %v1177_v39 = vpop.f32.mrf.mxu1  ;;  %v6682_v59 = vor.u32 %v5574_v38, %v4611_v47  ;;  %v5659_v38 = vld [vmem:[%s8780_s3 + $0xd4] sm:$0xf] }
 0x1c7   :  { %v1844_v42 = vmax.f32 %v6541_v37, %v1648_v48  ;;  %v2071_v50 = vpack.c.bf16 %v2023_v34, %v2023_v34 }
 0x1c8   :  { %v920_v27 = vpop.f32.mrf.mxu0 }
 0x1c9   :  { %v1924_v30 = vmax.f32 %v1840_v63, %v1844_v42  ;;  %v6668_v13 = vadd.f32 %v1169_v11, %v920_v27  ;;  %1440 = vmatmul.bf16.gmra.mxu2 %v6556_v57  ;;  %v6678_v37 = vpop.f32.mrf.mxu3  ;;  %4877 = vmatmul.msk.bf16.gmra.mxu1 %vm667_vm1, %v4624_v52  ;;  %v2180_v42 = vunpack.c.l.b16 %v2071_v50  ;;  %v5005_v50 = vld [vmem:[%s8780_s3 + $0xd8] sm:$0xf0] }
 0x1cb   :  { %v1976_v7 = vadd.f32 %v6422_v46, %v1924_v30 }
 0x1cc   :  { %v1401_v21 = vpop.f32.mrf.mxu2 }
 0x1cd   :  { %v2024_v63 = vmax.f32 %v1976_v7, 0.0  ;;  %v1651_v11 = vadd.f32 %v1650_v5, %v1401_v21  ;;  %v4629_v5 = vld [vmem:[%s8778_s0 + $0x1d8] sm:$0xf0] }
 0x1ce   :  { %v1179_v34 = vpop.f32.mrf.mxu1 }
 0x1cf   :  { %v2072_v57 = vpack.c.bf16 %v2024_v63, %v2024_v63  ;;  %v1845_v31 = vmax.f32 %v6561_v58, %v1651_v11  ;;  %v4632_v58 = vor.u32 %v5577_v22, %v4629_v5  ;;  %v5647_v22 = vld [vmem:[%s8780_s3 + $0x74] sm:$0xf]  ;;  %v5008_v11 = vor.u32 %v5659_v38, %v5005_v50 }
 0x1d0   :  { %v923_v48 = vpop.f32.mrf.mxu0 }
 0x1d1   :  { %v2181_v27 = vunpack.c.l.b16 %v2072_v57  ;;  %v1925_v30 = vmax.f32 %v1841_v53, %v1845_v31  ;;  %v6684_v40 = vadd.f32 %v1172_v0, %v923_v48  ;;  %v6695_v21 = vpop.f32.mrf.mxu3  ;;  %2407 = vmatpush.bf16.msrb.mxu3 %v5008_v11 }
 0x1d3   :  { %v6692_v52 = vpack.c.b16 %v2181_v27, %v2180_v42  ;;  %962 = vmatmul.bf16.gmra.mxu0 %v6682_v59  ;;  %v1977_v53 = vadd.f32 %v6422_v46, %v1925_v30  ;;  %4926 = vmatmul.msk.bf16.gmra.mxu3 %vm667_vm1, %v4632_v58 }
 0x1d4   :  { %v1403_v7 = vpop.f32.mrf.mxu2 }
 0x1d5   :  { %8829 = vst [vmem:[#allocation28_spill] sm:$0xff] %v6692_v52  ;;  %v1653_v0 = vadd.f32 %v1652_v3, %v1403_v7  ;;  %v5085_v3 = vld [vmem:[%s8780_s3 + $0x78] sm:$0xf0]  ;;  %v2025_v57 = vmax.f32 %v1977_v53, 0.0  ;;  %v4619_v7 = vld [vmem:[%s8778_s0 + $0x1c0] sm:$0xf] }
 0x1d6   :  { %v5088_v42 = vor.u32 %v5647_v22, %v5085_v3  ;;  %v1182_v27 = vpop.f32.mrf.mxu1  ;;  %v5579_v3 = vld [vmem:[%s8778_s0 + $0x1e4] sm:$0xf]  ;;  %v5585_v52 = vld [vmem:[%s8778_s0 + $0x214] sm:$0xf] }
 0x1d7   :  { %v1846_v47 = vmax.f32 %v6579_v17, %v1653_v0  ;;  %v8830_v17 = vmax.f32 %v6500_v54, %v6634_v18  ;;  %v5576_v54 = vld [vmem:[%s8778_s0 + $0x1c4] sm:$0xf0] }
 0x1d8   :  { %v925_v63 = vpop.f32.mrf.mxu0  ;;  %2675 = vmatpush.bf16.msra.mxu2 %v5088_v42  ;;  %v6728_v38 = vor.u32 %v5576_v54, %v4619_v7  ;;  %v5003_v7 = vld [vmem:[%s8780_s3 + $0xd0] sm:$0xf]  ;;  %v5660_v54 = vld [vmem:[%s8780_s3 + $0xd4] sm:$0xf0] }
 0x1d9   :  { %v1926_v31 = vmax.f32 %v8830_v17, %v1846_v47  ;;  %v6715_v48 = vadd.f32 %v1174_v10, %v925_v63  ;;  %1445 = vmatmul.bf16.gmra.mxu2 %v6592_v1  ;;  %v1665_v18 = vpop.f32.mrf.mxu3  ;;  %v2073_v10 = vpack.c.bf16 %v2025_v57, %v2025_v57  ;;  %4878 = vmatmul.msk.bf16.gmra.mxu1 %vm667_vm1, %v4632_v58 }
 0x1db   :  { %v1978_v30 = vadd.f32 %v6422_v46, %v1926_v31  ;;  %v2182_v22 = vunpack.c.l.b16 %v2073_v10  ;;  %v5004_v10 = vor.u32 %v5660_v54, %v5003_v7 }
 0x1dc   :  { %v1406_v5 = vpop.f32.mrf.mxu2 }
 0x1dd   :  { %v2026_v53 = vmax.f32 %v1978_v30, 0.0  ;;  %v1656_v1 = vadd.f32 %v6648_v25, %v1406_v5  ;;  %v4637_v25 = vld [vmem:[%s8778_s0 + $0x1e8] sm:$0xf0]  ;;  %2318 = vmatpush.bf16.msrb.mxu1 %v5004_v10 }
 0x1de   :  { %v1184_v57 = vpop.f32.mrf.mxu1 }
 0x1df   :  { %v2074_v0 = vpack.c.bf16 %v2026_v53, %v2026_v53  ;;  %v1847_v47 = vmax.f32 %v6594_v9, %v1656_v1  ;;  %v4640_v9 = vor.u32 %v5579_v3, %v4637_v25  ;;  %v5581_v3 = vld [vmem:[%s8778_s0 + $0x1f4] sm:$0xf] }
 0x1e0   :  { %v928_v50 = vpop.f32.mrf.mxu0 }
 0x1e1   :  { %v2183_v63 = vunpack.c.l.b16 %v2074_v0  ;;  %v6730_v11 = vadd.f32 %v1177_v39, %v928_v50  ;;  %v1667_v31 = vpop.f32.mrf.mxu3 }
 0x1e3   :  { %v6738_v58 = vpack.c.b16 %v2183_v63, %v2182_v22  ;;  %967 = vmatmul.bf16.gmra.mxu0 %v6728_v38  ;;  %4927 = vmatmul.msk.bf16.gmra.mxu3 %vm667_vm1, %v4640_v9 }
 0x1e4   :  { %v1408_v17 = vpop.f32.mrf.mxu2 }
 0x1e5   :  { %8831 = vst [vmem:[#allocation29_spill] sm:$0xff] %v6738_v58  ;;  %v1658_v42 = vadd.f32 %v6663_v41, %v1408_v17 }
 0x1e6   :  { %v1187_v53 = vpop.f32.mrf.mxu1 }
 0x1e7   :  { %v1848_v39 = vmax.f32 %v6608_v33, %v1658_v42  ;;  %v4627_v33 = vld [vmem:[%s8778_s0 + $0x1d0] sm:$0xf] }
 0x1e8   :  { %v930_v30 = vpop.f32.mrf.mxu0 }
 0x1e9   :  { %v6744_v5 = vadd.f32 %v1179_v34, %v930_v30  ;;  %1450 = vmatmul.bf16.gmra.mxu2 %v6623_v6  ;;  %v5578_v34 = vld [vmem:[%s8778_s0 + $0x1d4] sm:$0xf0]  ;;  %v1670_v6 = vpop.f32.mrf.mxu3  ;;  %4879 = vmatmul.msk.bf16.gmra.mxu1 %vm667_vm1, %v4640_v9 }
 0x1ea   :  { %v6765_v50 = vor.u32 %v5578_v34, %v4627_v33 }
 0x1ec   :  { %v1411_v41 = vpop.f32.mrf.mxu2 }
 0x1ed   :  { %v6760_v1 = vadd.f32 %v6678_v37, %v1411_v41  ;;  %v4645_v37 = vld [vmem:[%s8778_s0 + $0x1f8] sm:$0xf0]  ;;  %v4635_v41 = vld [vmem:[%s8778_s0 + $0x1e0] sm:$0xf] }
 0x1ee   :  { %v1189_v25 = vpop.f32.mrf.mxu1  ;;  %v4648_v9 = vor.u32 %v5581_v3, %v4645_v37  ;;  %v5583_v37 = vld [vmem:[%s8778_s0 + $0x204] sm:$0xf] }
 0x1ef   :  { %v1849_v0 = vmax.f32 %v6625_v15, %v6760_v1 }
 0x1f0   :  { %v933_v22 = vpop.f32.mrf.mxu0 }
 0x1f1   :  { %v6767_v63 = vadd.f32 %v1182_v27, %v933_v22  ;;  %v1672_v42 = vpop.f32.mrf.mxu3 }
 0x1f3   :  { %972 = vmatmul.bf16.gmra.mxu0 %v6765_v50  ;;  %4928 = vmatmul.msk.bf16.gmra.mxu3 %vm667_vm1, %v4648_v9 }
 0x1f4   :  { %v1413_v17 = vpop.f32.mrf.mxu2 }
 0x1f5   :  { %v6777_v15 = vadd.f32 %v6695_v21, %v1413_v17  ;;  %v5580_v21 = vld [vmem:[%s8778_s0 + $0x1e4] sm:$0xf0] }
 0x1f6   :  { %v1192_v54 = vpop.f32.mrf.mxu1  ;;  %v6795_v1 = vor.u32 %v5580_v21, %v4635_v41 }
 0x1f8   :  { %v935_v30 = vpop.f32.mrf.mxu0 }
 0x1f9   :  { %v6782_v7 = vadd.f32 %v1184_v57, %v935_v30  ;;  %1455 = vmatmul.bf16.gmra.mxu2 %v6652_v51  ;;  %v6791_v33 = vpop.f32.mrf.mxu3  ;;  %4880 = vmatmul.msk.bf16.gmra.mxu1 %vm667_vm1, %v4648_v9  ;;  %v4653_v30 = vld [vmem:[%s8778_s0 + $0x208] sm:$0xf0] }
 0x1fc   :  { %v1416_v10 = vpop.f32.mrf.mxu2 }
 0x1fd   :  { %v1666_v34 = vadd.f32 %v1665_v18, %v1416_v10  ;;  %v4656_v18 = vor.u32 %v5583_v37, %v4653_v30 }
 0x1fe   :  { %v1194_v17 = vpop.f32.mrf.mxu1 }
 0x1ff   :  { %v1851_v57 = vmax.f32 %v6654_v55, %v1666_v34 }
 0x200   :  { %v938_v51 = vpop.f32.mrf.mxu0 }
 0x201   :  { %v1927_v22 = vmax.f32 %v1847_v47, %v1851_v57  ;;  %v6797_v3 = vadd.f32 %v1187_v53, %v938_v51  ;;  %v6806_v55 = vpop.f32.mrf.mxu3 }
 0x203   :  { %977 = vmatmul.bf16.gmra.mxu0 %v6795_v1  ;;  %v1979_v10 = vadd.f32 %v6422_v46, %v1927_v22  ;;  %4929 = vmatmul.msk.bf16.gmra.mxu3 %vm667_vm1, %v4656_v18  ;;  %v4643_v22 = vld [vmem:[%s8778_s0 + $0x1f0] sm:$0xf] }
 0x204   :  { %v1418_v9 = vpop.f32.mrf.mxu2 }
 0x205   :  { %v1668_v47 = vadd.f32 %v1667_v31, %v1418_v9  ;;  %v2027_v21 = vmax.f32 %v1979_v10, 0.0  ;;  %v5582_v31 = vld [vmem:[%s8778_s0 + $0x1f4] sm:$0xf0] }
 0x206   :  { %v1197_v51 = vpop.f32.mrf.mxu1 }
 0x207   :  { %v1852_v53 = vmax.f32 %v6668_v13, %v1668_v47  ;;  %v2075_v9 = vpack.c.bf16 %v2027_v21, %v2027_v21  ;;  %v6825_v47 = vor.u32 %v5582_v31, %v4643_v22 }
 0x208   :  { %v940_v41 = vpop.f32.mrf.mxu0 }
 0x209   :  { %v1928_v34 = vmax.f32 %v1848_v39, %v1852_v53  ;;  %v6811_v57 = vadd.f32 %v1189_v25, %v940_v41  ;;  %1460 = vmatmul.bf16.gmra.mxu2 %v6682_v59  ;;  %v6821_v13 = vpop.f32.mrf.mxu3  ;;  %4881 = vmatmul.msk.bf16.gmra.mxu1 %vm667_vm1, %v4656_v18  ;;  %v2184_v41 = vunpack.c.l.b16 %v2075_v9 }
 0x20b   :  { %v1980_v37 = vadd.f32 %v6422_v46, %v1928_v34 }
 0x20c   :  { %v1421_v30 = vpop.f32.mrf.mxu2 }
 0x20d   :  { %v2028_v39 = vmax.f32 %v1980_v37, 0.0  ;;  %v1671_v25 = vadd.f32 %v1670_v6, %v1421_v30  ;;  %v4661_v6 = vld [vmem:[%s8778_s0 + $0x218] sm:$0xf0] }
 0x20e   :  { %v1199_v21 = vpop.f32.mrf.mxu1 }
 0x20f   :  { %v2076_v59 = vpack.c.bf16 %v2028_v39, %v2028_v39  ;;  %v1853_v10 = vmax.f32 %v6684_v40, %v1671_v25  ;;  %v4664_v40 = vor.u32 %v5585_v52, %v4661_v6  ;;  %v8833_v39 = vmax.f32 %v6639_v62, %v6777_v15 }
 0x210   :  { %v943_v53 = vpop.f32.mrf.mxu0 }
 0x211   :  { %v2185_v34 = vunpack.c.l.b16 %v2076_v59  ;;  %v1929_v27 = vmax.f32 %v1849_v0, %v1853_v10  ;;  %v6827_v58 = vadd.f32 %v1192_v54, %v943_v53  ;;  %v1682_v30 = vpop.f32.mrf.mxu3 }
 0x213   :  { %v6835_v18 = vpack.c.b16 %v2185_v34, %v2184_v41  ;;  %982 = vmatmul.bf16.gmra.mxu0 %v6825_v47  ;;  %v1981_v0 = vadd.f32 %v6422_v46, %v1929_v27  ;;  %4930 = vmatmul.msk.bf16.gmra.mxu3 %vm667_vm1, %v4664_v40 }
 0x214   :  { %v1423_v37 = vpop.f32.mrf.mxu2 }
 0x215   :  { %8832 = vst [vmem:[#allocation30_spill] sm:$0xff] %v6835_v18  ;;  %v1673_v54 = vadd.f32 %v1672_v42, %v1423_v37  ;;  %v2029_v9 = vmax.f32 %v1981_v0, 0.0  ;;  %v4651_v42 = vld [vmem:[%s8778_s0 + $0x200] sm:$0xf] }
 0x216   :  { %v1202_v52 = vpop.f32.mrf.mxu1 }
 0x217   :  { %v1854_v22 = vmax.f32 %v6715_v48, %v1673_v54  ;;  %v5584_v48 = vld [vmem:[%s8778_s0 + $0x204] sm:$0xf0]  ;;  %v2077_v41 = vpack.c.bf16 %v2029_v9, %v2029_v9 }
 0x218   :  { %v945_v31 = vpop.f32.mrf.mxu0  ;;  %v6860_v34 = vor.u32 %v5584_v48, %v4651_v42 }
 0x219   :  { %v1930_v25 = vmax.f32 %v8833_v39, %v1854_v22  ;;  %v6844_v59 = vadd.f32 %v1194_v17, %v945_v31  ;;  %1465 = vmatmul.bf16.gmra.mxu2 %v6728_v38  ;;  %v1685_v27 = vpop.f32.mrf.mxu3  ;;  %4882 = vmatmul.msk.bf16.gmra.mxu1 %vm667_vm1, %v4664_v40  ;;  %v2186_v37 = vunpack.c.l.b16 %v2077_v41  ;;  %v5587_v22 = vld [vmem:[%s8778_s0 + $0x224] sm:$0xf]  ;;  %v4659_v41 = vld [vmem:[%s8778_s0 + $0x210] sm:$0xf] }
 0x21b   :  { %v1982_v10 = vadd.f32 %v6422_v46, %v1930_v25 }
 0x21c   :  { %v1426_v53 = vpop.f32.mrf.mxu2 }
 0x21d   :  { %v2030_v62 = vmax.f32 %v1982_v10, 0.0  ;;  %v6855_v15 = vadd.f32 %v6791_v33, %v1426_v53  ;;  %v4669_v33 = vld [vmem:[%s8778_s0 + $0x228] sm:$0xf0] }
 0x21e   :  { %v1204_v31 = vpop.f32.mrf.mxu1 }
 0x21f   :  { %v2078_v38 = vpack.c.bf16 %v2030_v62, %v2030_v62  ;;  %v1855_v17 = vmax.f32 %v6730_v11, %v6855_v15  ;;  %v4672_v11 = vor.u32 %v5587_v22, %v4669_v33 }
 0x220   :  { %v948_v6 = vpop.f32.mrf.mxu0 }
 0x221   :  { %v2187_v0 = vunpack.c.l.b16 %v2078_v38  ;;  %v6862_v54 = vadd.f32 %v1197_v51, %v948_v6  ;;  %v1687_v39 = vpop.f32.mrf.mxu3 }
 0x223   :  { %v6870_v40 = vpack.c.b16 %v2187_v0, %v2186_v37  ;;  %987 = vmatmul.bf16.gmra.mxu0 %v6860_v34  ;;  %4931 = vmatmul.msk.bf16.gmra.mxu3 %vm667_vm1, %v4672_v11  ;;  %v5589_v37 = vld [vmem:[%s8778_s0 + $0x234] sm:$0xf] }
 0x224   :  { %v1428_v9 = vpop.f32.mrf.mxu2 }
 0x225   :  { %8834 = vst [vmem:[#allocation31_spill] sm:$0xff] %v6870_v40  ;;  %v6874_v25 = vadd.f32 %v6806_v55, %v1428_v9  ;;  %v5586_v55 = vld [vmem:[%s8778_s0 + $0x214] sm:$0xf0]  ;;  %v5591_v40 = vld [vmem:[%s8778_s0 + $0x244] sm:$0xf] }
 0x226   :  { %v1207_v42 = vpop.f32.mrf.mxu1 }
 0x228   :  { %v950_v10 = vpop.f32.mrf.mxu0 }
 0x229   :  { %v6879_v53 = vadd.f32 %v1199_v21, %v950_v10  ;;  %1470 = vmatmul.bf16.gmra.mxu2 %v6765_v50  ;;  %v6888_v62 = vpop.f32.mrf.mxu3  ;;  %4883 = vmatmul.msk.bf16.gmra.mxu1 %vm667_vm1, %v4672_v11  ;;  %v6896_v21 = vor.u32 %v5586_v55, %v4659_v41  ;;  %v5657_v41 = vld [vmem:[%s8780_s3 + $0xc4] sm:$0xf]  ;;  %v4997_v55 = vld [vmem:[%s8780_s3 + $0xc8] sm:$0xf0] }
 0x22c   :  { %v1431_v48 = vpop.f32.mrf.mxu2 }
 0x22d   :  { %v6891_v15 = vadd.f32 %v6821_v13, %v1431_v48  ;;  %v4677_v13 = vld [vmem:[%s8778_s0 + $0x238] sm:$0xf0] }
 0x22e   :  { %v1209_v0 = vpop.f32.mrf.mxu1  ;;  %v4680_v22 = vor.u32 %v5589_v37, %v4677_v13 }
 0x230   :  { %v953_v38 = vpop.f32.mrf.mxu0 }
 0x231   :  { %v6898_v6 = vadd.f32 %v1202_v52, %v953_v38  ;;  %v6907_v11 = vpop.f32.mrf.mxu3  ;;  %v5000_v38 = vor.u32 %v5657_v41, %v4997_v55 }
 0x233   :  { %992 = vmatmul.bf16.gmra.mxu0 %v6896_v21  ;;  %4932 = vmatmul.msk.bf16.gmra.mxu3 %vm667_vm1, %v4680_v22 }
 0x234   :  { %v1433_v33 = vpop.f32.mrf.mxu2  ;;  %2408 = vmatpush.bf16.msrb.mxu3 %v5000_v38 }
 0x235   :  { %v6909_v9 = vadd.f32 %v1682_v30, %v1433_v33  ;;  %v4995_v30 = vld [vmem:[%s8780_s3 + $0xc0] sm:$0xf] }
 0x236   :  { %v1212_v37 = vpop.f32.mrf.mxu1  ;;  %v4667_v33 = vld [vmem:[%s8778_s0 + $0x220] sm:$0xf] }
 0x238   :  { %v955_v10 = vpop.f32.mrf.mxu0 }
 0x239   :  { %v6914_v48 = vadd.f32 %v1204_v31, %v955_v10  ;;  %1475 = vmatmul.bf16.gmra.mxu2 %v6795_v1  ;;  %v5658_v31 = vld [vmem:[%s8780_s3 + $0xc4] sm:$0xf0]  ;;  %v6935_v52 = vpop.f32.mrf.mxu3  ;;  %4884 = vmatmul.msk.bf16.gmra.mxu1 %vm667_vm1, %v4680_v22 }
 0x23a   :  { %v4996_v13 = vor.u32 %v5658_v31, %v4995_v30  ;;  %v5588_v10 = vld [vmem:[%s8778_s0 + $0x224] sm:$0xf0] }
 0x23b   :  { %v6939_v55 = vor.u32 %v5588_v10, %v4667_v33 }
 0x23c   :  { %v1436_v1 = vpop.f32.mrf.mxu2  ;;  %2319 = vmatpush.bf16.msrb.mxu1 %v4996_v13 }
 0x23d   :  { %v1686_v50 = vadd.f32 %v1685_v27, %v1436_v1  ;;  %v4685_v27 = vld [vmem:[%s8778_s0 + $0x248] sm:$0xf0] }
 0x23e   :  { %v1214_v18 = vpop.f32.mrf.mxu1 }
 0x23f   :  { %v1859_v41 = vmax.f32 %v6797_v3, %v1686_v50  ;;  %v5645_v3 = vld [vmem:[%s8780_s3 + $0x64] sm:$0xf] }
 0x240   :  { %v958_v30 = vpop.f32.mrf.mxu0 }
 0x241   :  { %v1931_v31 = vmax.f32 %v1855_v17, %v1859_v41  ;;  %v6941_v51 = vadd.f32 %v1207_v42, %v958_v30  ;;  %v5077_v17 = vld [vmem:[%s8780_s3 + $0x68] sm:$0xf0]  ;;  %v4688_v42 = vor.u32 %v5591_v40, %v4685_v27  ;;  %v6956_v38 = vpop.f32.mrf.mxu3  ;;  %v8835_v30 = vmax.f32 %v6744_v5, %v6874_v25 }
 0x242   :  { %v5080_v22 = vor.u32 %v5645_v3, %v5077_v17 }
 0x243   :  { %997 = vmatmul.bf16.gmra.mxu0 %v6939_v55  ;;  %v1983_v13 = vadd.f32 %v6422_v46, %v1931_v31  ;;  %4933 = vmatmul.msk.bf16.gmra.mxu3 %vm667_vm1, %v4688_v42 }
 0x244   :  { %v1438_v50 = vpop.f32.mrf.mxu2  ;;  %2676 = vmatpush.bf16.msra.mxu2 %v5080_v22 }
 0x245   :  { %v1688_v1 = vadd.f32 %v1687_v39, %v1438_v50  ;;  %v2031_v41 = vmax.f32 %v1983_v13, 0.0  ;;  %v4675_v39 = vld [vmem:[%s8778_s0 + $0x230] sm:$0xf]  ;;  %v8836_v13 = vmax.f32 %v6767_v63, %v6891_v15  ;;  %v6998_v63 = vld [vmem:[%s8779_s2] ss:$0 sm:$0xff] }
 0x246   :  { %v1217_v40 = vpop.f32.mrf.mxu1 }
 0x247   :  { %v1860_v33 = vmax.f32 %v6811_v57, %v1688_v1  ;;  %v5590_v57 = vld [vmem:[%s8778_s0 + $0x234] sm:$0xf0]  ;;  %v2079_v5 = vpack.c.bf16 %v2031_v41, %v2031_v41 }
 0x248   :  { %v960_v10 = vpop.f32.mrf.mxu0 }
 0x249   :  { %v1932_v45 = vmax.f32 %v8835_v30, %v1860_v33  ;;  %v6964_v56 = vadd.f32 %v1209_v0, %v960_v10  ;;  %1480 = vmatmul.bf16.gmra.mxu2 %v6825_v47  ;;  %v6974_v3 = vpop.f32.mrf.mxu3  ;;  %4885 = vmatmul.msk.bf16.gmra.mxu1 %vm667_vm1, %v4688_v42  ;;  %v2188_v50 = vunpack.c.l.b16 %v2079_v5  ;;  %v8837_v5 = vmax.f32 %v6782_v7, %v6909_v9 }
 0x24b   :  { %v1984_v27 = vadd.f32 %v6422_v46, %v1932_v45  ;;  %v6979_v45 = vor.u32 %v5590_v57, %v4675_v39 }
 0x24c   :  { %v1441_v31 = vpop.f32.mrf.mxu2 }
 0x24d   :  { %v2032_v25 = vmax.f32 %v1984_v27, 0.0  ;;  %v1691_v0 = vadd.f32 %v6888_v62, %v1441_v31  ;;  %v5593_v62 = vld [vmem:[%s8778_s0 + $0x254] sm:$0xf] }
 0x24e   :  { %v1219_v10 = vpop.f32.mrf.mxu1 }
 0x24f   :  { %v2080_v47 = vpack.c.bf16 %v2032_v25, %v2032_v25  ;;  %v1861_v46 = vmax.f32 %v6827_v58, %v1691_v0  ;;  %v4693_v58 = vld [vmem:[%s8778_s0 + $0x258] sm:$0xf0] }
 0x250   :  { %v963_v17 = vpop.f32.mrf.mxu0  ;;  %v4696_v41 = vor.u32 %v5593_v62, %v4693_v58 }
 0x251   :  { %v2189_v22 = vunpack.c.l.b16 %v2080_v47  ;;  %v1933_v1 = vmax.f32 %v8836_v13, %v1861_v46  ;;  %v6984_v33 = vadd.f32 %v1212_v37, %v963_v17  ;;  %v1702_v27 = vpop.f32.mrf.mxu3 }
 0x253   :  { %v6992_v42 = vpack.c.b16 %v2189_v22, %v2188_v50  ;;  %1002 = vmatmul.bf16.gmra.mxu0 %v6979_v45  ;;  %v1985_v15 = vadd.f32 %v6998_v63, %v1933_v1  ;;  %4934 = vmatmul.msk.bf16.gmra.mxu3 %vm667_vm1, %v4696_v41 }
 0x254   :  { %v1443_v30 = vpop.f32.mrf.mxu2 }
 0x255   :  { %v1693_v37 = vadd.f32 %v6907_v11, %v1443_v30  ;;  %v2033_v57 = vmax.f32 %v1985_v15, 0.0  ;;  %v4683_v11 = vld [vmem:[%s8778_s0 + $0x240] sm:$0xf]  ;;  %v5595_v15 = vld [vmem:[%s8778_s0 + $0x264] sm:$0xf] }
 0x256   :  { %v1222_v47 = vpop.f32.mrf.mxu1 }
 0x257   :  { %v1862_v31 = vmax.f32 %v6844_v59, %v1693_v37  ;;  %v5592_v59 = vld [vmem:[%s8778_s0 + $0x244] sm:$0xf0]  ;;  %v2081_v22 = vpack.c.bf16 %v2033_v57, %v2033_v57 }
 0x258   :  { %v965_v39 = vpop.f32.mrf.mxu0  ;;  %v7020_v13 = vor.u32 %v5592_v59, %v4683_v11  ;;  %v4691_v11 = vld [vmem:[%s8778_s0 + $0x250] sm:$0xf] }
 0x259   :  { %v1934_v25 = vmax.f32 %v8837_v5, %v1862_v31  ;;  %v7007_v0 = vadd.f32 %v1214_v18, %v965_v39  ;;  %1485 = vmatmul.bf16.gmra.mxu2 %v6860_v34  ;;  %v1705_v50 = vpop.f32.mrf.mxu3  ;;  %4886 = vmatmul.msk.bf16.gmra.mxu1 %vm667_vm1, %v4696_v41  ;;  %v2190_v62 = vunpack.c.l.b16 %v2081_v22 }
 0x25b   :  { %v1986_v46 = vadd.f32 %v6998_v63, %v1934_v25 }
 0x25c   :  { %v1446_v17 = vpop.f32.mrf.mxu2 }
 0x25d   :  { %v2034_v7 = vmax.f32 %v1986_v46, 0.0  ;;  %v1696_v18 = vadd.f32 %v6935_v52, %v1446_v17  ;;  %v4701_v52 = vld [vmem:[%s8778_s0 + $0x268] sm:$0xf0] }
 0x25e   :  { %v1224_v37 = vpop.f32.mrf.mxu1 }
 0x25f   :  { %v2082_v34 = vpack.c.bf16 %v2034_v7, %v2034_v7  ;;  %v1863_v9 = vmax.f32 %v6862_v54, %v1696_v18  ;;  %v4704_v54 = vor.u32 %v5595_v15, %v4701_v52  ;;  %v5597_v18 = vld [vmem:[%s8778_s0 + $0x274] sm:$0xf] }
 0x260   :  { %v968_v1 = vpop.f32.mrf.mxu0 }
 0x261   :  { %v2191_v58 = vunpack.c.l.b16 %v2082_v34  ;;  %v7022_v30 = vadd.f32 %v1217_v40, %v968_v1  ;;  %v1707_v39 = vpop.f32.mrf.mxu3 }
 0x263   :  { %v7030_v41 = vpack.c.b16 %v2191_v58, %v2190_v62  ;;  %1007 = vmatmul.bf16.gmra.mxu0 %v7020_v13  ;;  %4935 = vmatmul.msk.bf16.gmra.mxu3 %vm667_vm1, %v4704_v54 }
 0x264   :  { %v1448_v31 = vpop.f32.mrf.mxu2 }
 0x265   :  { %8838 = vst [vmem:[#allocation32_spill] sm:$0xff] %v7030_v41  ;;  %v7034_v57 = vadd.f32 %v6956_v38, %v1448_v31  ;;  %v5594_v38 = vld [vmem:[%s8778_s0 + $0x254] sm:$0xf0] }
 0x266   :  { %v1227_v46 = vpop.f32.mrf.mxu1 }
 0x267   :  { %v1864_v40 = vmax.f32 %v6879_v53, %v7034_v57 }
 0x268   :  { %v970_v5 = vpop.f32.mrf.mxu0 }
 0x269   :  { %v7039_v25 = vadd.f32 %v1219_v10, %v970_v5  ;;  %1490 = vmatmul.bf16.gmra.mxu2 %v6896_v21  ;;  %v7048_v59 = vpop.f32.mrf.mxu3  ;;  %4887 = vmatmul.msk.bf16.gmra.mxu1 %vm667_vm1, %v4704_v54  ;;  %v7056_v21 = vor.u32 %v5594_v38, %v4691_v11  ;;  %v4699_v5 = vld [vmem:[%s8778_s0 + $0x260] sm:$0xf] }
 0x26c   :  { %v1451_v17 = vpop.f32.mrf.mxu2 }
 0x26d   :  { %v7051_v22 = vadd.f32 %v6974_v3, %v1451_v17  ;;  %v4709_v3 = vld [vmem:[%s8778_s0 + $0x278] sm:$0xf0] }
 0x26e   :  { %v1229_v34 = vpop.f32.mrf.mxu1  ;;  %v4712_v1 = vor.u32 %v5597_v18, %v4709_v3  ;;  %v5599_v3 = vld [vmem:[%s8778_s0 + $0x284] sm:$0xf] }
 0x26f   :  { %v1865_v53 = vmax.f32 %v6898_v6, %v7051_v22 }
 0x270   :  { %v973_v10 = vpop.f32.mrf.mxu0 }
 0x271   :  { %v7058_v7 = vadd.f32 %v1222_v47, %v973_v10  ;;  %v7067_v58 = vpop.f32.mrf.mxu3 }
 0x273   :  { %1012 = vmatmul.bf16.gmra.mxu0 %v7056_v21  ;;  %4936 = vmatmul.msk.bf16.gmra.mxu3 %vm667_vm1, %v4712_v1 }
 0x274   :  { %v1453_v62 = vpop.f32.mrf.mxu2 }
 0x275   :  { %v7069_v15 = vadd.f32 %v1702_v27, %v1453_v62  ;;  %v5596_v27 = vld [vmem:[%s8778_s0 + $0x264] sm:$0xf0] }
 0x276   :  { %v1232_v31 = vpop.f32.mrf.mxu1  ;;  %v7087_v38 = vor.u32 %v5596_v27, %v4699_v5 }
 0x278   :  { %v975_v52 = vpop.f32.mrf.mxu0 }
 0x279   :  { %v7074_v54 = vadd.f32 %v1224_v37, %v975_v52  ;;  %1495 = vmatmul.bf16.gmra.mxu2 %v6939_v55  ;;  %v7083_v17 = vpop.f32.mrf.mxu3  ;;  %4888 = vmatmul.msk.bf16.gmra.mxu1 %vm667_vm1, %v4712_v1 }
 0x27c   :  { %v1456_v57 = vpop.f32.mrf.mxu2 }
 0x27d   :  { %v1706_v11 = vadd.f32 %v1705_v50, %v1456_v57  ;;  %v4717_v50 = vld [vmem:[%s8778_s0 + $0x288] sm:$0xf0] }
 0x27e   :  { %v7094_v62 = vpop.f32.mrf.mxu1 }
 0x27f   :  { %v1867_v37 = vmax.f32 %v6941_v51, %v1706_v11  ;;  %v5655_v51 = vld [vmem:[%s8780_s3 + $0xb4] sm:$0xf] }
 0x280   :  { %v978_v55 = vpop.f32.mrf.mxu0 }
 0x281   :  { %v1935_v10 = vmax.f32 %v1863_v9, %v1867_v37  ;;  %v7089_v18 = vadd.f32 %v1227_v46, %v978_v55  ;;  %v4989_v9 = vld [vmem:[%s8780_s3 + $0xb8] sm:$0xf0]  ;;  %v4720_v46 = vor.u32 %v5599_v3, %v4717_v50  ;;  %v7106_v57 = vpop.f32.mrf.mxu3  ;;  %v4987_v37 = vld [vmem:[%s8780_s3 + $0xb0] sm:$0xf]  ;;  %v5656_v55 = vld [vmem:[%s8780_s3 + $0xb4] sm:$0xf0] }
 0x282   :  { %v4992_v52 = vor.u32 %v5655_v51, %v4989_v9  ;;  %v4988_v50 = vor.u32 %v5656_v55, %v4987_v37 }
 0x283   :  { %1017 = vmatmul.bf16.gmra.mxu0 %v7087_v38  ;;  %v1987_v5 = vadd.f32 %v6998_v63, %v1935_v10  ;;  %4937 = vmatmul.msk.bf16.gmra.mxu3 %vm667_vm1, %v4720_v46 }
 0x284   :  { %v1458_v1 = vpop.f32.mrf.mxu2  ;;  %2409 = vmatpush.bf16.msrb.mxu3 %v4992_v52  ;;  %2320 = vmatpush.bf16.msrb.mxu1 %v4988_v50  ;;  %v5598_v52 = vld [vmem:[%s8778_s0 + $0x274] sm:$0xf0] }
 0x285   :  { %v1708_v27 = vadd.f32 %v1707_v39, %v1458_v1  ;;  %v2035_v51 = vmax.f32 %v1987_v5, 0.0  ;;  %v4707_v1 = vld [vmem:[%s8778_s0 + $0x270] sm:$0xf] }
 0x286   :  { %v1237_v39 = vpop.f32.mrf.mxu1  ;;  %v7132_v37 = vor.u32 %v5598_v52, %v4707_v1  ;;  %v5643_v1 = vld [vmem:[%s8780_s3 + $0x54] sm:$0xf]  ;;  %v5069_v52 = vld [vmem:[%s8780_s3 + $0x58] sm:$0xf0] }
 0x287   :  { %v1868_v11 = vmax.f32 %v6964_v56, %v1708_v27 }
 0x288   :  { %v980_v3 = vpop.f32.mrf.mxu0 }
 0x289   :  { %v1936_v9 = vmax.f32 %v1864_v40, %v1868_v11  ;;  %v7117_v47 = vadd.f32 %v1229_v34, %v980_v3  ;;  %1500 = vmatmul.bf16.gmra.mxu2 %v6979_v45  ;;  %v7127_v27 = vpop.f32.mrf.mxu3  ;;  %v2083_v40 = vpack.c.bf16 %v2035_v51, %v2035_v51  ;;  %4889 = vmatmul.msk.bf16.gmra.mxu1 %vm667_vm1, %v4720_v46 }
 0x28b   :  { %v1988_v56 = vadd.f32 %v6998_v63, %v1936_v9  ;;  %v2192_v3 = vunpack.c.l.b16 %v2083_v40 }
 0x28c   :  { %v1461_v10 = vpop.f32.mrf.mxu2 }
 0x28d   :  { %v2036_v34 = vmax.f32 %v1988_v56, 0.0  ;;  %v1711_v5 = vadd.f32 %v7048_v59, %v1461_v10  ;;  %v5601_v59 = vld [vmem:[%s8778_s0 + $0x294] sm:$0xf] }
 0x28e   :  { %v7142_v51 = vpop.f32.mrf.mxu1 }
 0x28f   :  { %v2084_v45 = vpack.c.bf16 %v2036_v34, %v2036_v34  ;;  %v1869_v11 = vmax.f32 %v6984_v33, %v1711_v5  ;;  %v4725_v33 = vld [vmem:[%s8778_s0 + $0x298] sm:$0xf0]  ;;  %v5072_v34 = vor.u32 %v5643_v1, %v5069_v52  ;;  %v5603_v52 = vld [vmem:[%s8778_s0 + $0x2a4] sm:$0xf] }
 0x290   :  { %v983_v55 = vpop.f32.mrf.mxu0  ;;  %v4728_v56 = vor.u32 %v5601_v59, %v4725_v33 }
 0x291   :  { %v2193_v50 = vunpack.c.l.b16 %v2084_v45  ;;  %v1937_v9 = vmax.f32 %v1865_v53, %v1869_v11  ;;  %v7137_v41 = vadd.f32 %v1232_v31, %v983_v55  ;;  %v1722_v6 = vpop.f32.mrf.mxu3  ;;  %v8840_v45 = vmax.f32 %v6914_v48, %v7069_v15  ;;  %2677 = vmatpush.bf16.msra.mxu2 %v5072_v34 }
 0x293   :  { %v7147_v46 = vpack.c.b16 %v2193_v50, %v2192_v3  ;;  %1022 = vmatmul.bf16.gmra.mxu0 %v7132_v37  ;;  %v1989_v22 = vadd.f32 %v6998_v63, %v1937_v9  ;;  %4938 = vmatmul.msk.bf16.gmra.mxu3 %vm667_vm1, %v4728_v56  ;;  %v4715_v3 = vld [vmem:[%s8778_s0 + $0x280] sm:$0xf]  ;;  %v5600_v50 = vld [vmem:[%s8778_s0 + $0x284] sm:$0xf0] }
 0x294   :  { %v1463_v10 = vpop.f32.mrf.mxu2 }
 0x295   :  { %8839 = vst [vmem:[#allocation33_spill] sm:$0xff] %v7147_v46  ;;  %v1713_v53 = vadd.f32 %v7067_v58, %v1463_v10  ;;  %v2037_v5 = vmax.f32 %v1989_v22, 0.0  ;;  %v7176_v10 = vor.u32 %v5600_v50, %v4715_v3  ;;  %v4723_v50 = vld [vmem:[%s8778_s0 + $0x290] sm:$0xf] }
 0x296   :  { %v1242_v11 = vpop.f32.mrf.mxu1 }
 0x297   :  { %v1870_v31 = vmax.f32 %v7007_v0, %v1713_v53  ;;  %v2085_v59 = vpack.c.bf16 %v2037_v5, %v2037_v5 }
 0x298   :  { %v7160_v40 = vpop.f32.mrf.mxu0 }
 0x299   :  { %v1938_v58 = vmax.f32 %v8840_v45, %v1870_v31  ;;  %1505 = vmatmul.bf16.gmra.mxu2 %v7020_v13  ;;  %v1725_v9 = vpop.f32.mrf.mxu3  ;;  %4890 = vmatmul.msk.bf16.gmra.mxu1 %vm667_vm1, %v4728_v56  ;;  %v2194_v53 = vunpack.c.l.b16 %v2085_v59  ;;  %v5602_v59 = vld [vmem:[%s8778_s0 + $0x294] sm:$0xf0] }
 0x29b   :  { %v1990_v0 = vadd.f32 %v6998_v63, %v1938_v58 }
 0x29c   :  { %v1466_v55 = vpop.f32.mrf.mxu2 }
 0x29d   :  { %v2038_v33 = vmax.f32 %v1990_v0, 0.0  ;;  %v1716_v48 = vadd.f32 %v7083_v17, %v1466_v55  ;;  %v4733_v17 = vld [vmem:[%s8778_s0 + $0x2a8] sm:$0xf0] }
 0x29e   :  { %v7183_v34 = vpop.f32.mrf.mxu1 }
 0x29f   :  { %v2086_v13 = vpack.c.bf16 %v2038_v33, %v2038_v33  ;;  %v1871_v15 = vmax.f32 %v7022_v30, %v1716_v48  ;;  %v4736_v30 = vor.u32 %v5603_v52, %v4733_v17  ;;  %v7206_v48 = vor.u32 %v5602_v59, %v4723_v50 }
 0x2a0   :  { %v988_v22 = vpop.f32.mrf.mxu0 }
 0x2a1   :  { %v2195_v31 = vunpack.c.l.b16 %v2086_v13  ;;  %v7178_v1 = vadd.f32 %v1237_v39, %v988_v22  ;;  %v1727_v45 = vpop.f32.mrf.mxu3 }
 0x2a3   :  { %v7188_v56 = vpack.c.b16 %v2195_v31, %v2194_v53  ;;  %1027 = vmatmul.bf16.gmra.mxu0 %v7176_v10  ;;  %4939 = vmatmul.msk.bf16.gmra.mxu3 %vm667_vm1, %v4736_v30 }
 0x2a4   :  { %v1468_v5 = vpop.f32.mrf.mxu2 }
 0x2a5   :  { %8841 = vst [vmem:[#allocation34_spill] sm:$0xff] %v7188_v56  ;;  %v1718_v39 = vadd.f32 %v7106_v57, %v1468_v5  ;;  %v5604_v5 = vld [vmem:[%s8778_s0 + $0x2a4] sm:$0xf0] }
 0x2a6   :  { %v1247_v55 = vpop.f32.mrf.mxu1 }
 0x2a7   :  { %v1872_v58 = vmax.f32 %v7039_v25, %v1718_v39 }
 0x2a8   :  { %v7194_v0 = vpop.f32.mrf.mxu0 }
 0x2a9   :  { %1510 = vmatmul.bf16.gmra.mxu2 %v7056_v21  ;;  %v1730_v33 = vpop.f32.mrf.mxu3  ;;  %4891 = vmatmul.msk.bf16.gmra.mxu1 %vm667_vm1, %v4736_v30 }
 0x2ac   :  { %v1471_v3 = vpop.f32.mrf.mxu2 }
 0x2ad   :  { %v1721_v57 = vadd.f32 %v7127_v27, %v1471_v3 }
 0x2ae   :  { %v7210_v22 = vpop.f32.mrf.mxu1 }
 0x2af   :  { %v1873_v25 = vmax.f32 %v7058_v7, %v1721_v57 }
 0x2b0   :  { %v993_v21 = vpop.f32.mrf.mxu0 }
 0x2b1   :  { %v7208_v13 = vadd.f32 %v1242_v11, %v993_v21  ;;  %v1732_v31 = vpop.f32.mrf.mxu3  ;;  %v4731_v11 = vld [vmem:[%s8778_s0 + $0x2a0] sm:$0xf] }
 0x2b2   :  { %v7226_v3 = vor.u32 %v5604_v5, %v4731_v11 }
 0x2b3   :  { %1032 = vmatmul.bf16.gmra.mxu0 %v7206_v48  ;;  %4940 = vmatmul.msk.bf16.gmra.mxu3 %vm667_vm1, %v5832_v12 }
 0x2b4   :  { %v1473_v53 = vpop.f32.mrf.mxu2 }
 0x2b5   :  { %v1723_v52 = vadd.f32 %v1722_v6, %v1473_v53 }
 0x2b6   :  { %v1252_v7 = vpop.f32.mrf.mxu1 }
 0x2b7   :  { %v1874_v27 = vmax.f32 %v7074_v54, %v1723_v52 }
 0x2b8   :  { %v7216_v17 = vpop.f32.mrf.mxu0 }
 0x2b9   :  { %1515 = vmatmul.bf16.gmra.mxu2 %v7087_v38  ;;  %v1735_v6 = vpop.f32.mrf.mxu3 }
 0x2bc   :  { %v1476_v30 = vpop.f32.mrf.mxu2 }
 0x2bd   :  { %v1726_v39 = vadd.f32 %v1725_v9, %v1476_v30 }
 0x2be   :  { %v7231_v38 = vpop.f32.mrf.mxu1 }
 0x2bf   :  { %v1875_v12 = vmax.f32 %v7089_v18, %v1726_v39  ;;  %v4739_v39 = vld [vmem:[%s8778_s0 + $0x2b0] sm:$0xf] }
 0x2c0   :  { %v998_v54 = vpop.f32.mrf.mxu0 }
 0x2c1   :  { %v1939_v50 = vmax.f32 %v1871_v15, %v1875_v12  ;;  %v7228_v59 = vadd.f32 %v1247_v55, %v998_v54  ;;  %v7233_v21 = vpop.f32.mrf.mxu3 }
 0x2c3   :  { %1037 = vmatmul.bf16.gmra.mxu0 %v7226_v3  ;;  %v1991_v53 = vadd.f32 %v6998_v63, %v1939_v50  ;;  %4941 = vmatmul.msk.bf16.gmra.mxu3 %vm667_vm1, %v5886_v35  ;;  %v5606_v35 = vld [vmem:[%s8778_s0 + $0x2b4] sm:$0xf0] }
 0x2c4   :  { %v1478_v57 = vpop.f32.mrf.mxu2  ;;  %v7252_v50 = vor.u32 %v5606_v35, %v4739_v39  ;;  %v4981_v39 = vld [vmem:[%s8780_s3 + $0xa8] sm:$0xf0] }
 0x2c5   :  { %v1728_v52 = vadd.f32 %v1727_v45, %v1478_v57  ;;  %v2039_v15 = vmax.f32 %v1991_v53, 0.0 }
 0x2c6   :  { %v1257_v11 = vpop.f32.mrf.mxu1 }
 0x2c7   :  { %v1876_v18 = vmax.f32 %v7117_v47, %v1728_v52  ;;  %v2087_v47 = vpack.c.bf16 %v2039_v15, %v2039_v15 }
 0x2c8   :  { %v7239_v9 = vpop.f32.mrf.mxu0 }
 0x2c9   :  { %v1940_v55 = vmax.f32 %v1872_v58, %v1876_v18  ;;  %1520 = vmatmul.bf16.gmra.mxu2 %v7132_v37  ;;  %v7249_v45 = vpop.f32.mrf.mxu3  ;;  %v2196_v53 = vunpack.c.l.b16 %v2087_v47 }
 0x2cb   :  { %v1992_v30 = vadd.f32 %v6998_v63, %v1940_v55 }
 0x2cc   :  { %v1481_v5 = vpop.f32.mrf.mxu2 }
 0x2cd   :  { %v2040_v12 = vmax.f32 %v1992_v30, 0.0  ;;  %v1731_v54 = vadd.f32 %v1730_v33, %v1481_v5  ;;  %v1235_v33 = vadd.f32 %v7094_v62, %v7160_v40 }
 0x2ce   :  { %v7259_v46 = vpop.f32.mrf.mxu1 }
 0x2cf   :  { %v2088_v58 = vpack.c.bf16 %v2040_v12, %v2040_v12  ;;  %v1877_v37 = vmax.f32 %v7137_v41, %v1731_v54  ;;  %v4747_v54 = vld [vmem:[%s8778_s0 + $0x2c0] sm:$0xf] }
 0x2d0   :  { %v1003_v57 = vpop.f32.mrf.mxu0 }
 0x2d1   :  { %v2197_v52 = vunpack.c.l.b16 %v2088_v58  ;;  %v1941_v18 = vmax.f32 %v1873_v25, %v1877_v37  ;;  %v7254_v55 = vadd.f32 %v1252_v7, %v1003_v57  ;;  %v1742_v30 = vpop.f32.mrf.mxu3  ;;  %v5653_v7 = vld [vmem:[%s8780_s3 + $0xa4] sm:$0xf]  ;;  %v5608_v58 = vld [vmem:[%s8778_s0 + $0x2c4] sm:$0xf0] }
 0x2d2   :  { %v4984_v47 = vor.u32 %v5653_v7, %v4981_v39 }
 0x2d3   :  { %v7256_v56 = vpack.c.b16 %v2197_v52, %v2196_v53  ;;  %1042 = vmatmul.bf16.gmra.mxu0 %v7252_v50  ;;  %v1993_v41 = vadd.f32 %v6998_v63, %v1941_v18  ;;  %4942 = vmatmul.msk.bf16.gmra.mxu3 %vm667_vm1, %v5948_v61  ;;  %v7283_v18 = vor.u32 %v5608_v58, %v4747_v54 }
 0x2d4   :  { %v1483_v15 = vpop.f32.mrf.mxu2  ;;  %2410 = vmatpush.bf16.msrb.mxu3 %v4984_v47 }
 0x2d5   :  { %v1733_v5 = vadd.f32 %v1732_v31, %v1483_v15  ;;  %v2041_v12 = vmax.f32 %v1993_v41, 0.0 }
 0x2d6   :  { %v1262_v61 = vpop.f32.mrf.mxu1 }
 0x2d7   :  { %v1878_v25 = vmax.f32 %v1235_v33, %v1733_v5  ;;  %v2089_v57 = vpack.c.bf16 %v2041_v12, %v2041_v12 }
 0x2d8   :  { %v7272_v35 = vpop.f32.mrf.mxu0 }
 0x2d9   :  { %v1942_v62 = vmax.f32 %v1874_v27, %v1878_v25  ;;  %1525 = vmatmul.bf16.gmra.mxu2 %v7176_v10  ;;  %v1745_v37 = vpop.f32.mrf.mxu3  ;;  %v2198_v33 = vunpack.c.l.b16 %v2089_v57 }
 0x2db   :  { %v1994_v40 = vadd.f32 %v6998_v63, %v1942_v62 }
 0x2dc   :  { %v1486_v31 = vpop.f32.mrf.mxu2 }
 0x2dd   :  { %v2042_v53 = vmax.f32 %v1994_v40, 0.0  ;;  %v1736_v52 = vadd.f32 %v1735_v6, %v1486_v31  ;;  %v1240_v6 = vadd.f32 %v7142_v51, %v7194_v0  ;;  %v5654_v40 = vld [vmem:[%s8780_s3 + $0xa4] sm:$0xf0]  ;;  %v4755_v0 = vld [vmem:[%s8778_s0 + $0x2d0] sm:$0xf] }
 0x2de   :  { %v7290_v7 = vpop.f32.mrf.mxu1 }
 0x2df   :  { %v2090_v27 = vpack.c.bf16 %v2042_v53, %v2042_v53  ;;  %v1879_v10 = vmax.f32 %v7178_v1, %v1736_v52 }
 0x2e0   :  { %v1008_v15 = vpop.f32.mrf.mxu0 }
 0x2e1   :  { %v2199_v41 = vunpack.c.l.b16 %v2090_v27  ;;  %v7285_v5 = vadd.f32 %v1257_v11, %v1008_v15  ;;  %v1747_v47 = vpop.f32.mrf.mxu3  ;;  %v4979_v11 = vld [vmem:[%s8780_s3 + $0xa0] sm:$0xf] }
 0x2e2   :  { %v4980_v31 = vor.u32 %v5654_v40, %v4979_v11 }
 0x2e3   :  { %v7287_v25 = vpack.c.b16 %v2199_v41, %v2198_v33  ;;  %1047 = vmatmul.bf16.gmra.mxu0 %v7283_v18  ;;  %4943 = vmatmul.msk.bf16.gmra.mxu3 %vm667_vm1, %v5998_v19  ;;  %v5610_v19 = vld [vmem:[%s8778_s0 + $0x2d4] sm:$0xf0]  ;;  %v1245_v33 = vadd.f32 %v7183_v34, %v7216_v17  ;;  %v5612_v34 = vld [vmem:[%s8778_s0 + $0x2e4] sm:$0xf0] }
 0x2e4   :  { %v1488_v39 = vpop.f32.mrf.mxu2  ;;  %2321 = vmatpush.bf16.msrb.mxu1 %v4980_v31  ;;  %v7314_v57 = vor.u32 %v5610_v19, %v4755_v0  ;;  %v5061_v0 = vld [vmem:[%s8780_s3 + $0x48] sm:$0xf0] }
 0x2e5   :  { %v1738_v1 = vadd.f32 %v7233_v21, %v1488_v39 }
 0x2e6   :  { %v1267_v54 = vpop.f32.mrf.mxu1 }
 0x2e7   :  { %v1880_v12 = vmax.f32 %v1240_v6, %v1738_v1  ;;  %v4763_v6 = vld [vmem:[%s8778_s0 + $0x2e0] sm:$0xf] }
 0x2e8   :  { %v7297_v62 = vpop.f32.mrf.mxu0  ;;  %v7335_v1 = vor.u32 %v5612_v34, %v4763_v6 }
 0x2e9   :  { %1530 = vmatmul.bf16.gmra.mxu2 %v7206_v48  ;;  %v1750_v48 = vpop.f32.mrf.mxu3 }
 0x2ec   :  { %v1491_v51 = vpop.f32.mrf.mxu2 }
 0x2ed   :  { %v1741_v21 = vadd.f32 %v7249_v45, %v1491_v51  ;;  %v5641_v51 = vld [vmem:[%s8780_s3 + $0x44] sm:$0xf] }
 0x2ee   :  { %v7323_v39 = vpop.f32.mrf.mxu1  ;;  %v5064_v19 = vor.u32 %v5641_v51, %v5061_v0 }
 0x2ef   :  { %v1881_v58 = vmax.f32 %v7208_v13, %v1741_v21 }
 0x2f0   :  { %v1013_v53 = vpop.f32.mrf.mxu0  ;;  %2678 = vmatpush.bf16.msra.mxu2 %v5064_v19 }
 0x2f1   :  { %v7316_v52 = vadd.f32 %v1262_v61, %v1013_v53  ;;  %v1752_v15 = vpop.f32.mrf.mxu3 }
 0x2f3   :  { %1052 = vmatmul.bf16.gmra.mxu0 %v7314_v57  ;;  %4944 = vmatmul.msk.bf16.gmra.mxu3 %vm667_vm1, %v6024_v29 }
 0x2f4   :  { %v1493_v27 = vpop.f32.mrf.mxu2 }
 0x2f5   :  { %v1743_v41 = vadd.f32 %v1742_v30, %v1493_v27 }
 0x2f7   :  { %v1882_v45 = vmax.f32 %v1245_v33, %v1743_v41 }
 0x2f8   :  { %v7325_v13 = vpop.f32.mrf.mxu0 }
 0x2f9   :  { %1535 = vmatmul.bf16.gmra.mxu2 %v7226_v3  ;;  %v1755_v17 = vpop.f32.mrf.mxu3  ;;  %v1272_v3 = vpop.f32.mrf.mxu1 }
 0x2fc   :  { %v1496_v61 = vpop.f32.mrf.mxu2 }
 0x2fd   :  { %v1746_v30 = vadd.f32 %v1745_v37, %v1496_v61 }
 0x2ff   :  { %v1883_v29 = vmax.f32 %v7228_v59, %v1746_v30 }
 0x300   :  { %v1018_v11 = vpop.f32.mrf.mxu0 }
 0x301   :  { %v1943_v40 = vmax.f32 %v1879_v10, %v1883_v29  ;;  %v7337_v31 = vadd.f32 %v1267_v54, %v1018_v11  ;;  %v7346_v59 = vpop.f32.mrf.mxu3  ;;  %v1250_v10 = vadd.f32 %v7210_v22, %v7239_v9  ;;  %v7355_v6 = vpop.f32.mrf.mxu1  ;;  %v4771_v22 = vld [vmem:[%s8778_s0 + $0x2f0] sm:$0xf]  ;;  %v5614_v9 = vld [vmem:[%s8778_s0 + $0x2f4] sm:$0xf0] }
 0x303   :  { %1057 = vmatmul.bf16.gmra.mxu0 %v7335_v1  ;;  %v1995_v21 = vadd.f32 %v6998_v63, %v1943_v40  ;;  %v7364_v40 = vor.u32 %v5614_v9, %v4771_v22 }
 0x304   :  { %v1498_v37 = vpop.f32.mrf.mxu2 }
 0x305   :  { %v1748_v54 = vadd.f32 %v1747_v47, %v1498_v37  ;;  %v2043_v33 = vmax.f32 %v1995_v21, 0.0 }
 0x307   :  { %v1884_v53 = vmax.f32 %v1250_v10, %v1748_v54  ;;  %v2091_v30 = vpack.c.bf16 %v2043_v33, %v2043_v33 }
 0x308   :  { %v7351_v27 = vpop.f32.mrf.mxu0 }
 0x309   :  { %v1944_v41 = vmax.f32 %v1880_v12, %v1884_v53  ;;  %1540 = vmatmul.bf16.gmra.mxu2 %v7252_v50  ;;  %v1760_v47 = vpop.f32.mrf.mxu3  ;;  %v2200_v0 = vunpack.c.l.b16 %v2091_v30 }
 0x30b   :  { %v1996_v61 = vadd.f32 %v6998_v63, %v1944_v41  ;;  %v1277_v41 = vpop.f32.mrf.mxu1 }
 0x30c   :  { %v1501_v34 = vpop.f32.mrf.mxu2 }
 0x30d   :  { %v2044_v29 = vmax.f32 %v1996_v61, 0.0  ;;  %v1751_v11 = vadd.f32 %v1750_v48, %v1501_v34  ;;  %v1255_v48 = vadd.f32 %v7231_v38, %v7272_v35 }
 0x30f   :  { %v2092_v12 = vpack.c.bf16 %v2044_v29, %v2044_v29  ;;  %v1885_v50 = vmax.f32 %v7254_v55, %v1751_v11 }
 0x310   :  { %v1023_v51 = vpop.f32.mrf.mxu0 }
 0x311   :  { %v2201_v37 = vunpack.c.l.b16 %v2092_v12  ;;  %v1945_v19 = vmax.f32 %v1881_v58, %v1885_v50  ;;  %v7366_v10 = vadd.f32 %v1272_v3, %v1023_v51  ;;  %v7371_v53 = vpop.f32.mrf.mxu3 }
 0x313   :  { %v7368_v21 = vpack.c.b16 %v2201_v37, %v2200_v0  ;;  %1062 = vmatmul.bf16.gmra.mxu0 %v7364_v40  ;;  %v1997_v55 = vadd.f32 %v6998_v63, %v1945_v19  ;;  %v7381_v35 = vpop.f32.mrf.mxu1 }
 0x314   :  { %v1503_v54 = vpop.f32.mrf.mxu2 }
 0x315   :  { %v1753_v33 = vadd.f32 %v1752_v15, %v1503_v54  ;;  %v2045_v58 = vmax.f32 %v1997_v55, 0.0 }
 0x317   :  { %v1886_v61 = vmax.f32 %v1255_v48, %v1753_v33  ;;  %v2093_v29 = vpack.c.bf16 %v2045_v58, %v2045_v58 }
 0x318   :  { %v7376_v34 = vpop.f32.mrf.mxu0 }
 0x319   :  { %v1946_v3 = vmax.f32 %v1882_v45, %v1886_v61  ;;  %1545 = vmatmul.bf16.gmra.mxu2 %v7283_v18  ;;  %v1765_v30 = vpop.f32.mrf.mxu3  ;;  %v2202_v51 = vunpack.c.l.b16 %v2093_v29 }
 0x31b   :  { %v1998_v22 = vadd.f32 %v6998_v63, %v1946_v3 }
 0x31c   :  { %v1506_v9 = vpop.f32.mrf.mxu2 }
 0x31d   :  { %v2046_v11 = vmax.f32 %v1998_v22, 0.0  ;;  %v1756_v12 = vadd.f32 %v1755_v17, %v1506_v9  ;;  %v1282_v17 = vpop.f32.mrf.mxu1 }
 0x31f   :  { %v2094_v50 = vpack.c.bf16 %v2046_v11, %v2046_v11  ;;  %v1887_v38 = vmax.f32 %v7285_v5, %v1756_v12 }
 0x320   :  { %v1028_v15 = vpop.f32.mrf.mxu0 }
 0x321   :  { %v2203_v0 = vunpack.c.l.b16 %v2094_v50  ;;  %v7383_v37 = vadd.f32 %v1277_v41, %v1028_v15  ;;  %v1767_v19 = vpop.f32.mrf.mxu3 }
 0x323   :  { %v7385_v45 = vpack.c.b16 %v2203_v0, %v2202_v51  ;;  %4897 = vmatmul.msk.bf16.vlgmr.msrb.gmra.mxu0 %vm667_vm1, %v5854_v20  ;;  %v4971_v0 = vld [vmem:[%s8780_s3 + $0x90] sm:$0xf] }
 0x324   :  { %v1508_v18 = vpop.f32.mrf.mxu2 }
 0x325   :  { %v7397_v58 = vpop.f32.mrf.mxu1 }
 0x328   :  { %v7389_v54 = vpop.f32.mrf.mxu0 }
 0x329   :  { %1550 = vmatmul.bf16.gmra.mxu2 %v7314_v57  ;;  %v1770_v48 = vpop.f32.mrf.mxu3  ;;  %v5651_v57 = vld [vmem:[%s8780_s3 + $0x94] sm:$0xf] }
 0x32c   :  { %v1511_v5 = vpop.f32.mrf.mxu2 }
 0x32d   :  { %v1761_v55 = vadd.f32 %v1760_v47, %v1511_v5  ;;  %v1287_v29 = vpop.f32.mrf.mxu1 }
 0x32f   :  { %v1889_v33 = vmax.f32 %v7316_v52, %v1761_v55  ;;  %v4973_v52 = vld [vmem:[%s8780_s3 + $0x98] sm:$0xf0] }
 0x330   :  { %v1033_v61 = vpop.f32.mrf.mxu0  ;;  %v4976_v47 = vor.u32 %v5651_v57, %v4973_v52 }
 0x331   :  { %v7393_v41 = vadd.f32 %v1282_v17, %v1033_v61  ;;  %v1772_v3 = vpop.f32.mrf.mxu3 }
 0x332   :  { %2411 = vmatpush.bf16.msrb.mxu3 %v4976_v47 }
 0x333   :  { %4898 = vmatmul.msk.bf16.gmra.mxu0 %vm667_vm1, %v5906_v43 }
 0x334   :  { %v1513_v20 = vpop.f32.mrf.mxu2 }
 0x338   :  { %v7399_v22 = vpop.f32.mrf.mxu0 }
 0x339   :  { %1555 = vmatmul.bf16.gmra.mxu2 %v7335_v1  ;;  %v1775_v11 = vpop.f32.mrf.mxu3  ;;  %v1758_v1 = vadd.f32 %v7346_v59, %v1508_v18 }
 0x33c   :  { %v1516_v9 = vpop.f32.mrf.mxu2 }
 0x33d   :  { %v1766_v43 = vadd.f32 %v1765_v30, %v1516_v9  ;;  %v5652_v30 = vld [vmem:[%s8780_s3 + $0x94] sm:$0xf0] }
 0x33e   :  { %v4972_v5 = vor.u32 %v5652_v30, %v4971_v0  ;;  %v1763_v0 = vadd.f32 %v7371_v53, %v1513_v20  ;;  %v5639_v53 = vld [vmem:[%s8780_s3 + $0x34] sm:$0xf] }
 0x33f   :  { %v1891_v12 = vmax.f32 %v7337_v31, %v1766_v43  ;;  %v1260_v31 = vadd.f32 %v7259_v46, %v7297_v62 }
 0x340   :  { %v1038_v50 = vpop.f32.mrf.mxu0  ;;  %2322 = vmatpush.bf16.msrb.mxu1 %v4972_v5 }
 0x341   :  { %v1947_v15 = vmax.f32 %v1887_v38, %v1891_v12  ;;  %v7409_v51 = vadd.f32 %v1287_v29, %v1038_v50  ;;  %v1270_v38 = vadd.f32 %v7323_v39, %v7351_v27  ;;  %v7427_v57 = vpop.f32.mrf.mxu3 }
 0x343   :  { %4899 = vmatmul.msk.bf16.gmra.mxu0 %vm667_vm1, %v5962_v2  ;;  %v1999_v59 = vadd.f32 %v6998_v63, %v1947_v15  ;;  %v1888_v2 = vmax.f32 %v1260_v31, %v1758_v1 }
 0x344   :  { %v1518_v17 = vpop.f32.mrf.mxu2 }
 0x345   :  { %v1768_v18 = vadd.f32 %v1767_v19, %v1518_v17  ;;  %v2047_v52 = vmax.f32 %v1999_v59, 0.0 }
 0x347   :  { %v1892_v55 = vmax.f32 %v1270_v38, %v1768_v18  ;;  %v2095_v62 = vpack.c.bf16 %v2047_v52, %v2047_v52 }
 0x348   :  { %v7425_v61 = vpop.f32.mrf.mxu0 }
 0x349   :  { %v1948_v47 = vmax.f32 %v1888_v2, %v1892_v55  ;;  %1560 = vmatmul.bf16.gmra.mxu2 %v7364_v40  ;;  %v2785_v12 = vunpack.c.l.b16 %v2095_v62  ;;  %v1780_v1 = vpop.f32.mrf.mxu3 }
 0x34b   :  { %v2000_v9 = vadd.f32 %v6998_v63, %v1948_v47 }
 0x34c   :  { %v1521_v46 = vpop.f32.mrf.mxu2 }
 0x34d   :  { %v2048_v43 = vmax.f32 %v2000_v9, 0.0  ;;  %v1771_v39 = vadd.f32 %v1770_v48, %v1521_v46  ;;  %v1265_v48 = vadd.f32 %v7290_v7, %v7325_v13 }
 0x34f   :  { %v2096_v27 = vpack.c.bf16 %v2048_v43, %v2048_v43  ;;  %v1893_v19 = vmax.f32 %v7366_v10, %v1771_v39  ;;  %v1275_v10 = vadd.f32 %v7355_v6, %v7376_v34  ;;  %v1890_v31 = vmax.f32 %v1265_v48, %v1763_v0 }
 0x350   :  { %v7432_v29 = vpop.f32.mrf.mxu0 }
 0x351   :  { %v2786_v50 = vunpack.c.l.b16 %v2096_v27  ;;  %v1949_v15 = vmax.f32 %v1889_v33, %v1893_v19 }
 0x353   :  { %v7435_v30 = vpack.c.b16 %v2786_v50, %v2785_v12  ;;  %4900 = vmatmul.msk.bf16.gmra.mxu0 %vm667_vm1, %v6006_v23  ;;  %v2001_v17 = vadd.f32 %v6998_v63, %v1949_v15  ;;  %v5053_v23 = vld [vmem:[%s8780_s3 + $0x38] sm:$0xf0] }
 0x354   :  { %v1523_v40 = vpop.f32.mrf.mxu2  ;;  %v5056_v38 = vor.u32 %v5639_v53, %v5053_v23  ;;  %v1280_v53 = vadd.f32 %v7381_v35, %v7389_v54 }
 0x355   :  { %v1773_v5 = vadd.f32 %v1772_v3, %v1523_v40  ;;  %v2049_v7 = vmax.f32 %v2001_v17, 0.0  ;;  %v7453_v3 = vpop.f32.mrf.mxu3 }
 0x356   :  { %2679 = vmatpush.bf16.msra.mxu2 %v5056_v38 }
 0x357   :  { %v1894_v33 = vmax.f32 %v1275_v10, %v1773_v5  ;;  %v2097_v59 = vpack.c.bf16 %v2049_v7, %v2049_v7 }
 0x358   :  { %v7450_v20 = vpop.f32.mrf.mxu0 }
 0x359   :  { %v1950_v13 = vmax.f32 %v1890_v31, %v1894_v33  ;;  %v2787_v9 = vunpack.c.l.b16 %v2097_v59  ;;  %v1289_v31 = vpop.f32.mrf.mxu1 }
 0x35a   :  { %v1290_v23 = vadd.f32 %v1289_v31, %v7425_v61  ;;  %v4963_v61 = vld [vmem:[%s8780_s3 + $0x80] sm:$0xf] }
 0x35b   :  { %v2002_v6 = vadd.f32 %v6998_v63, %v1950_v13 }
 0x35c   :  { %v1526_v34 = vpop.f32.mrf.mxu2 }
 0x35d   :  { %v2050_v18 = vmax.f32 %v2002_v6, 0.0  ;;  %v1776_v2 = vadd.f32 %v1775_v11, %v1526_v34  ;;  %v1785_v39 = vpop.f32.mrf.mxu3 }
 0x35f   :  { %v2098_v55 = vpack.c.bf16 %v2050_v18, %v2050_v18  ;;  %v1895_v52 = vmax.f32 %v7383_v37, %v1776_v2  ;;  %v5650_v2 = vld [vmem:[%s8780_s3 + $0x84] sm:$0xf0] }
 0x360   :  { %v7456_v47 = vpop.f32.mrf.mxu0 }
 0x361   :  { %v2788_v46 = vunpack.c.l.b16 %v2098_v55 }
 0x363   :  { %v7458_v62 = vpack.c.b16 %v2788_v46, %v2787_v9  ;;  %4901 = vmatmul.msk.bf16.gmra.mxu0 %vm667_vm1, %v6032_v32  ;;  %v1293_v9 = vadd.f32 %v6094_v60, %v7432_v29  ;;  %v5083_v29 = vld [vmem:[%s8780_s3 + $0x70] sm:$0xf] }
 0x364   :  { %v1528_v43 = vpop.f32.mrf.mxu2 }
 0x365   :  { %v1787_v37 = vpop.f32.mrf.mxu3 }
 0x368   :  { %v7462_v27 = vpop.f32.mrf.mxu0 }
 0x369   :  { %8842 = vst [vmem:[#allocation35_spill] sm:$0xff] %v7462_v27  ;;  %v5195_v27 = vld [vmem:[%s8780_s3 + $0x190] sm:$0xf] }
 0x36c   :  { %v1531_v19 = vpop.f32.mrf.mxu2 }
 0x36d   :  { %v1781_v12 = vadd.f32 %v1780_v1, %v1531_v19  ;;  %v1790_v40 = vpop.f32.mrf.mxu3  ;;  %v1778_v1 = vadd.f32 %v7427_v57, %v1528_v43  ;;  %v4965_v57 = vld [vmem:[%s8780_s3 + $0x88] sm:$0xf0] }
 0x36f   :  { %v1897_v11 = vmax.f32 %v7393_v41, %v1781_v12  ;;  %v1896_v13 = vmax.f32 %v1280_v53, %v1778_v1  ;;  %v5075_v53 = vld [vmem:[%s8780_s3 + $0x60] sm:$0xf] }
 0x370   :  { %v7465_v50 = vpop.f32.mrf.mxu0 }
 0x374   :  { %v7467_v15 = vpop.f32.mrf.mxu2 }
 0x375   :  { %v7475_v41 = vpop.f32.mrf.mxu3 }
 0x378   :  { %v7469_v0 = vpop.f32.mrf.mxu0 }
 0x379   :  { %8843 = vst [vmem:[#allocation36_spill] sm:$0xff] %v7469_v0  ;;  %v5693_v0 = vld [vmem:[%s8780_s3 + $0x1e4] sm:$0xf] }
 0x37c   :  { %v1536_v48 = vpop.f32.mrf.mxu2 }
 0x37d   :  { %v1786_v10 = vadd.f32 %v1785_v39, %v1536_v48  ;;  %v1795_v19 = vpop.f32.mrf.mxu3 }
 0x37f   :  { %v1899_v32 = vmax.f32 %v7409_v51, %v1786_v10  ;;  %v5649_v51 = vld [vmem:[%s8780_s3 + $0x84] sm:$0xf] }
 0x380   :  { %v7472_v17 = vpop.f32.mrf.mxu0  ;;  %v4968_v59 = vor.u32 %v5649_v51, %v4965_v57  ;;  %v5067_v57 = vld [vmem:[%s8780_s3 + $0x50] sm:$0xf] }
 0x381   :  { %v1951_v5 = vmax.f32 %v1895_v52, %v1899_v32  ;;  %v4964_v52 = vor.u32 %v5650_v2, %v4963_v61 }
 0x382   :  { %2412 = vmatpush.bf16.msrb.mxu3 %v4968_v59  ;;  %v5644_v59 = vld [vmem:[%s8780_s3 + $0x54] sm:$0xf0] }
 0x383   :  { %v2003_v38 = vadd.f32 %v6998_v63, %v1951_v5  ;;  %2323 = vmatpush.bf16.msrb.mxu1 %v4964_v52  ;;  %v5640_v52 = vld [vmem:[%s8780_s3 + $0x34] sm:$0xf0] }
 0x384   :  { %v1538_v33 = vpop.f32.mrf.mxu2 }
 0x385   :  { %v1788_v7 = vadd.f32 %v1787_v37, %v1538_v33  ;;  %v2051_v18 = vmax.f32 %v2003_v38, 0.0  ;;  %v7508_v60 = vpop.f32.mrf.mxu3  ;;  %v1298_v38 = vadd.f32 %v6112_v8, %v7456_v47  ;;  %v5059_v8 = vld [vmem:[%s8780_s3 + $0x40] sm:$0xf]  ;;  %v5642_v47 = vld [vmem:[%s8780_s3 + $0x44] sm:$0xf0] }
 0x386   :  { %8846 = vst [vmem:[#allocation39_spill] sm:$0xff] %v7508_v60  ;;  %v5060_v61 = vor.u32 %v5642_v47, %v5059_v8  ;;  %v5029_v8 = vld [vmem:[%s8780_s3 + $0x8] sm:$0xf0] }
 0x387   :  { %v1900_v6 = vmax.f32 %v1290_v23, %v1788_v7  ;;  %v2099_v46 = vpack.c.bf16 %v2051_v18, %v2051_v18  ;;  %v5646_v23 = vld [vmem:[%s8780_s3 + $0x64] sm:$0xf0]  ;;  %v5068_v18 = vor.u32 %v5644_v59, %v5067_v57  ;;  %v5027_v57 = vld [vmem:[%s8780_s3] sm:$0xf] }
 0x388   :  { %v7487_v34 = vpop.f32.mrf.mxu0  ;;  %v5634_v59 = vld [vmem:[%s8780_s3 + $0x4] sm:$0xf0] }
 0x389   :  { %8844 = vst [vmem:[#allocation37_spill] sm:$0xff] %v7487_v34  ;;  %v1952_v35 = vmax.f32 %v1896_v13, %v1900_v6  ;;  %v3136_v48 = vunpack.c.l.b16 %v2099_v46  ;;  %v5076_v13 = vor.u32 %v5646_v23, %v5075_v53  ;;  %v5035_v53 = vld [vmem:[%s8780_s3 + $0x10] sm:$0xf]  ;;  %v5636_v23 = vld [vmem:[%s8780_s3 + $0x14] sm:$0xf0] }
 0x38b   :  { %v2004_v54 = vadd.f32 %v6998_v63, %v1952_v35 }
 0x38c   :  { %v1541_v55 = vpop.f32.mrf.mxu2 }
 0x38d   :  { %v2052_v43 = vmax.f32 %v2004_v54, 0.0  ;;  %v1791_v39 = vadd.f32 %v1790_v40, %v1541_v55  ;;  %v5648_v40 = vld [vmem:[%s8780_s3 + $0x74] sm:$0xf0]  ;;  %v1800_v35 = vpop.f32.mrf.mxu3  ;;  %v5051_v55 = vld [vmem:[%s8780_s3 + $0x30] sm:$0xf] }
 0x38e   :  { %v5084_v33 = vor.u32 %v5648_v40, %v5083_v29  ;;  %v5045_v29 = vld [vmem:[%s8780_s3 + $0x28] sm:$0xf0] }
 0x38f   :  { %v2100_v12 = vpack.c.bf16 %v2052_v43, %v2052_v43  ;;  %v1901_v63 = vmax.f32 %v1293_v9, %v1791_v39  ;;  %v5052_v9 = vor.u32 %v5640_v52, %v5051_v55  ;;  %v5043_v39 = vld [vmem:[%s8780_s3 + $0x20] sm:$0xf] }
 0x390   :  { %v7498_v37 = vpop.f32.mrf.mxu0  ;;  %2586 = vmatpush.bf16.msra.mxu0 %v5084_v33 }
 0x391   :  { %v3137_v10 = vunpack.c.l.b16 %v2100_v12  ;;  %v7500_v32 = vmax.f32 %v1897_v11, %v1901_v63  ;;  %v5637_v12 = vld [vmem:[%s8780_s3 + $0x24] sm:$0xf]  ;;  %v1303_v63 = vadd.f32 %v6137_v26, %v7465_v50  ;;  %v5635_v26 = vld [vmem:[%s8780_s3 + $0x14] sm:$0xf]  ;;  %v5036_v50 = vor.u32 %v5636_v23, %v5035_v53 }
 0x392   :  { %v5048_v40 = vor.u32 %v5637_v12, %v5045_v29 }
 0x393   :  { %v7502_v5 = vpack.c.b16 %v3137_v10, %v3136_v48 }
 0x394   :  { %v7504_v31 = vpop.f32.mrf.mxu2  ;;  %2587 = vmatpush.bf16.msra.mxu0 %v5076_v13  ;;  %2680 = vmatpush.bf16.msra.mxu2 %v5048_v40 }
 0x395   :  { %v7544_v43 = vpop.f32.mrf.mxu3 }
 0x396   :  { %8848 = vst [vmem:[#allocation41_spill] sm:$0xff] %v7544_v43 }
 0x398   :  { %v7506_v1 = vpop.f32.mrf.mxu0  ;;  %2588 = vmatpush.bf16.msra.mxu0 %v5068_v18  ;;  %v5633_v18 = vld [vmem:[%s8780_s3 + $0x4] sm:$0xf] }
 0x399   :  { %8845 = vst [vmem:[#allocation38_spill] sm:$0xff] %v7506_v1 }
 0x39c   :  { %v1546_v11 = vpop.f32.mrf.mxu2  ;;  %2589 = vmatpush.bf16.msra.mxu0 %v5060_v61  ;;  %v5032_v61 = vor.u32 %v5633_v18, %v5029_v8 }
 0x39d   :  { %v1796_v7 = vadd.f32 %v1795_v19, %v1546_v11  ;;  %v5638_v19 = vld [vmem:[%s8780_s3 + $0x24] sm:$0xf0]  ;;  %v1805_v47 = vpop.f32.mrf.mxu3 }
 0x39e   :  { %v5044_v10 = vor.u32 %v5638_v19, %v5043_v39 }
 0x39f   :  { %v1903_v6 = vmax.f32 %v1298_v38, %v1796_v7  ;;  %v5037_v38 = vld [vmem:[%s8780_s3 + $0x18] sm:$0xf0] }
 0x3a0   :  { %v1575_v51 = vpop.f32.mrf.mxu0  ;;  %2590 = vmatpush.bf16.msra.mxu0 %v5052_v9  ;;  %v5040_v7 = vor.u32 %v5635_v26, %v5037_v38  ;;  %v1308_v9 = vadd.f32 %v6162_v44, %v7472_v17  ;;  %v8853_v26 = vld [vmem:[#allocation8_spill] sm:$0xff]  ;;  %v8854_v38 = vld [vmem:[#allocation9_spill] sm:$0xff] }
 0x3a1   :  { %v1576_v39 = vadd.f32 %v1575_v51, %v6213_v16  ;;  %v7602_v16 = vld [vmem:[%s8779_s2] ss:$0 sm:$0xff] }
 0x3a2   :  { %2681 = vmatpush.bf16.msra.mxu2 %v5040_v7  ;;  %v1313_v7 = vadd.f32 %v8854_v38, %v7498_v37 }
 0x3a3   :  { %v1815_v29 = vmax.f32 %v6123_v14, %v1576_v39 }
 0x3a4   :  { %v7530_v54 = vpop.f32.mrf.mxu2  ;;  %2591 = vmatpush.bf16.msra.mxu0 %v5044_v10 }
 0x3a5   :  { %8847 = vst [vmem:[#allocation40_spill] sm:$0xff] %v7530_v54  ;;  %v5666_v54 = vld [vmem:[%s8780_s3 + $0x104] sm:$0xf0] }
 0x3a6   :  { %2682 = vmatpush.bf16.msra.mxu2 %v5032_v61 }
 0x3a8   :  { %v1577_v2 = vpop.f32.mrf.mxu0  ;;  %2592 = vmatpush.bf16.msra.mxu0 %v5036_v50 }
 0x3a9   :  { %v1578_v44 = vadd.f32 %v1577_v2, %v6233_v36 }
 0x3ab   :  { %v1816_v14 = vmax.f32 %v6135_v24, %v1578_v44  ;;  %v8857_v24 = vld [vmem:[#allocation19_spill] sm:$0xff] }
 0x3ac   :  { %v1551_v46 = vpop.f32.mrf.mxu2 }
 0x3ad   :  { %v1801_v48 = vadd.f32 %v1800_v35, %v1551_v46  ;;  %v5028_v35 = vor.u32 %v5634_v59, %v5027_v57  ;;  %v8855_v59 = vld [vmem:[#allocation15_spill] sm:$0xff] }
 0x3af   :  { %v1905_v33 = vmax.f32 %v1303_v63, %v1801_v48  ;;  %2593 = vmatpush.bf16.msra.mxu0 %v5028_v35  ;;  %v7589_v63 = vpop.f32.mrf.mxu3 }
 0x3b0   :  { %v1580_v11 = vpop.f32.mrf.mxu0  ;;  %8850 = vst [vmem:[#allocation43_spill] sm:$0xff] %v7589_v63 }
 0x3b1   :  { %v1581_v18 = vadd.f32 %v1580_v11, %v8855_v59 }
 0x3b4   :  { %v7572_v13 = vpop.f32.mrf.mxu2 }
 0x3b5   :  { %8849 = vst [vmem:[#allocation42_spill] sm:$0xff] %v7572_v13 }
 0x3b8   :  { %v1582_v55 = vpop.f32.mrf.mxu0 }
 0x3bc   :  { %v1556_v52 = vpop.f32.mrf.mxu2 }
 0x3bd   :  { %v1806_v46 = vadd.f32 %v1805_v47, %v1556_v52 }
 0x3bf   :  { %v1907_v19 = vmax.f32 %v1308_v9, %v1806_v46  ;;  %v8858_v46 = vld [vmem:[#allocation4_spill] sm:$0xff] }
 0x3c0   :  { %v1585_v12 = vpop.f32.mrf.mxu0  ;;  %v1817_v39 = vmax.f32 %v8858_v46, %v1581_v18 }
 0x3c1   :  { %v7591_v48 = vmax.f32 %v1903_v6, %v1907_v19  ;;  %v1586_v10 = vadd.f32 %v1585_v12, %v6265_v4  ;;  %v1810_v4 = vpop.f32.mrf.mxu3  ;;  %v8859_v12 = vld [vmem:[#allocation10_spill] sm:$0xff] }
 0x3c3   :  { %8851 = vst [vmem:[#allocation44_spill] sm:$0xff] %v7591_v48  ;;  %v1819_v40 = vmax.f32 %v6173_v49, %v1586_v10 }
 0x3c4   :  { %v7596_v53 = vpop.f32.mrf.mxu2 }
 0x3c5   :  { %8852 = vst [vmem:[#allocation45_spill] sm:$0xff] %v7596_v53  ;;  %v1911_v23 = vmax.f32 %v1815_v29, %v1819_v40 }
 0x3c7   :  { %v1963_v6 = vadd.f32 %v7602_v16, %v1911_v23  ;;  %v8860_v23 = vld [vmem:[#allocation16_spill] sm:$0xff] }
 0x3c8   :  { %v1587_v17 = vpop.f32.mrf.mxu0  ;;  %v1583_v11 = vadd.f32 %v1582_v55, %v8860_v23  ;;  %v5163_v55 = vld [vmem:[%s8780_s3 + $0x170] sm:$0xf] }
 0x3c9   :  { %v1588_v51 = vadd.f32 %v1587_v17, %v6285_v28  ;;  %v2011_v36 = vmax.f32 %v1963_v6, 0.0 }
 0x3cb   :  { %v1820_v49 = vmax.f32 %v8853_v26, %v1588_v51  ;;  %v2059_v61 = vpack.c.bf16 %v2011_v36, %v2011_v36  ;;  %v8861_v51 = vld [vmem:[#allocation20_spill] sm:$0xff]  ;;  %v8862_v26 = vld [vmem:[#allocation6_spill] sm:$0xff]  ;;  %v5680_v36 = vld [vmem:[%s8780_s3 + $0x174] sm:$0xf0] }
 0x3cc   :  { %v1561_v50 = vpop.f32.mrf.mxu2 }
 0x3cd   :  { %v1912_v2 = vmax.f32 %v1816_v14, %v1820_v49  ;;  %v1811_v57 = vadd.f32 %v1810_v4, %v1561_v50  ;;  %v2498_v10 = vunpack.c.l.b16 %v2059_v61  ;;  %v5165_v14 = vld [vmem:[%s8780_s3 + $0x178] sm:$0xf0]  ;;  %v1818_v49 = vmax.f32 %v8862_v26, %v1583_v11  ;;  %v8863_v50 = vld [vmem:[#allocation12_spill] sm:$0xff] }
 0x3cf   :  { %v1964_v35 = vadd.f32 %v7602_v16, %v1912_v2  ;;  %v1909_v8 = vmax.f32 %v1313_v7, %v1811_v57  ;;  %v5164_v2 = vor.u32 %v5680_v36, %v5163_v55 }
 0x3d0   :  { %v1590_v47 = vpop.f32.mrf.mxu0 }
 0x3d1   :  { %v2012_v28 = vmax.f32 %v1964_v35, 0.0  ;;  %v7612_v52 = vmax.f32 %v1905_v33, %v1909_v8  ;;  %v1591_v9 = vadd.f32 %v1590_v47, %v8857_v24  ;;  %v5679_v33 = vld [vmem:[%s8780_s3 + $0x174] sm:$0xf]  ;;  %2873 = vmatpush.bf16.msra.mxu1 %v5164_v2  ;;  %v8864_v8 = vld [vmem:[#allocation21_spill] sm:$0xff] }
 0x3d2   :  { %v5168_v7 = vor.u32 %v5679_v33, %v5165_v14  ;;  %v8865_v24 = vld [vmem:[#allocation13_spill] sm:$0xff]  ;;  %v8871_v33 = vld [vmem:[#allocation18_spill] sm:$0xff]  ;;  %v8872_v14 = vld [vmem:[#allocation24_spill] sm:$0xff] }
 0x3d3   :  { %8856 = vst [vmem:[#allocation8_spill] sm:$0xff] %v7612_v52  ;;  %v2060_v19 = vpack.c.bf16 %v2012_v28, %v2012_v28  ;;  %v1821_v37 = vmax.f32 %v8859_v12, %v1591_v9  ;;  %v8873_v55 = vmax.f32 %v8871_v33, %v8872_v14  ;;  %v8880_v33 = vld [vmem:[#allocation30_spill] sm:$0xff]  ;;  %v5671_v14 = vld [vmem:[%s8780_s3 + $0x134] sm:$0xf]  ;;  %v5694_v52 = vld [vmem:[%s8780_s3 + $0x1e4] sm:$0xf0] }
 0x3d4   :  { %2962 = vmatpush.bf16.msra.mxu3 %v5168_v7 }
 0x3d5   :  { %v2499_v29 = vunpack.c.l.b16 %v2060_v19  ;;  %v1913_v40 = vmax.f32 %v1817_v39, %v1821_v37  ;;  %v8866_v39 = vld [vmem:[#allocation17_spill] sm:$0xff]  ;;  %v8867_v19 = vld [vmem:[#allocation23_spill] sm:$0xff] }
 0x3d6   :  { %v8868_v12 = vmax.f32 %v8866_v39, %v8867_v19  ;;  %v5676_v19 = vld [vmem:[%s8780_s3 + $0x154] sm:$0xf0] }
 0x3d7   :  { %v2502_v44 = vpack.c.b16 %v2499_v29, %v2498_v10  ;;  %v1965_v6 = vadd.f32 %v7602_v16, %v1913_v40 }
 0x3d8   :  { %v1592_v17 = vpop.f32.mrf.mxu0 }
 0x3d9   :  { %v1593_v4 = vadd.f32 %v1592_v17, %v8861_v51  ;;  %2594 = vmatmul.bf16.vlgmr.msra.gmra.mxu0 %v2502_v44  ;;  %2683 = vmatmul.bf16.vlgmr.msra.gmra.mxu2 %v2502_v44  ;;  %v2013_v59 = vmax.f32 %v1965_v6, 0.0  ;;  %v8869_v44 = vld [vmem:[#allocation22_spill] sm:$0xff] }
 0x3da   :  { %v8870_v6 = vld [vmem:[#allocation14_spill] sm:$0xff] }
 0x3db   :  { %v1822_v38 = vmax.f32 %v8863_v50, %v1593_v4  ;;  %v2061_v28 = vpack.c.bf16 %v2013_v59, %v2013_v59  ;;  %v5677_v59 = vld [vmem:[%s8780_s3 + $0x164] sm:$0xf] }
 0x3dd   :  { %v1914_v57 = vmax.f32 %v1818_v49, %v1822_v38  ;;  %v2500_v10 = vunpack.c.l.b16 %v2061_v28  ;;  %v8875_v28 = vld [vmem:[#allocation26_spill] sm:$0xff] }
 0x3df   :  { %v1966_v18 = vadd.f32 %v7602_v16, %v1914_v57 }
 0x3e0   :  { %v1595_v35 = vpop.f32.mrf.mxu0 }
 0x3e1   :  { %v1596_v47 = vadd.f32 %v1595_v35, %v8864_v8  ;;  %v2014_v61 = vmax.f32 %v1966_v18, 0.0  ;;  %v5157_v18 = vld [vmem:[%s8780_s3 + $0x168] sm:$0xf0]  ;;  %v5678_v8 = vld [vmem:[%s8780_s3 + $0x164] sm:$0xf0] }
 0x3e2   :  { %v5160_v35 = vor.u32 %v5677_v59, %v5157_v18  ;;  %v8881_v59 = vld [vmem:[#allocation31_spill] sm:$0xff] }
 0x3e3   :  { %v1823_v9 = vmax.f32 %v8865_v24, %v1596_v47  ;;  %v2062_v46 = vpack.c.bf16 %v2014_v61, %v2014_v61  ;;  %v8874_v61 = vld [vmem:[#allocation25_spill] sm:$0xff]  ;;  %v5675_v24 = vld [vmem:[%s8780_s3 + $0x154] sm:$0xf] }
 0x3e4   :  { %2963 = vmatpush.bf16.msra.mxu3 %v5160_v35  ;;  %v7725_v35 = vpop.f32.mrf.mxu3 }
 0x3e5   :  { %v1915_v37 = vmax.f32 %v1823_v9, %v8868_v12  ;;  %v2501_v29 = vunpack.c.l.b16 %v2062_v46  ;;  %v5149_v9 = vld [vmem:[%s8780_s3 + $0x158] sm:$0xf0]  ;;  %v5147_v46 = vld [vmem:[%s8780_s3 + $0x150] sm:$0xf]  ;;  %8882 = vst [vmem:[#allocation15_spill] sm:$0xff] %v7725_v35 }
 0x3e6   :  { %v5152_v39 = vor.u32 %v5675_v24, %v5149_v9  ;;  %v5148_v12 = vor.u32 %v5676_v19, %v5147_v46  ;;  %v5669_v9 = vld [vmem:[%s8780_s3 + $0x124] sm:$0xf]  ;;  %v5125_v46 = vld [vmem:[%s8780_s3 + $0x128] sm:$0xf0] }
 0x3e7   :  { %v2503_v40 = vpack.c.b16 %v2501_v29, %v2500_v10  ;;  %v1967_v11 = vadd.f32 %v7602_v16, %v1915_v37  ;;  %v8876_v37 = vld [vmem:[#allocation27_spill] sm:$0xff]  ;;  %v8877_v10 = vld [vmem:[#allocation28_spill] sm:$0xff]  ;;  %v5673_v29 = vld [vmem:[%s8780_s3 + $0x144] sm:$0xf] }
 0x3e8   :  { %v1597_v23 = vpop.f32.mrf.mxu0  ;;  %2964 = vmatpush.bf16.msra.mxu3 %v5152_v39  ;;  %v5128_v39 = vor.u32 %v5669_v9, %v5125_v46 }
 0x3e9   :  { %v1598_v17 = vadd.f32 %v1597_v23, %v8869_v44  ;;  %2599 = vmatmul.bf16.gmra.mxu0 %v2503_v40  ;;  %2688 = vmatmul.bf16.gmra.mxu2 %v2503_v40  ;;  %v2015_v4 = vmax.f32 %v1967_v11, 0.0  ;;  %v5141_v40 = vld [vmem:[%s8780_s3 + $0x148] sm:$0xf0]  ;;  %v5139_v11 = vld [vmem:[%s8780_s3 + $0x140] sm:$0xf] }
 0x3ea   :  { %v5144_v23 = vor.u32 %v5673_v29, %v5141_v40  ;;  %v5674_v44 = vld [vmem:[%s8780_s3 + $0x144] sm:$0xf0] }
 0x3eb   :  { %v1824_v51 = vmax.f32 %v8870_v6, %v1598_v17  ;;  %v2063_v50 = vpack.c.bf16 %v2015_v4, %v2015_v4  ;;  %v5140_v17 = vor.u32 %v5674_v44, %v5139_v11  ;;  %v8878_v6 = vld [vmem:[#allocation29_spill] sm:$0xff]  ;;  %v5123_v44 = vld [vmem:[%s8780_s3 + $0x120] sm:$0xf] }
 0x3ec   :  { %2965 = vmatpush.bf16.msra.mxu3 %v5144_v23 }
 0x3ed   :  { %v1916_v26 = vmax.f32 %v1824_v51, %v8873_v55  ;;  %v2172_v36 = vunpack.c.l.b16 %v2063_v50  ;;  %v7703_v51 = vpop.f32.mrf.mxu2  ;;  %v5133_v55 = vld [vmem:[%s8780_s3 + $0x138] sm:$0xf0] }
 0x3ee   :  { %8879 = vst [vmem:[#allocation9_spill] sm:$0xff] %v7703_v51 }
 0x3ef   :  { %v1968_v49 = vadd.f32 %v7602_v16, %v1916_v26  ;;  %v5155_v16 = vld [vmem:[%s8780_s3 + $0x160] sm:$0xf]  ;;  %v5136_v26 = vor.u32 %v5671_v14, %v5133_v55 }
 0x3f0   :  { %v5156_v47 = vor.u32 %v5678_v8, %v5155_v16 }
 0x3f1   :  { %v2016_v38 = vmax.f32 %v1968_v49, 0.0  ;;  %2966 = vmatpush.bf16.msra.mxu3 %v5136_v26 }
 0x3f2   :  { %2874 = vmatpush.bf16.msra.mxu1 %v5156_v47 }
 0x3f3   :  { %v2064_v7 = vpack.c.bf16 %v2016_v38, %v2016_v38  ;;  %v5131_v38 = vld [vmem:[%s8780_s3 + $0x130] sm:$0xf] }
 0x3f5   :  { %v2173_v2 = vunpack.c.l.b16 %v2064_v7  ;;  %v5672_v7 = vld [vmem:[%s8780_s3 + $0x134] sm:$0xf0]  ;;  %2967 = vmatpush.bf16.msra.mxu3 %v5128_v39 }
 0x3f6   :  { %2875 = vmatpush.bf16.msra.mxu1 %v5148_v12 }
 0x3f7   :  { %v2204_v57 = vpack.c.b16 %v2173_v2, %v2172_v36  ;;  %v5132_v36 = vor.u32 %v5672_v7, %v5131_v38  ;;  %v8883_v7 = vld [vmem:[#allocation32_spill] sm:$0xff] }
 0x3f9   :  { %2324 = vmatmul.bf16.vlgmr.msrb.gmra.mxu1 %v2204_v57  ;;  %2413 = vmatmul.bf16.vlgmr.msrb.gmra.mxu3 %v2204_v57 }
 0x3fa   :  { %2604 = vmatmul.bf16.gmra.mxu0 %v2204_v57  ;;  %2693 = vmatmul.bf16.gmra.mxu2 %v2204_v57 }
 0x3fb   :  { %2876 = vmatpush.bf16.msra.mxu1 %v5140_v17  ;;  %v5670_v17 = vld [vmem:[%s8780_s3 + $0x124] sm:$0xf0] }
 0x3ff   :  { %2877 = vmatpush.bf16.msra.mxu1 %v5132_v36 }
 0x409   :  { %2329 = vmatmul.bf16.gmra.mxu1 %v8874_v61  ;;  %2418 = vmatmul.bf16.gmra.mxu3 %v8874_v61 }
 0x40a   :  { %2609 = vmatmul.bf16.gmra.mxu0 %v8874_v61  ;;  %2698 = vmatmul.bf16.gmra.mxu2 %v8874_v61 }
 0x419   :  { %2334 = vmatmul.bf16.gmra.mxu1 %v8875_v28  ;;  %2423 = vmatmul.bf16.gmra.mxu3 %v8875_v28 }
 0x41a   :  { %2614 = vmatmul.bf16.gmra.mxu0 %v8875_v28  ;;  %2703 = vmatmul.bf16.gmra.mxu2 %v8875_v28 }
 0x429   :  { %2339 = vmatmul.bf16.gmra.mxu1 %v8876_v37  ;;  %2428 = vmatmul.bf16.gmra.mxu3 %v8876_v37 }
 0x42a   :  { %2619 = vmatmul.bf16.gmra.mxu0 %v8876_v37  ;;  %2708 = vmatmul.bf16.gmra.mxu2 %v8876_v37 }
 0x439   :  { %2344 = vmatmul.bf16.gmra.mxu1 %v8877_v10  ;;  %2433 = vmatmul.bf16.gmra.mxu3 %v8877_v10 }
 0x43a   :  { %2624 = vmatmul.bf16.gmra.mxu0 %v8877_v10  ;;  %2713 = vmatmul.bf16.gmra.mxu2 %v8877_v10 }
 0x449   :  { %2349 = vmatmul.bf16.gmra.mxu1 %v8878_v6  ;;  %2438 = vmatmul.bf16.gmra.mxu3 %v8878_v6 }
 0x44a   :  { %2629 = vmatmul.bf16.gmra.mxu0 %v8878_v6  ;;  %2718 = vmatmul.bf16.gmra.mxu2 %v8878_v6 }
 0x456   :  { %v2595_v4 = vpop.f32.mrf.mxu0 }
 0x459   :  { %2354 = vmatmul.bf16.gmra.mxu1 %v8880_v33  ;;  %2443 = vmatmul.bf16.gmra.mxu3 %v8880_v33 }
 0x45a   :  { %2634 = vmatmul.bf16.gmra.mxu0 %v8880_v33  ;;  %2723 = vmatmul.bf16.gmra.mxu2 %v8880_v33 }
 0x45c   :  { %v2684_v49 = vpop.f32.mrf.mxu2 }
 0x45e   :  { %v2597_v50 = vpop.f32.mrf.mxu0 }
 0x464   :  { %v2686_v2 = vpop.f32.mrf.mxu2 }
 0x466   :  { %v2600_v57 = vpop.f32.mrf.mxu0 }
 0x469   :  { %2359 = vmatmul.bf16.gmra.mxu1 %v8881_v59  ;;  %2448 = vmatmul.bf16.gmra.mxu3 %v8881_v59 }
 0x46a   :  { %2639 = vmatmul.bf16.gmra.mxu0 %v8881_v59  ;;  %2728 = vmatmul.bf16.gmra.mxu2 %v8881_v59 }
 0x46c   :  { %v2689_v18 = vpop.f32.mrf.mxu2 }
 0x46e   :  { %v2602_v16 = vpop.f32.mrf.mxu0 }
 0x474   :  { %v2691_v8 = vpop.f32.mrf.mxu2 }
 0x476   :  { %v2325_v47 = vpop.f32.mrf.mxu1 }
 0x477   :  { %v7727_v61 = vadd.f32 %v2595_v4, %v2325_v47  ;;  %v2605_v24 = vpop.f32.mrf.mxu0  ;;  %v5124_v4 = vor.u32 %v5670_v17, %v5123_v44 }
 0x479   :  { %2364 = vmatmul.bf16.gmra.mxu1 %v6992_v42  ;;  %2453 = vmatmul.bf16.gmra.mxu3 %v6992_v42 }
 0x47a   :  { %2644 = vmatmul.bf16.gmra.mxu0 %v6992_v42  ;;  %2733 = vmatmul.bf16.gmra.mxu2 %v6992_v42 }
 0x47b   :  { %2878 = vmatpush.bf16.msra.mxu1 %v5124_v4 }
 0x47c   :  { %v2414_v19 = vpop.f32.mrf.mxu3 }
 0x47d   :  { %v7739_v12 = vadd.f32 %v2684_v49, %v2414_v19  ;;  %v2694_v29 = vpop.f32.mrf.mxu2 }
 0x47e   :  { %v2327_v40 = vpop.f32.mrf.mxu1 }
 0x47f   :  { %v7741_v23 = vadd.f32 %v2597_v50, %v2327_v40  ;;  %v2607_v11 = vpop.f32.mrf.mxu0 }
 0x484   :  { %v2416_v14 = vpop.f32.mrf.mxu3 }
 0x485   :  { %v7749_v55 = vadd.f32 %v2686_v2, %v2416_v14  ;;  %v7751_v26 = vpop.f32.mrf.mxu2  ;;  %v8884_v14 = vld [vmem:[#allocation33_spill] sm:$0xff] }
 0x486   :  { %v2330_v49 = vpop.f32.mrf.mxu1 }
 0x487   :  { %v7753_v38 = vadd.f32 %v2600_v57, %v2330_v49  ;;  %v7755_v50 = vpop.f32.mrf.mxu0  ;;  %v5245_v49 = vld [vmem:[%s8780_s3 + $0x1f8] sm:$0xf0] }
 0x489   :  { %2369 = vmatmul.bf16.gmra.mxu1 %v8883_v7  ;;  %2458 = vmatmul.bf16.gmra.mxu3 %v8883_v7 }
 0x48a   :  { %2649 = vmatmul.bf16.gmra.mxu0 %v8883_v7  ;;  %2738 = vmatmul.bf16.gmra.mxu2 %v8883_v7 }
 0x48c   :  { %v2419_v36 = vpop.f32.mrf.mxu3 }
 0x48d   :  { %v7761_v47 = vadd.f32 %v2689_v18, %v2419_v36  ;;  %v7763_v2 = vpop.f32.mrf.mxu2  ;;  %v5243_v18 = vld [vmem:[%s8780_s3 + $0x1f0] sm:$0xf]  ;;  %v5667_v36 = vld [vmem:[%s8780_s3 + $0x114] sm:$0xf] }
 0x48e   :  { %v2332_v9 = vpop.f32.mrf.mxu1 }
 0x48f   :  { %v7765_v46 = vadd.f32 %v2602_v16, %v2332_v9  ;;  %v7767_v57 = vpop.f32.mrf.mxu0  ;;  %v5696_v16 = vld [vmem:[%s8780_s3 + $0x1f4] sm:$0xf0]  ;;  %v5117_v9 = vld [vmem:[%s8780_s3 + $0x118] sm:$0xf0] }
 0x494   :  { %v2421_v39 = vpop.f32.mrf.mxu3 }
 0x495   :  { %v7769_v19 = vadd.f32 %v2691_v8, %v2421_v39  ;;  %v7771_v40 = vpop.f32.mrf.mxu2  ;;  %v5695_v8 = vld [vmem:[%s8780_s3 + $0x1f4] sm:$0xf] }
 0x496   :  { %v2335_v44 = vpop.f32.mrf.mxu1  ;;  %v5248_v39 = vor.u32 %v5695_v8, %v5245_v49 }
 0x497   :  { %v7773_v17 = vadd.f32 %v2605_v24, %v2335_v44  ;;  %v7775_v4 = vpop.f32.mrf.mxu0  ;;  %v5244_v24 = vor.u32 %v5696_v16, %v5243_v18  ;;  %v5120_v44 = vor.u32 %v5667_v36, %v5117_v9  ;;  %v5235_v16 = vld [vmem:[%s8780_s3 + $0x1e0] sm:$0xf] }
 0x498   :  { %3313 = vmatpush.bf16.msrb.mxu2 %v5248_v39  ;;  %v5236_v8 = vor.u32 %v5694_v52, %v5235_v16  ;;  %v5227_v52 = vld [vmem:[%s8780_s3 + $0x1d0] sm:$0xf]  ;;  %v5229_v16 = vld [vmem:[%s8780_s3 + $0x1d8] sm:$0xf0] }
 0x499   :  { %2374 = vmatmul.bf16.gmra.mxu1 %v8884_v14  ;;  %2463 = vmatmul.bf16.gmra.mxu3 %v8884_v14 }
 0x49a   :  { %2654 = vmatmul.bf16.gmra.mxu0 %v8884_v14  ;;  %2743 = vmatmul.bf16.gmra.mxu2 %v8884_v14 }
 0x49b   :  { %3224 = vmatpush.bf16.msrb.mxu0 %v5244_v24  ;;  %2968 = vmatpush.bf16.msra.mxu3 %v5120_v44  ;;  %v5237_v24 = vld [vmem:[%s8780_s3 + $0x1e8] sm:$0xf0]  ;;  %v5668_v44 = vld [vmem:[%s8780_s3 + $0x114] sm:$0xf0] }
 0x49c   :  { %v2424_v18 = vpop.f32.mrf.mxu3  ;;  %v5240_v36 = vor.u32 %v5693_v0, %v5237_v24  ;;  %v5692_v0 = vld [vmem:[%s8780_s3 + $0x1d4] sm:$0xf0] }
 0x49d   :  { %v7808_v43 = vadd.f32 %v2694_v29, %v2424_v18  ;;  %v7810_v13 = vpop.f32.mrf.mxu2  ;;  %v5115_v29 = vld [vmem:[%s8780_s3 + $0x110] sm:$0xf] }
 0x49e   :  { %v2337_v49 = vpop.f32.mrf.mxu1  ;;  %3314 = vmatpush.bf16.msrb.mxu2 %v5240_v36  ;;  %v5116_v18 = vor.u32 %v5668_v44, %v5115_v29  ;;  %v5219_v36 = vld [vmem:[%s8780_s3 + $0x1c0] sm:$0xf]  ;;  %v5690_v29 = vld [vmem:[%s8780_s3 + $0x1c4] sm:$0xf0]  ;;  %v5689_v44 = vld [vmem:[%s8780_s3 + $0x1c4] sm:$0xf] }
 0x49f   :  { %v7815_v9 = vadd.f32 %v2607_v11, %v2337_v49  ;;  %v7817_v39 = vpop.f32.mrf.mxu0  ;;  %3225 = vmatpush.bf16.msrb.mxu0 %v5236_v8  ;;  %v5691_v11 = vld [vmem:[%s8780_s3 + $0x1d4] sm:$0xf]  ;;  %v5228_v8 = vor.u32 %v5692_v0, %v5227_v52  ;;  %v5221_v0 = vld [vmem:[%s8780_s3 + $0x1c8] sm:$0xf0] }
 0x4a0   :  { %v5232_v24 = vor.u32 %v5691_v11, %v5229_v16  ;;  %2879 = vmatpush.bf16.msra.mxu1 %v5116_v18  ;;  %v5220_v18 = vor.u32 %v5690_v29, %v5219_v36  ;;  %v5224_v16 = vor.u32 %v5689_v44, %v5221_v0  ;;  %v5687_v36 = vld [vmem:[%s8780_s3 + $0x1b4] sm:$0xf]  ;;  %v8885_v29 = vld [vmem:[#allocation34_spill] sm:$0xff]  ;;  %v5213_v44 = vld [vmem:[%s8780_s3 + $0x1b8] sm:$0xf0] }
 0x4a2   :  { %3315 = vmatpush.bf16.msrb.mxu2 %v5232_v24 }
 0x4a3   :  { %3226 = vmatpush.bf16.msrb.mxu0 %v5228_v8 }
 0x4a4   :  { %v2426_v49 = vpop.f32.mrf.mxu3 }
 0x4a5   :  { %v7847_v1 = vadd.f32 %v7751_v26, %v2426_v49  ;;  %v7849_v52 = vpop.f32.mrf.mxu2  ;;  %v5211_v26 = vld [vmem:[%s8780_s3 + $0x1b0] sm:$0xf]  ;;  %v5688_v49 = vld [vmem:[%s8780_s3 + $0x1b4] sm:$0xf0] }
 0x4a6   :  { %v2340_v11 = vpop.f32.mrf.mxu1  ;;  %3316 = vmatpush.bf16.msrb.mxu2 %v5224_v16  ;;  %v5686_v16 = vld [vmem:[%s8780_s3 + $0x1a4] sm:$0xf0] }
 0x4a7   :  { %v7855_v8 = vadd.f32 %v7755_v50, %v2340_v11  ;;  %v7857_v24 = vpop.f32.mrf.mxu0  ;;  %3227 = vmatpush.bf16.msrb.mxu0 %v5220_v18  ;;  %v5212_v50 = vor.u32 %v5688_v49, %v5211_v26  ;;  %v5216_v18 = vor.u32 %v5687_v36, %v5213_v44  ;;  %v5203_v11 = vld [vmem:[%s8780_s3 + $0x1a0] sm:$0xf]  ;;  %v5685_v26 = vld [vmem:[%s8780_s3 + $0x1a4] sm:$0xf] }
 0x4a8   :  { %v5204_v36 = vor.u32 %v5686_v16, %v5203_v11 }
 0x4a9   :  { %2379 = vmatmul.bf16.gmra.mxu1 %v8885_v29  ;;  %2468 = vmatmul.bf16.gmra.mxu3 %v8885_v29 }
 0x4aa   :  { %2659 = vmatmul.bf16.gmra.mxu0 %v8885_v29  ;;  %2748 = vmatmul.bf16.gmra.mxu2 %v8885_v29 }
 0x4ab   :  { %3228 = vmatpush.bf16.msrb.mxu0 %v5212_v50  ;;  %3317 = vmatpush.bf16.msrb.mxu2 %v5216_v18  ;;  %v5205_v50 = vld [vmem:[%s8780_s3 + $0x1a8] sm:$0xf0] }
 0x4ac   :  { %v2429_v0 = vpop.f32.mrf.mxu3  ;;  %v5208_v18 = vor.u32 %v5685_v26, %v5205_v50  ;;  %v5682_v50 = vld [vmem:[%s8780_s3 + $0x184] sm:$0xf0] }
 0x4ad   :  { %v7885_v49 = vadd.f32 %v7763_v2, %v2429_v0  ;;  %v2709_v35 = vpop.f32.mrf.mxu2  ;;  %v5684_v2 = vld [vmem:[%s8780_s3 + $0x194] sm:$0xf0]  ;;  %v5683_v0 = vld [vmem:[%s8780_s3 + $0x194] sm:$0xf] }
 0x4ae   :  { %v2342_v44 = vpop.f32.mrf.mxu1  ;;  %v5196_v11 = vor.u32 %v5684_v2, %v5195_v27  ;;  %v5681_v27 = vld [vmem:[%s8780_s3 + $0x184] sm:$0xf] }
 0x4af   :  { %v7891_v51 = vadd.f32 %v7767_v57, %v2342_v44  ;;  %v2622_v48 = vpop.f32.mrf.mxu0  ;;  %3229 = vmatpush.bf16.msrb.mxu0 %v5204_v36  ;;  %3318 = vmatpush.bf16.msrb.mxu2 %v5208_v18  ;;  %v5197_v57 = vld [vmem:[%s8780_s3 + $0x198] sm:$0xf0]  ;;  %v5187_v36 = vld [vmem:[%s8780_s3 + $0x180] sm:$0xf] }
 0x4b0   :  { %v5200_v16 = vor.u32 %v5683_v0, %v5197_v57  ;;  %v5188_v2 = vor.u32 %v5682_v50, %v5187_v36  ;;  %v5189_v0 = vld [vmem:[%s8780_s3 + $0x188] sm:$0xf0] }
 0x4b1   :  { %v5192_v57 = vor.u32 %v5681_v27, %v5189_v0 }
 0x4b3   :  { %3230 = vmatpush.bf16.msrb.mxu0 %v5196_v11  ;;  %3319 = vmatpush.bf16.msrb.mxu2 %v5200_v16 }
 0x4b4   :  { %v2431_v26 = vpop.f32.mrf.mxu3 }
 0x4b5   :  { %v7915_v44 = vadd.f32 %v7771_v40, %v2431_v26  ;;  %v2711_v18 = vpop.f32.mrf.mxu2  ;;  %v5665_v40 = vld [vmem:[%s8780_s3 + $0x104] sm:$0xf]  ;;  %v5109_v26 = vld [vmem:[%s8780_s3 + $0x108] sm:$0xf0] }
 0x4b6   :  { %v2345_v11 = vpop.f32.mrf.mxu1 }
 0x4b7   :  { %v7921_v16 = vadd.f32 %v7775_v4, %v2345_v11  ;;  %v2625_v60 = vpop.f32.mrf.mxu0  ;;  %3231 = vmatpush.bf16.msrb.mxu0 %v5188_v2  ;;  %3320 = vmatpush.bf16.msrb.mxu2 %v5192_v57  ;;  %v5112_v4 = vor.u32 %v5665_v40, %v5109_v26  ;;  %v5107_v57 = vld [vmem:[%s8780_s3 + $0x100] sm:$0xf] }
 0x4b8   :  { %v5108_v40 = vor.u32 %v5666_v54, %v5107_v57 }
 0x4b9   :  { %2384 = vmatmul.bf16.gmra.mxu1 %v7256_v56  ;;  %2473 = vmatmul.bf16.gmra.mxu3 %v7256_v56 }
 0x4ba   :  { %2664 = vmatmul.bf16.gmra.mxu0 %v7256_v56  ;;  %2753 = vmatmul.bf16.gmra.mxu2 %v7256_v56 }
 0x4bb   :  { %2969 = vmatpush.bf16.msra.mxu3 %v5112_v4  ;;  %2880 = vmatpush.bf16.msra.mxu1 %v5108_v40 }
 0x4bc   :  { %v2434_v36 = vpop.f32.mrf.mxu3 }
 0x4bd   :  { %v7934_v50 = vadd.f32 %v7810_v13, %v2434_v36  ;;  %v2714_v27 = vpop.f32.mrf.mxu2 }
 0x4be   :  { %v2347_v2 = vpop.f32.mrf.mxu1 }
 0x4bf   :  { %v7937_v0 = vadd.f32 %v7817_v39, %v2347_v2  ;;  %v2627_v11 = vpop.f32.mrf.mxu0 }
 0x4c4   :  { %v2436_v26 = vpop.f32.mrf.mxu3 }
 0x4c5   :  { %v7946_v13 = vadd.f32 %v7849_v52, %v2436_v26  ;;  %v2716_v4 = vpop.f32.mrf.mxu2 }
 0x4c6   :  { %v2350_v36 = vpop.f32.mrf.mxu1 }
 0x4c7   :  { %8886 = vst [vmem:[#allocation19_spill] sm:$0xff] %v7946_v13  ;;  %v7949_v39 = vadd.f32 %v7857_v24, %v2350_v36  ;;  %v2630_v2 = vpop.f32.mrf.mxu0 }
 0x4c9   :  { %8887 = vst [vmem:[#allocation4_spill] sm:$0xff] %v7949_v39  ;;  %2389 = vmatmul.bf16.gmra.mxu1 %v7287_v25  ;;  %2478 = vmatmul.bf16.gmra.mxu3 %v7287_v25 }
 0x4ca   :  { %2669 = vmatmul.bf16.gmra.mxu0 %v7287_v25  ;;  %2758 = vmatmul.bf16.gmra.mxu2 %v7287_v25 }
 0x4cc   :  { %v2439_v54 = vpop.f32.mrf.mxu3 }
 0x4cd   :  { %v7955_v57 = vadd.f32 %v2709_v35, %v2439_v54  ;;  %v2719_v40 = vpop.f32.mrf.mxu2 }
 0x4ce   :  { %v2352_v52 = vpop.f32.mrf.mxu1 }
 0x4cf   :  { %8888 = vst [vmem:[#allocation10_spill] sm:$0xff] %v7955_v57  ;;  %v7957_v26 = vadd.f32 %v2622_v48, %v2352_v52  ;;  %v2632_v34 = vpop.f32.mrf.mxu0  ;;  %v5711_v48 = vld [vmem:[%s8780_s3 + $0x274] sm:$0xf] }
 0x4d1   :  { %8889 = vst [vmem:[#allocation16_spill] sm:$0xff] %v7957_v26  ;;  %v5712_v26 = vld [vmem:[%s8780_s3 + $0x274] sm:$0xf0] }
 0x4d4   :  { %v2441_v63 = vpop.f32.mrf.mxu3 }
 0x4d5   :  { %v7959_v24 = vadd.f32 %v2711_v18, %v2441_v63  ;;  %v2721_v36 = vpop.f32.mrf.mxu2  ;;  %v5325_v63 = vld [vmem:[%s8780_s3 + $0x278] sm:$0xf0] }
 0x4d6   :  { %v2355_v53 = vpop.f32.mrf.mxu1  ;;  %v5328_v35 = vor.u32 %v5711_v48, %v5325_v63 }
 0x4d7   :  { %8890 = vst [vmem:[#allocation20_spill] sm:$0xff] %v7959_v24  ;;  %v7961_v39 = vadd.f32 %v2625_v60, %v2355_v53  ;;  %v2635_v13 = vpop.f32.mrf.mxu0  ;;  %v5323_v24 = vld [vmem:[%s8780_s3 + $0x270] sm:$0xf] }
 0x4d8   :  { %3664 = vmatpush.bf16.msrb.mxu3 %v5328_v35  ;;  %v5324_v57 = vor.u32 %v5712_v26, %v5323_v24 }
 0x4d9   :  { %8891 = vst [vmem:[#allocation6_spill] sm:$0xff] %v7961_v39  ;;  %2394 = vmatmul.bf16.gmra.mxu1 %v7368_v21  ;;  %2483 = vmatmul.bf16.gmra.mxu3 %v7368_v21 }
 0x4da   :  { %3232 = vmatmul.bf16.vlgmr.msrb.gmra.mxu0 %v8877_v10  ;;  %3321 = vmatmul.bf16.vlgmr.msrb.gmra.mxu2 %v8877_v10 }
 0x4db   :  { %3575 = vmatpush.bf16.msrb.mxu1 %v5324_v57 }
 0x4dc   :  { %v2444_v60 = vpop.f32.mrf.mxu3 }
 0x4dd   :  { %v7973_v53 = vadd.f32 %v2714_v27, %v2444_v60  ;;  %v2724_v18 = vpop.f32.mrf.mxu2 }
 0x4de   :  { %v2357_v54 = vpop.f32.mrf.mxu1 }
 0x4df   :  { %8892 = vst [vmem:[#allocation12_spill] sm:$0xff] %v7973_v53  ;;  %v7975_v52 = vadd.f32 %v2627_v11, %v2357_v54  ;;  %v2637_v39 = vpop.f32.mrf.mxu0 }
 0x4e1   :  { %8893 = vst [vmem:[#allocation21_spill] sm:$0xff] %v7975_v52 }
 0x4e4   :  { %v2446_v48 = vpop.f32.mrf.mxu3 }
 0x4e5   :  { %v7983_v63 = vadd.f32 %v2716_v4, %v2446_v48  ;;  %v2726_v27 = vpop.f32.mrf.mxu2 }
 0x4e6   :  { %v2360_v60 = vpop.f32.mrf.mxu1 }
 0x4e7   :  { %8894 = vst [vmem:[#allocation13_spill] sm:$0xff] %v7983_v63  ;;  %v7985_v35 = vadd.f32 %v2630_v2, %v2360_v60  ;;  %v2640_v11 = vpop.f32.mrf.mxu0 }
 0x4e9   :  { %8895 = vst [vmem:[#allocation17_spill] sm:$0xff] %v7985_v35  ;;  %2399 = vmatmul.bf16.gmra.mxu1 %v7385_v45  ;;  %2488 = vmatmul.bf16.gmra.mxu3 %v7385_v45 }
 0x4ea   :  { %3237 = vmatmul.bf16.gmra.mxu0 %v8878_v6  ;;  %3326 = vmatmul.bf16.gmra.mxu2 %v8878_v6 }
 0x4ec   :  { %v2449_v54 = vpop.f32.mrf.mxu3 }
 0x4ed   :  { %v7991_v52 = vadd.f32 %v2719_v40, %v2449_v54  ;;  %v2729_v57 = vpop.f32.mrf.mxu2  ;;  %v5317_v40 = vld [vmem:[%s8780_s3 + $0x268] sm:$0xf0] }
 0x4ee   :  { %v2362_v26 = vpop.f32.mrf.mxu1 }
 0x4ef   :  { %v7993_v4 = vadd.f32 %v2632_v34, %v2362_v26  ;;  %v2642_v24 = vpop.f32.mrf.mxu0  ;;  %v5709_v34 = vld [vmem:[%s8780_s3 + $0x264] sm:$0xf] }
 0x4f1   :  { %8896 = vst [vmem:[#allocation23_spill] sm:$0xff] %v7993_v4 }
 0x4f4   :  { %v2451_v48 = vpop.f32.mrf.mxu3 }
 0x4f5   :  { %v7995_v2 = vadd.f32 %v2721_v36, %v2451_v48  ;;  %v2731_v60 = vpop.f32.mrf.mxu2  ;;  %v5320_v36 = vor.u32 %v5709_v34, %v5317_v40 }
 0x4f6   :  { %v2365_v35 = vpop.f32.mrf.mxu1 }
 0x4f7   :  { %8897 = vst [vmem:[#allocation22_spill] sm:$0xff] %v7995_v2  ;;  %v7997_v63 = vadd.f32 %v2635_v13, %v2365_v35  ;;  %v2645_v53 = vpop.f32.mrf.mxu0  ;;  %3665 = vmatpush.bf16.msrb.mxu3 %v5320_v36  ;;  %v5710_v2 = vld [vmem:[%s8780_s3 + $0x264] sm:$0xf0] }
 0x4f9   :  { %8898 = vst [vmem:[#allocation14_spill] sm:$0xff] %v7997_v63  ;;  %2881 = vmatmul.bf16.vlgmr.msra.gmra.mxu1 %v8875_v28  ;;  %2970 = vmatmul.bf16.vlgmr.msra.gmra.mxu3 %v8875_v28  ;;  %v5315_v63 = vld [vmem:[%s8780_s3 + $0x260] sm:$0xf] }
 0x4fa   :  { %3242 = vmatmul.bf16.gmra.mxu0 %v8880_v33  ;;  %3331 = vmatmul.bf16.gmra.mxu2 %v8880_v33  ;;  %v5316_v4 = vor.u32 %v5710_v2, %v5315_v63 }
 0x4fc   :  { %v2454_v13 = vpop.f32.mrf.mxu3  ;;  %3576 = vmatpush.bf16.msrb.mxu1 %v5316_v4 }
 0x4fd   :  { %v8009_v35 = vadd.f32 %v2724_v18, %v2454_v13  ;;  %v2734_v54 = vpop.f32.mrf.mxu2 }
 0x4fe   :  { %v2367_v26 = vpop.f32.mrf.mxu1 }
 0x4ff   :  { %v8011_v28 = vadd.f32 %v2637_v39, %v2367_v26  ;;  %v2647_v48 = vpop.f32.mrf.mxu0 }
 0x501   :  { %8899 = vst [vmem:[#allocation18_spill] sm:$0xff] %v8011_v28 }
 0x504   :  { %v2456_v34 = vpop.f32.mrf.mxu3 }
 0x505   :  { %v8019_v40 = vadd.f32 %v2726_v27, %v2456_v34  ;;  %v2736_v18 = vpop.f32.mrf.mxu2 }
 0x506   :  { %v2370_v13 = vpop.f32.mrf.mxu1 }
 0x507   :  { %8900 = vst [vmem:[#allocation24_spill] sm:$0xff] %v8019_v40  ;;  %v8021_v36 = vadd.f32 %v2640_v11, %v2370_v13  ;;  %v2650_v39 = vpop.f32.mrf.mxu0 }
 0x509   :  { %8901 = vst [vmem:[#allocation25_spill] sm:$0xff] %v8021_v36  ;;  %2886 = vmatmul.bf16.gmra.mxu1 %v8876_v37  ;;  %2975 = vmatmul.bf16.gmra.mxu3 %v8876_v37 }
 0x50a   :  { %3247 = vmatmul.bf16.gmra.mxu0 %v8881_v59  ;;  %3336 = vmatmul.bf16.gmra.mxu2 %v8881_v59 }
 0x50c   :  { %v2459_v26 = vpop.f32.mrf.mxu3 }
 0x50d   :  { %v8027_v28 = vadd.f32 %v2729_v57, %v2459_v26  ;;  %v2739_v63 = vpop.f32.mrf.mxu2  ;;  %v5707_v57 = vld [vmem:[%s8780_s3 + $0x254] sm:$0xf] }
 0x50e   :  { %v2372_v4 = vpop.f32.mrf.mxu1 }
 0x50f   :  { %v8029_v27 = vadd.f32 %v2642_v24, %v2372_v4  ;;  %v2652_v2 = vpop.f32.mrf.mxu0  ;;  %v5309_v24 = vld [vmem:[%s8780_s3 + $0x258] sm:$0xf0]  ;;  %v5307_v4 = vld [vmem:[%s8780_s3 + $0x250] sm:$0xf] }
 0x511   :  { %8902 = vst [vmem:[#allocation26_spill] sm:$0xff] %v8029_v27 }
 0x514   :  { %v2461_v34 = vpop.f32.mrf.mxu3 }
 0x515   :  { %v8031_v11 = vadd.f32 %v2731_v60, %v2461_v34  ;;  %v2741_v13 = vpop.f32.mrf.mxu2  ;;  %v5312_v60 = vor.u32 %v5707_v57, %v5309_v24  ;;  %v5708_v34 = vld [vmem:[%s8780_s3 + $0x254] sm:$0xf0] }
 0x516   :  { %v2375_v36 = vpop.f32.mrf.mxu1 }
 0x517   :  { %8903 = vst [vmem:[#allocation27_spill] sm:$0xff] %v8031_v11  ;;  %v8033_v40 = vadd.f32 %v2645_v53, %v2375_v36  ;;  %v2655_v37 = vpop.f32.mrf.mxu0  ;;  %3666 = vmatpush.bf16.msrb.mxu3 %v5312_v60  ;;  %v5308_v11 = vor.u32 %v5708_v34, %v5307_v4 }
 0x519   :  { %8904 = vst [vmem:[#allocation28_spill] sm:$0xff] %v8033_v40  ;;  %2891 = vmatmul.bf16.gmra.mxu1 %v8877_v10  ;;  %2980 = vmatmul.bf16.gmra.mxu3 %v8877_v10 }
 0x51a   :  { %3252 = vmatmul.bf16.gmra.mxu0 %v6992_v42  ;;  %3341 = vmatmul.bf16.gmra.mxu2 %v6992_v42 }
 0x51b   :  { %3577 = vmatpush.bf16.msrb.mxu1 %v5308_v11 }
 0x51c   :  { %v2464_v53 = vpop.f32.mrf.mxu3 }
 0x51d   :  { %v8045_v36 = vadd.f32 %v2734_v54, %v2464_v53  ;;  %v2744_v40 = vpop.f32.mrf.mxu2 }
 0x51e   :  { %v2377_v26 = vpop.f32.mrf.mxu1 }
 0x51f   :  { %v8047_v10 = vadd.f32 %v2647_v48, %v2377_v26  ;;  %v2657_v27 = vpop.f32.mrf.mxu0 }
 0x524   :  { %v2466_v57 = vpop.f32.mrf.mxu3 }
 0x525   :  { %v8055_v24 = vadd.f32 %v2736_v18, %v2466_v57  ;;  %v2746_v48 = vpop.f32.mrf.mxu2 }
 0x526   :  { %v2380_v54 = vpop.f32.mrf.mxu1 }
 0x527   :  { %v8057_v60 = vadd.f32 %v2650_v39, %v2380_v54  ;;  %v2660_v11 = vpop.f32.mrf.mxu0 }
 0x529   :  { %8905 = vst [vmem:[#allocation29_spill] sm:$0xff] %v8057_v60  ;;  %2896 = vmatmul.bf16.gmra.mxu1 %v8878_v6  ;;  %2985 = vmatmul.bf16.gmra.mxu3 %v8878_v6 }
 0x52a   :  { %3257 = vmatmul.bf16.gmra.mxu0 %v8883_v7  ;;  %3346 = vmatmul.bf16.gmra.mxu2 %v8883_v7 }
 0x52c   :  { %v2469_v53 = vpop.f32.mrf.mxu3 }
 0x52d   :  { %v8063_v26 = vadd.f32 %v2739_v63, %v2469_v53  ;;  %v2749_v18 = vpop.f32.mrf.mxu2  ;;  %v5705_v63 = vld [vmem:[%s8780_s3 + $0x244] sm:$0xf] }
 0x52e   :  { %v2382_v4 = vpop.f32.mrf.mxu1 }
 0x52f   :  { %8906 = vst [vmem:[#allocation30_spill] sm:$0xff] %v8063_v26  ;;  %v8065_v34 = vadd.f32 %v2652_v2, %v2382_v4  ;;  %v2662_v6 = vpop.f32.mrf.mxu0  ;;  %v5301_v2 = vld [vmem:[%s8780_s3 + $0x248] sm:$0xf0] }
 0x531   :  { %8907 = vst [vmem:[#allocation31_spill] sm:$0xff] %v8065_v34 }
 0x534   :  { %v2471_v57 = vpop.f32.mrf.mxu3 }
 0x535   :  { %v8067_v39 = vadd.f32 %v2741_v13, %v2471_v57  ;;  %v5304_v13 = vor.u32 %v5705_v63, %v5301_v2  ;;  %v2751_v4 = vpop.f32.mrf.mxu2 }
 0x536   :  { %v2385_v54 = vpop.f32.mrf.mxu1 }
 0x537   :  { %8908 = vst [vmem:[#allocation32_spill] sm:$0xff] %v8067_v39  ;;  %v8069_v60 = vadd.f32 %v2655_v37, %v2385_v54  ;;  %3667 = vmatpush.bf16.msrb.mxu3 %v5304_v13  ;;  %v5706_v39 = vld [vmem:[%s8780_s3 + $0x244] sm:$0xf0]  ;;  %v2665_v26 = vpop.f32.mrf.mxu0 }
 0x539   :  { %8909 = vst [vmem:[#allocation33_spill] sm:$0xff] %v8069_v60  ;;  %2901 = vmatmul.bf16.gmra.mxu1 %v8880_v33  ;;  %2990 = vmatmul.bf16.gmra.mxu3 %v8880_v33  ;;  %v5299_v60 = vld [vmem:[%s8780_s3 + $0x240] sm:$0xf] }
 0x53a   :  { %3262 = vmatmul.bf16.gmra.mxu0 %v8884_v14  ;;  %3351 = vmatmul.bf16.gmra.mxu2 %v8884_v14  ;;  %v5300_v34 = vor.u32 %v5706_v39, %v5299_v60 }
 0x53c   :  { %v2474_v37 = vpop.f32.mrf.mxu3  ;;  %3578 = vmatpush.bf16.msrb.mxu1 %v5300_v34 }
 0x53d   :  { %v8081_v53 = vadd.f32 %v2744_v40, %v2474_v37  ;;  %v2754_v37 = vpop.f32.mrf.mxu2 }
 0x53e   :  { %v2387_v57 = vpop.f32.mrf.mxu1 }
 0x53f   :  { %v8083_v54 = vadd.f32 %v2657_v27, %v2387_v57  ;;  %v2667_v27 = vpop.f32.mrf.mxu0 }
 0x544   :  { %v2476_v63 = vpop.f32.mrf.mxu3 }
 0x545   :  { %v8091_v2 = vadd.f32 %v2746_v48, %v2476_v63  ;;  %v2756_v48 = vpop.f32.mrf.mxu2 }
 0x546   :  { %v2390_v40 = vpop.f32.mrf.mxu1 }
 0x547   :  { %8910 = vst [vmem:[#allocation34_spill] sm:$0xff] %v8091_v2  ;;  %v8093_v13 = vadd.f32 %v2660_v11, %v2390_v40  ;;  %v2670_v40 = vpop.f32.mrf.mxu0 }
 0x549   :  { %8911 = vst [vmem:[#allocation46_spill] sm:$0xff] %v8093_v13  ;;  %2906 = vmatmul.bf16.gmra.mxu1 %v8881_v59  ;;  %2995 = vmatmul.bf16.gmra.mxu3 %v8881_v59 }
 0x54a   :  { %3267 = vmatmul.bf16.gmra.mxu0 %v8885_v29  ;;  %3356 = vmatmul.bf16.gmra.mxu2 %v8885_v29 }
 0x54c   :  { %v2479_v57 = vpop.f32.mrf.mxu3 }
 0x54d   :  { %v8099_v60 = vadd.f32 %v2749_v18, %v2479_v57  ;;  %v5703_v18 = vld [vmem:[%s8780_s3 + $0x234] sm:$0xf]  ;;  %v2759_v57 = vpop.f32.mrf.mxu2 }
 0x54e   :  { %v2392_v34 = vpop.f32.mrf.mxu1 }
 0x54f   :  { %8912 = vst [vmem:[#allocation47_spill] sm:$0xff] %v8099_v60  ;;  %v8101_v39 = vadd.f32 %v2662_v6, %v2392_v34  ;;  %v5293_v6 = vld [vmem:[%s8780_s3 + $0x238] sm:$0xf0] }
 0x551   :  { %8913 = vst [vmem:[#allocation48_spill] sm:$0xff] %v8101_v39  ;;  %v2672_v39 = vpop.f32.mrf.mxu0 }
 0x554   :  { %v2481_v63 = vpop.f32.mrf.mxu3 }
 0x555   :  { %v8103_v11 = vadd.f32 %v2751_v4, %v2481_v63  ;;  %v5296_v4 = vor.u32 %v5703_v18, %v5293_v6 }
 0x556   :  { %v2395_v13 = vpop.f32.mrf.mxu1 }
 0x557   :  { %8914 = vst [vmem:[#allocation49_spill] sm:$0xff] %v8103_v11  ;;  %v8105_v2 = vadd.f32 %v2665_v26, %v2395_v13  ;;  %3668 = vmatpush.bf16.msrb.mxu3 %v5296_v4  ;;  %v5704_v11 = vld [vmem:[%s8780_s3 + $0x234] sm:$0xf0] }
 0x559   :  { %8915 = vst [vmem:[#allocation50_spill] sm:$0xff] %v8105_v2  ;;  %2911 = vmatmul.bf16.gmra.mxu1 %v6992_v42  ;;  %3000 = vmatmul.bf16.gmra.mxu3 %v6992_v42  ;;  %v5291_v2 = vld [vmem:[%s8780_s3 + $0x230] sm:$0xf] }
 0x55a   :  { %3272 = vmatmul.bf16.gmra.mxu0 %v7256_v56  ;;  %3361 = vmatmul.bf16.gmra.mxu2 %v7256_v56  ;;  %v5292_v60 = vor.u32 %v5704_v11, %v5291_v2 }
 0x55c   :  { %v2484_v26 = vpop.f32.mrf.mxu3  ;;  %3579 = vmatpush.bf16.msrb.mxu1 %v5292_v60 }
 0x55d   :  { %v8117_v13 = vadd.f32 %v2754_v37, %v2484_v26  ;;  %v2761_v37 = vpop.f32.mrf.mxu2 }
 0x55e   :  { %v2397_v34 = vpop.f32.mrf.mxu1 }
 0x55f   :  { %8916 = vst [vmem:[#allocation51_spill] sm:$0xff] %v8117_v13  ;;  %v8119_v63 = vadd.f32 %v2667_v27, %v2397_v34  ;;  %v3233_v27 = vpop.f32.mrf.mxu0 }
 0x561   :  { %8917 = vst [vmem:[#allocation52_spill] sm:$0xff] %v8119_v63 }
 0x564   :  { %v2486_v18 = vpop.f32.mrf.mxu3 }
 0x565   :  { %v8127_v6 = vadd.f32 %v2756_v48, %v2486_v18  ;;  %v3322_v48 = vpop.f32.mrf.mxu2 }
 0x566   :  { %v2400_v26 = vpop.f32.mrf.mxu1 }
 0x567   :  { %8918 = vst [vmem:[#allocation53_spill] sm:$0xff] %v8127_v6  ;;  %v8129_v4 = vadd.f32 %v2670_v40, %v2400_v26  ;;  %v3235_v11 = vpop.f32.mrf.mxu0 }
 0x569   :  { %8919 = vst [vmem:[#allocation54_spill] sm:$0xff] %v8129_v4  ;;  %2916 = vmatmul.bf16.gmra.mxu1 %v8883_v7  ;;  %3005 = vmatmul.bf16.gmra.mxu3 %v8883_v7 }
 0x56a   :  { %3277 = vmatmul.bf16.gmra.mxu0 %v7287_v25  ;;  %3366 = vmatmul.bf16.gmra.mxu2 %v7287_v25 }
 0x56c   :  { %v2489_v34 = vpop.f32.mrf.mxu3 }
 0x56d   :  { %v8135_v63 = vadd.f32 %v2759_v57, %v2489_v34  ;;  %v3324_v13 = vpop.f32.mrf.mxu2  ;;  %v5285_v57 = vld [vmem:[%s8780_s3 + $0x228] sm:$0xf0] }
 0x56e   :  { %v2402_v2 = vpop.f32.mrf.mxu1 }
 0x56f   :  { %v8137_v60 = vadd.f32 %v2672_v39, %v2402_v2  ;;  %v5701_v39 = vld [vmem:[%s8780_s3 + $0x224] sm:$0xf] }
 0x571   :  { %8920 = vst [vmem:[#allocation55_spill] sm:$0xff] %v8137_v60 }
 0x574   :  { %v2491_v18 = vpop.f32.mrf.mxu3 }
 0x575   :  { %v8139_v40 = vadd.f32 %v2761_v37, %v2491_v18  ;;  %v5283_v18 = vld [vmem:[%s8780_s3 + $0x220] sm:$0xf] }
 0x576   :  { %v2882_v26 = vpop.f32.mrf.mxu1 }
 0x577   :  { %8921 = vst [vmem:[#allocation56_spill] sm:$0xff] %v8139_v40  ;;  %v3051_v4 = vadd.f32 %v2882_v26, %v7727_v61  ;;  %v5288_v61 = vor.u32 %v5701_v39, %v5285_v57  ;;  %v5702_v26 = vld [vmem:[%s8780_s3 + $0x224] sm:$0xf0] }
 0x578   :  { %v5284_v40 = vor.u32 %v5702_v26, %v5283_v18 }
 0x579   :  { %2921 = vmatmul.bf16.gmra.mxu1 %v8884_v14  ;;  %3010 = vmatmul.bf16.gmra.mxu3 %v8884_v14  ;;  %v8144_v6 = vadd.f32 %v3233_v27, %v3051_v4  ;;  %v3238_v4 = vpop.f32.mrf.mxu0 }
 0x57a   :  { %3282 = vmatmul.bf16.gmra.mxu0 %v7368_v21  ;;  %3371 = vmatmul.bf16.gmra.mxu2 %v7368_v21 }
 0x57b   :  { %8922 = vst [vmem:[#allocation57_spill] sm:$0xff] %v8144_v6  ;;  %3669 = vmatpush.bf16.msrb.mxu3 %v5288_v61  ;;  %3580 = vmatpush.bf16.msrb.mxu1 %v5284_v40 }
 0x57c   :  { %v2971_v37 = vpop.f32.mrf.mxu3 }
 0x57d   :  { %v3052_v34 = vadd.f32 %v2971_v37, %v7739_v12  ;;  %v3327_v12 = vpop.f32.mrf.mxu2 }
 0x57e   :  { %v2884_v27 = vpop.f32.mrf.mxu1 }
 0x57f   :  { %v3053_v2 = vadd.f32 %v2884_v27, %v7741_v23  ;;  %v8162_v6 = vadd.f32 %v3322_v48, %v3052_v34 }
 0x581   :  { %v8164_v39 = vadd.f32 %v3235_v11, %v3053_v2  ;;  %v3240_v60 = vpop.f32.mrf.mxu0 }
 0x584   :  { %v2973_v57 = vpop.f32.mrf.mxu3 }
 0x585   :  { %v3054_v61 = vadd.f32 %v2973_v57, %v7749_v55  ;;  %v3329_v55 = vpop.f32.mrf.mxu2 }
 0x586   :  { %v2887_v37 = vpop.f32.mrf.mxu1 }
 0x587   :  { %v3055_v23 = vadd.f32 %v2887_v37, %v7753_v38  ;;  %v8168_v27 = vadd.f32 %v3324_v13, %v3054_v61 }
 0x589   :  { %2926 = vmatmul.bf16.gmra.mxu1 %v8885_v29  ;;  %3015 = vmatmul.bf16.gmra.mxu3 %v8885_v29  ;;  %v8172_v48 = vadd.f32 %v3238_v4, %v3055_v23  ;;  %v3243_v18 = vpop.f32.mrf.mxu0 }
 0x58a   :  { %3287 = vmatmul.bf16.gmra.mxu0 %v7385_v45  ;;  %3376 = vmatmul.bf16.gmra.mxu2 %v7385_v45 }
 0x58c   :  { %v2976_v11 = vpop.f32.mrf.mxu3 }
 0x58d   :  { %v3056_v40 = vadd.f32 %v2976_v11, %v7761_v47  ;;  %v3332_v23 = vpop.f32.mrf.mxu2 }
 0x58e   :  { %v2889_v34 = vpop.f32.mrf.mxu1 }
 0x58f   :  { %v3057_v38 = vadd.f32 %v2889_v34, %v7765_v46  ;;  %v8178_v13 = vadd.f32 %v3327_v12, %v3056_v40  ;;  %v5699_v46 = vld [vmem:[%s8780_s3 + $0x214] sm:$0xf]  ;;  %v5275_v34 = vld [vmem:[%s8780_s3 + $0x210] sm:$0xf] }
 0x591   :  { %v8180_v2 = vadd.f32 %v3240_v60, %v3057_v38  ;;  %v3245_v60 = vpop.f32.mrf.mxu0  ;;  %v5700_v38 = vld [vmem:[%s8780_s3 + $0x214] sm:$0xf0] }
 0x594   :  { %v2978_v26 = vpop.f32.mrf.mxu3 }
 0x595   :  { %v3058_v4 = vadd.f32 %v2978_v26, %v7769_v19  ;;  %v5277_v19 = vld [vmem:[%s8780_s3 + $0x218] sm:$0xf0]  ;;  %v5276_v26 = vor.u32 %v5700_v38, %v5275_v34 }
 0x596   :  { %v2892_v57 = vpop.f32.mrf.mxu1 }
 0x597   :  { %v3059_v61 = vadd.f32 %v2892_v57, %v7773_v17  ;;  %v8184_v37 = vadd.f32 %v3329_v55, %v3058_v4  ;;  %v5280_v17 = vor.u32 %v5699_v46, %v5277_v19  ;;  %v3334_v57 = vpop.f32.mrf.mxu2  ;;  %3581 = vmatpush.bf16.msrb.mxu1 %v5276_v26 }
 0x599   :  { %2931 = vmatmul.bf16.gmra.mxu1 %v7256_v56  ;;  %3020 = vmatmul.bf16.gmra.mxu3 %v7256_v56  ;;  %v8188_v47 = vadd.f32 %v3243_v18, %v3059_v61  ;;  %v3248_v46 = vpop.f32.mrf.mxu0 }
 0x59a   :  { %3292 = vmatmul.bf16.gmra.mxu0 %v7435_v30  ;;  %3381 = vmatmul.bf16.gmra.mxu2 %v7435_v30 }
 0x59b   :  { %3670 = vmatpush.bf16.msrb.mxu3 %v5280_v17 }
 0x59c   :  { %v2981_v12 = vpop.f32.mrf.mxu3 }
 0x59d   :  { %v3060_v11 = vadd.f32 %v2981_v12, %v7808_v43 }
 0x59e   :  { %v2894_v40 = vpop.f32.mrf.mxu1 }
 0x59f   :  { %v3061_v55 = vadd.f32 %v2894_v40, %v7815_v9  ;;  %v8206_v18 = vadd.f32 %v3332_v23, %v3060_v11 }
 0x5a1   :  { %v8208_v4 = vadd.f32 %v3245_v60, %v3061_v55  ;;  %v1793_v60 = vadd.f32 %v7475_v41, %v7504_v31  ;;  %v1783_v55 = vadd.f32 %v7453_v3, %v7467_v15  ;;  %v3250_v41 = vpop.f32.mrf.mxu0 }
 0x5a4   :  { %v2983_v43 = vpop.f32.mrf.mxu3 }
 0x5a5   :  { %v3062_v61 = vadd.f32 %v2983_v43, %v7847_v1  ;;  %v3337_v1 = vpop.f32.mrf.mxu2 }
 0x5a6   :  { %v2897_v9 = vpop.f32.mrf.mxu1 }
 0x5a7   :  { %v3063_v19 = vadd.f32 %v2897_v9, %v7855_v8  ;;  %v8212_v17 = vadd.f32 %v3334_v57, %v3062_v61  ;;  %v8923_v8 = vld [vmem:[#allocation2_spill] sm:$0xff]  ;;  %v1285_v57 = vadd.f32 %v7397_v58, %v7399_v22 }
 0x5a8   :  { %v1295_v40 = vadd.f32 %v8923_v8, %v7450_v20  ;;  %v8243_v58 = vld [vmem:[%s8779_s2] ss:$0 sm:$0xff] }
 0x5a9   :  { %2936 = vmatmul.bf16.gmra.mxu1 %v7287_v25  ;;  %3025 = vmatmul.bf16.gmra.mxu3 %v7287_v25  ;;  %v8216_v23 = vadd.f32 %v3248_v46, %v3063_v19  ;;  %v1898_v61 = vmax.f32 %v1285_v57, %v1783_v55 }
 0x5aa   :  { %3297 = vmatmul.bf16.gmra.mxu0 %v7458_v62  ;;  %3386 = vmatmul.bf16.gmra.mxu2 %v7458_v62  ;;  %v1902_v43 = vmax.f32 %v1295_v40, %v1793_v60 }
 0x5ac   :  { %v2986_v12 = vpop.f32.mrf.mxu3 }
 0x5ad   :  { %v3064_v11 = vadd.f32 %v2986_v12, %v7885_v49  ;;  %v1954_v49 = vmax.f32 %v1898_v61, %v1902_v43  ;;  %v3339_v9 = vpop.f32.mrf.mxu2  ;;  %v8924_v61 = vld [vmem:[#allocation19_spill] sm:$0xff] }
 0x5ae   :  { %v2899_v34 = vpop.f32.mrf.mxu1 }
 0x5af   :  { %v3065_v38 = vadd.f32 %v2899_v34, %v7891_v51  ;;  %v8228_v26 = vadd.f32 %v3337_v1, %v3064_v11  ;;  %v2006_v22 = vadd.f32 %v8243_v58, %v1954_v49  ;;  %v5697_v51 = vld [vmem:[%s8780_s3 + $0x204] sm:$0xf]  ;;  %v5698_v34 = vld [vmem:[%s8780_s3 + $0x204] sm:$0xf0] }
 0x5b1   :  { %v8232_v31 = vadd.f32 %v3250_v41, %v3065_v38  ;;  %v2054_v1 = vmax.f32 %v2006_v22, 0.0 }
 0x5b3   :  { %v2102_v38 = vpack.c.bf16 %v2054_v1, %v2054_v1 }
 0x5b4   :  { %v2988_v46 = vpop.f32.mrf.mxu3 }
 0x5b5   :  { %v3066_v20 = vadd.f32 %v2988_v46, %v7915_v44  ;;  %v5269_v44 = vld [vmem:[%s8780_s3 + $0x208] sm:$0xf0]  ;;  %v3139_v41 = vunpack.c.l.b16 %v2102_v38 }
 0x5b6   :  { %v2902_v19 = vpop.f32.mrf.mxu1  ;;  %v5272_v60 = vor.u32 %v5697_v51, %v5269_v44  ;;  %v8926_v51 = vld [vmem:[#allocation10_spill] sm:$0xff] }
 0x5b7   :  { %v8236_v3 = vadd.f32 %v2902_v19, %v7921_v16  ;;  %v8238_v15 = vadd.f32 %v3339_v9, %v3066_v20  ;;  %v2005_v16 = vadd.f32 %v8243_v58, %v7500_v32  ;;  %v5267_v32 = vld [vmem:[%s8780_s3 + $0x200] sm:$0xf]  ;;  %v8925_v20 = vld [vmem:[#allocation4_spill] sm:$0xff] }
 0x5b8   :  { %3671 = vmatpush.bf16.msrb.mxu3 %v5272_v60  ;;  %v5268_v57 = vor.u32 %v5698_v34, %v5267_v32  ;;  %v8927_v60 = vld [vmem:[#allocation16_spill] sm:$0xff]  ;;  %v8929_v34 = vld [vmem:[#allocation6_spill] sm:$0xff] }
 0x5b9   :  { %2941 = vmatmul.bf16.gmra.mxu1 %v7368_v21  ;;  %3030 = vmatmul.bf16.gmra.mxu3 %v7368_v21  ;;  %v2053_v8 = vmax.f32 %v2005_v16, 0.0 }
 0x5ba   :  { %3302 = vmatmul.bf16.gmra.mxu0 %v7502_v5  ;;  %3391 = vmatmul.bf16.gmra.mxu2 %v7502_v5 }
 0x5bb   :  { %v2101_v43 = vpack.c.bf16 %v2053_v8, %v2053_v8  ;;  %3582 = vmatpush.bf16.msrb.mxu1 %v5268_v57  ;;  %v8928_v8 = vld [vmem:[#allocation20_spill] sm:$0xff] }
 0x5bc   :  { %v2991_v12 = vpop.f32.mrf.mxu3 }
 0x5bd   :  { %v8259_v11 = vadd.f32 %v2991_v12, %v7934_v50  ;;  %v3138_v46 = vunpack.c.l.b16 %v2101_v43  ;;  %v8930_v43 = vld [vmem:[#allocation12_spill] sm:$0xff] }
 0x5be   :  { %v2904_v40 = vpop.f32.mrf.mxu1 }
 0x5bf   :  { %v8262_v55 = vadd.f32 %v2904_v40, %v7937_v0  ;;  %v8276_v19 = vpack.c.b16 %v3139_v41, %v3138_v46 }
 0x5c4   :  { %v2993_v50 = vpop.f32.mrf.mxu3 }
 0x5c5   :  { %v8271_v49 = vadd.f32 %v2993_v50, %v8924_v61  ;;  %v8931_v61 = vld [vmem:[#allocation21_spill] sm:$0xff] }
 0x5c6   :  { %v2907_v0 = vpop.f32.mrf.mxu1 }
 0x5c7   :  { %v8274_v9 = vadd.f32 %v2907_v0, %v8925_v20  ;;  %v8932_v20 = vld [vmem:[#allocation13_spill] sm:$0xff] }
 0x5c9   :  { %2946 = vmatmul.bf16.gmra.mxu1 %v7385_v45  ;;  %3035 = vmatmul.bf16.gmra.mxu3 %v7385_v45 }
 0x5ca   :  { %3307 = vmatmul.bf16.gmra.mxu0 %v8276_v19  ;;  %3396 = vmatmul.bf16.gmra.mxu2 %v8276_v19 }
 0x5cc   :  { %v2996_v22 = vpop.f32.mrf.mxu3 }
 0x5cd   :  { %v8283_v44 = vadd.f32 %v2996_v22, %v8926_v51 }
 0x5ce   :  { %v2909_v16 = vpop.f32.mrf.mxu1 }
 0x5cf   :  { %v8286_v1 = vadd.f32 %v2909_v16, %v8927_v60  ;;  %v8933_v16 = vld [vmem:[#allocation17_spill] sm:$0xff] }
 0x5d4   :  { %v2998_v12 = vpop.f32.mrf.mxu3 }
 0x5d5   :  { %v8289_v40 = vadd.f32 %v2998_v12, %v8928_v8 }
 0x5d6   :  { %v2912_v32 = vpop.f32.mrf.mxu1 }
 0x5d7   :  { %v8292_v38 = vadd.f32 %v2912_v32, %v8929_v34  ;;  %v8935_v34 = vld [vmem:[#allocation23_spill] sm:$0xff] }
 0x5d9   :  { %2951 = vmatmul.bf16.gmra.mxu1 %v7435_v30  ;;  %3040 = vmatmul.bf16.gmra.mxu3 %v7435_v30 }
 0x5dc   :  { %v3001_v57 = vpop.f32.mrf.mxu3 }
 0x5dd   :  { %v8297_v41 = vadd.f32 %v3001_v57, %v8930_v43 }
 0x5de   :  { %v2914_v50 = vpop.f32.mrf.mxu1 }
 0x5df   :  { %v8300_v46 = vadd.f32 %v2914_v50, %v8931_v61  ;;  %v8937_v50 = vld [vmem:[#allocation22_spill] sm:$0xff] }
 0x5e4   :  { %v3003_v0 = vpop.f32.mrf.mxu3 }
 0x5e5   :  { %v8303_v22 = vadd.f32 %v3003_v0, %v8932_v20  ;;  %v8939_v20 = vld [vmem:[#allocation14_spill] sm:$0xff] }
 0x5e6   :  { %v2917_v51 = vpop.f32.mrf.mxu1 }
 0x5e7   :  { %v8306_v60 = vadd.f32 %v2917_v51, %v8933_v16 }
 0x5e9   :  { %2956 = vmatmul.bf16.gmra.mxu1 %v7458_v62  ;;  %3045 = vmatmul.bf16.gmra.mxu3 %v7458_v62 }
 0x5ec   :  { %v3006_v12 = vpop.f32.mrf.mxu3 }
 0x5ed   :  { %v8311_v8 = vadd.f32 %v3006_v12, %v7991_v52 }
 0x5ee   :  { %v2919_v32 = vpop.f32.mrf.mxu1 }
 0x5ef   :  { %8934 = vst [vmem:[#allocation2_spill] sm:$0xff] %v8311_v8  ;;  %v8314_v57 = vadd.f32 %v2919_v32, %v8935_v34  ;;  %v8940_v8 = vld [vmem:[#allocation18_spill] sm:$0xff] }
 0x5f1   :  { %8936 = vst [vmem:[#allocation19_spill] sm:$0xff] %v8314_v57  ;;  %v8942_v57 = vld [vmem:[#allocation24_spill] sm:$0xff] }
 0x5f4   :  { %v3008_v43 = vpop.f32.mrf.mxu3 }
 0x5f5   :  { %v8317_v61 = vadd.f32 %v3008_v43, %v8937_v50 }
 0x5f6   :  { %v2922_v0 = vpop.f32.mrf.mxu1 }
 0x5f7   :  { %8938 = vst [vmem:[#allocation4_spill] sm:$0xff] %v8317_v61  ;;  %v8320_v51 = vadd.f32 %v2922_v0, %v8939_v20  ;;  %v8943_v61 = vld [vmem:[#allocation25_spill] sm:$0xff] }
 0x5f9   :  { %3583 = vmatmul.bf16.vlgmr.msrb.gmra.mxu1 %v8880_v33  ;;  %3672 = vmatmul.bf16.vlgmr.msrb.gmra.mxu3 %v8880_v33 }
 0x5fc   :  { %v3011_v16 = vpop.f32.mrf.mxu3 }
 0x5fd   :  { %v8325_v52 = vadd.f32 %v3011_v16, %v8009_v35  ;;  %v8945_v16 = vld [vmem:[#allocation26_spill] sm:$0xff] }
 0x5fe   :  { %v2924_v12 = vpop.f32.mrf.mxu1 }
 0x5ff   :  { %v8328_v32 = vadd.f32 %v2924_v12, %v8940_v8 }
 0x601   :  { %8941 = vst [vmem:[#allocation10_spill] sm:$0xff] %v8328_v32  ;;  %v8946_v32 = vld [vmem:[#allocation27_spill] sm:$0xff] }
 0x604   :  { %v3013_v34 = vpop.f32.mrf.mxu3 }
 0x605   :  { %v8331_v43 = vadd.f32 %v3013_v34, %v8942_v57 }
 0x606   :  { %v2927_v50 = vpop.f32.mrf.mxu1 }
 0x607   :  { %v8334_v0 = vadd.f32 %v2927_v50, %v8943_v61  ;;  %v5728_v61 = vld [vmem:[%s8781_s5 + $0x78] sm:$0xff]  ;;  %v8947_v50 = vld [vmem:[#allocation28_spill] sm:$0xff] }
 0x608   :  { %4010 = vmatpush.bf16.msra.mxu2 %v5728_v61  ;;  %v8952_v61 = vld [vmem:[#allocation30_spill] sm:$0xff] }
 0x609   :  { %8944 = vst [vmem:[#allocation16_spill] sm:$0xff] %v8334_v0  ;;  %3588 = vmatmul.bf16.gmra.mxu1 %v8881_v59  ;;  %3677 = vmatmul.bf16.gmra.mxu3 %v8881_v59 }
 0x60c   :  { %v3016_v33 = vpop.f32.mrf.mxu3 }
 0x60d   :  { %v8339_v35 = vadd.f32 %v3016_v33, %v8027_v28 }
 0x60e   :  { %v2929_v20 = vpop.f32.mrf.mxu1 }
 0x60f   :  { %v8342_v8 = vadd.f32 %v2929_v20, %v8945_v16 }
 0x614   :  { %v3018_v12 = vpop.f32.mrf.mxu3 }
 0x615   :  { %v8345_v57 = vadd.f32 %v3018_v12, %v8946_v32 }
 0x616   :  { %v2932_v34 = vpop.f32.mrf.mxu1 }
 0x617   :  { %v8351_v0 = vadd.f32 %v2932_v34, %v8947_v50  ;;  %v8950_v34 = vld [vmem:[#allocation29_spill] sm:$0xff] }
 0x619   :  { %3593 = vmatmul.bf16.gmra.mxu1 %v6992_v42  ;;  %3682 = vmatmul.bf16.gmra.mxu3 %v6992_v42 }
 0x61c   :  { %v3021_v59 = vpop.f32.mrf.mxu3 }
 0x61d   :  { %v8356_v28 = vadd.f32 %v3021_v59, %v8045_v36 }
 0x61e   :  { %v2934_v33 = vpop.f32.mrf.mxu1 }
 0x61f   :  { %8948 = vst [vmem:[#allocation20_spill] sm:$0xff] %v8356_v28  ;;  %v8359_v32 = vadd.f32 %v2934_v33, %v8047_v10  ;;  %v8953_v28 = vld [vmem:[#allocation31_spill] sm:$0xff] }
 0x621   :  { %8949 = vst [vmem:[#allocation6_spill] sm:$0xff] %v8359_v32  ;;  %v8954_v32 = vld [vmem:[#allocation32_spill] sm:$0xff] }
 0x624   :  { %v3023_v20 = vpop.f32.mrf.mxu3 }
 0x625   :  { %v8362_v16 = vadd.f32 %v3023_v20, %v8055_v24  ;;  %v5727_v20 = vld [vmem:[%s8781_s5 + $0x70] sm:$0xff] }
 0x626   :  { %v2937_v12 = vpop.f32.mrf.mxu1  ;;  %4011 = vmatpush.bf16.msra.mxu2 %v5727_v20  ;;  %v8962_v20 = vld [vmem:[#allocation47_spill] sm:$0xff] }
 0x627   :  { %v8365_v50 = vadd.f32 %v2937_v12, %v8950_v34  ;;  %v8956_v34 = vld [vmem:[#allocation33_spill] sm:$0xff] }
 0x629   :  { %8951 = vst [vmem:[#allocation12_spill] sm:$0xff] %v8365_v50  ;;  %3598 = vmatmul.bf16.gmra.mxu1 %v8883_v7  ;;  %3687 = vmatmul.bf16.gmra.mxu3 %v8883_v7 }
 0x62c   :  { %v3026_v42 = vpop.f32.mrf.mxu3 }
 0x62d   :  { %v8370_v36 = vadd.f32 %v3026_v42, %v8952_v61 }
 0x62e   :  { %v2939_v59 = vpop.f32.mrf.mxu1 }
 0x62f   :  { %v8373_v10 = vadd.f32 %v2939_v59, %v8953_v28  ;;  %v8959_v59 = vld [vmem:[#allocation34_spill] sm:$0xff] }
 0x634   :  { %v3028_v33 = vpop.f32.mrf.mxu3 }
 0x635   :  { %v8376_v24 = vadd.f32 %v3028_v33, %v8954_v32 }
 0x636   :  { %v2942_v12 = vpop.f32.mrf.mxu1 }
 0x637   :  { %8955 = vst [vmem:[#allocation21_spill] sm:$0xff] %v8376_v24  ;;  %v8382_v50 = vadd.f32 %v2942_v12, %v8956_v34  ;;  %v8960_v12 = vld [vmem:[#allocation46_spill] sm:$0xff] }
 0x639   :  { %3603 = vmatmul.bf16.gmra.mxu1 %v8884_v14  ;;  %3692 = vmatmul.bf16.gmra.mxu3 %v8884_v14 }
 0x63c   :  { %v3031_v7 = vpop.f32.mrf.mxu3 }
 0x63d   :  { %v8387_v28 = vadd.f32 %v3031_v7, %v8081_v53 }
 0x63e   :  { %v2944_v42 = vpop.f32.mrf.mxu1 }
 0x63f   :  { %8957 = vst [vmem:[#allocation13_spill] sm:$0xff] %v8387_v28  ;;  %v8390_v32 = vadd.f32 %v2944_v42, %v8083_v54  ;;  %v8963_v28 = vld [vmem:[#allocation48_spill] sm:$0xff] }
 0x641   :  { %8958 = vst [vmem:[#allocation17_spill] sm:$0xff] %v8390_v32  ;;  %v8964_v32 = vld [vmem:[#allocation49_spill] sm:$0xff] }
 0x644   :  { %v3033_v61 = vpop.f32.mrf.mxu3 }
 0x645   :  { %v8393_v33 = vadd.f32 %v3033_v61, %v8959_v59 }
 0x646   :  { %v2947_v24 = vpop.f32.mrf.mxu1 }
 0x647   :  { %v8396_v34 = vadd.f32 %v2947_v24, %v8960_v12  ;;  %v5726_v24 = vld [vmem:[%s8781_s5 + $0x68] sm:$0xff]  ;;  %v8966_v12 = vld [vmem:[#allocation50_spill] sm:$0xff] }
 0x648   :  { %4012 = vmatpush.bf16.msra.mxu2 %v5726_v24 }
 0x649   :  { %8961 = vst [vmem:[#allocation23_spill] sm:$0xff] %v8396_v34  ;;  %3608 = vmatmul.bf16.gmra.mxu1 %v8885_v29  ;;  %3697 = vmatmul.bf16.gmra.mxu3 %v8885_v29  ;;  %v5736_v29 = vld [vmem:[%s8781_s5 + $0xb8] sm:$0xff] }
 0x64a   :  { %4185 = vmatpush.bf16.msra.mxu0 %v5736_v29 }
 0x64c   :  { %v3036_v14 = vpop.f32.mrf.mxu3 }
 0x64d   :  { %v8401_v53 = vadd.f32 %v3036_v14, %v8962_v20 }
 0x64e   :  { %v2949_v7 = vpop.f32.mrf.mxu1 }
 0x64f   :  { %v8404_v54 = vadd.f32 %v2949_v7, %v8963_v28  ;;  %v8970_v7 = vld [vmem:[#allocation52_spill] sm:$0xff] }
 0x654   :  { %v3038_v42 = vpop.f32.mrf.mxu3 }
 0x655   :  { %v8407_v61 = vadd.f32 %v3038_v42, %v8964_v32  ;;  %v8968_v32 = vld [vmem:[#allocation51_spill] sm:$0xff] }
 0x656   :  { %v2952_v59 = vpop.f32.mrf.mxu1 }
 0x657   :  { %8965 = vst [vmem:[#allocation22_spill] sm:$0xff] %v8407_v61  ;;  %v8413_v34 = vadd.f32 %v2952_v59, %v8966_v12  ;;  %v8972_v12 = vld [vmem:[#allocation53_spill] sm:$0xff]  ;;  %v8974_v61 = vld [vmem:[#allocation54_spill] sm:$0xff] }
 0x659   :  { %8967 = vst [vmem:[#allocation14_spill] sm:$0xff] %v8413_v34  ;;  %3613 = vmatmul.bf16.gmra.mxu1 %v7256_v56  ;;  %3702 = vmatmul.bf16.gmra.mxu3 %v7256_v56 }
 0x65c   :  { %v3041_v28 = vpop.f32.mrf.mxu3 }
 0x65d   :  { %v8421_v14 = vadd.f32 %v3041_v28, %v8968_v32 }
 0x65e   :  { %v2954_v20 = vpop.f32.mrf.mxu1 }
 0x65f   :  { %8969 = vst [vmem:[#allocation18_spill] sm:$0xff] %v8421_v14  ;;  %v8424_v42 = vadd.f32 %v2954_v20, %v8970_v7  ;;  %v8975_v14 = vld [vmem:[#allocation55_spill] sm:$0xff] }
 0x661   :  { %8971 = vst [vmem:[#allocation24_spill] sm:$0xff] %v8424_v42  ;;  %v8977_v42 = vld [vmem:[#allocation56_spill] sm:$0xff] }
 0x664   :  { %v3043_v59 = vpop.f32.mrf.mxu3 }
 0x665   :  { %v8427_v24 = vadd.f32 %v3043_v59, %v8972_v12 }
 0x666   :  { %v2957_v34 = vpop.f32.mrf.mxu1 }
 0x667   :  { %8973 = vst [vmem:[#allocation25_spill] sm:$0xff] %v8427_v24  ;;  %v8430_v56 = vadd.f32 %v2957_v34, %v8974_v61  ;;  %v8979_v24 = vld [vmem:[#allocation57_spill] sm:$0xff]  ;;  %v5725_v61 = vld [vmem:[%s8781_s5 + $0x60] sm:$0xff] }
 0x668   :  { %4013 = vmatpush.bf16.msra.mxu2 %v5725_v61  ;;  %v8458_v61 = vpop.f32.mrf.mxu0 }
 0x669   :  { %3618 = vmatmul.bf16.gmra.mxu1 %v7287_v25  ;;  %3707 = vmatmul.bf16.gmra.mxu3 %v7287_v25  ;;  %v5735_v25 = vld [vmem:[%s8781_s5 + $0xb0] sm:$0xff] }
 0x66a   :  { %4186 = vmatpush.bf16.msra.mxu0 %v5735_v25  ;;  %v8460_v25 = vpop.f32.mrf.mxu2 }
 0x66c   :  { %v3046_v29 = vpop.f32.mrf.mxu3 }
 0x66d   :  { %v8435_v28 = vadd.f32 %v3046_v29, %v8135_v63 }
 0x66e   :  { %v2959_v32 = vpop.f32.mrf.mxu1 }
 0x66f   :  { %v8438_v20 = vadd.f32 %v2959_v32, %v8975_v14 }
 0x671   :  { %8976 = vst [vmem:[#allocation26_spill] sm:$0xff] %v8438_v20 }
 0x674   :  { %v3048_v7 = vpop.f32.mrf.mxu3 }
 0x675   :  { %v8441_v59 = vadd.f32 %v3048_v7, %v8977_v42 }
 0x676   :  { %v3584_v12 = vpop.f32.mrf.mxu1 }
 0x677   :  { %8978 = vst [vmem:[#allocation27_spill] sm:$0xff] %v8441_v59  ;;  %v3753_v34 = vadd.f32 %v3584_v12, %v8979_v24 }
 0x679   :  { %3623 = vmatmul.bf16.gmra.mxu1 %v7368_v21  ;;  %3712 = vmatmul.bf16.gmra.mxu3 %v7368_v21 }
 0x67c   :  { %v3673_v63 = vpop.f32.mrf.mxu3 }
 0x67d   :  { %v3754_v14 = vadd.f32 %v3673_v63, %v8162_v6 }
 0x67e   :  { %v3586_v42 = vpop.f32.mrf.mxu1 }
 0x67f   :  { %v3817_v29 = vmax.f32 %v3753_v34, %v3754_v14  ;;  %v3755_v24 = vadd.f32 %v3586_v42, %v8164_v39  ;;  %v8464_v42 = vpop.f32.mrf.mxu0 }
 0x684   :  { %v3675_v32 = vpop.f32.mrf.mxu3 }
 0x685   :  { %v3756_v7 = vadd.f32 %v3675_v32, %v8168_v27 }
 0x686   :  { %v3589_v12 = vpop.f32.mrf.mxu1 }
 0x687   :  { %v3818_v59 = vmax.f32 %v3755_v24, %v3756_v7  ;;  %v3757_v21 = vadd.f32 %v3589_v12, %v8172_v48  ;;  %v8467_v24 = vpop.f32.mrf.mxu2 }
 0x689   :  { %3628 = vmatmul.bf16.gmra.mxu1 %v7385_v45  ;;  %3717 = vmatmul.bf16.gmra.mxu3 %v7385_v45 }
 0x68c   :  { %v3678_v6 = vpop.f32.mrf.mxu3 }
 0x68d   :  { %v3758_v34 = vadd.f32 %v3678_v6, %v8178_v13  ;;  %v5724_v13 = vld [vmem:[%s8781_s5 + $0x58] sm:$0xff]  ;;  %v8479_v6 = vpop.f32.mrf.mxu0 }
 0x68e   :  { %v3591_v63 = vpop.f32.mrf.mxu1  ;;  %4014 = vmatpush.bf16.msra.mxu2 %v5724_v13 }
 0x68f   :  { %v3819_v39 = vmax.f32 %v3757_v21, %v3758_v34  ;;  %v3759_v14 = vadd.f32 %v3591_v63, %v8180_v2  ;;  %v5734_v2 = vld [vmem:[%s8781_s5 + $0xa8] sm:$0xff] }
 0x690   :  { %4187 = vmatpush.bf16.msra.mxu0 %v5734_v2 }
 0x694   :  { %v3680_v27 = vpop.f32.mrf.mxu3 }
 0x695   :  { %v3760_v48 = vadd.f32 %v3680_v27, %v8184_v37 }
 0x696   :  { %v3594_v32 = vpop.f32.mrf.mxu1 }
 0x697   :  { %v3820_v45 = vmax.f32 %v3759_v14, %v3760_v48  ;;  %v3761_v7 = vadd.f32 %v3594_v32, %v8188_v47  ;;  %v8487_v14 = vld [vmem:[%s8782_s4] ss:$0 sm:$0xff] }
 0x699   :  { %3633 = vmatmul.bf16.gmra.mxu1 %v7435_v30  ;;  %3722 = vmatmul.bf16.gmra.mxu3 %v7435_v30  ;;  %v8482_v30 = vpop.f32.mrf.mxu2 }
 0x69c   :  { %v3683_v37 = vpop.f32.mrf.mxu3 }
 0x69d   :  { %v3762_v12 = vadd.f32 %v3683_v37, %v8206_v18 }
 0x69e   :  { %v3596_v21 = vpop.f32.mrf.mxu1 }
 0x69f   :  { %v3821_v47 = vmax.f32 %v3761_v7, %v3762_v12  ;;  %v3763_v34 = vadd.f32 %v3596_v21, %v8208_v4  ;;  %v8492_v7 = vpop.f32.mrf.mxu0 }
 0x6a1   :  { %v3849_v63 = vmax.f32 %v3817_v29, %v3821_v47  ;;  %v8496_v29 = vpop.f32.mrf.mxu2 }
 0x6a3   :  { %v3869_v48 = vadd.f32 %v8487_v14, %v3849_v63 }
 0x6a4   :  { %v3685_v27 = vpop.f32.mrf.mxu3 }
 0x6a5   :  { %v3764_v32 = vadd.f32 %v3685_v27, %v8212_v17  ;;  %v3885_v4 = vmax.f32 %v3869_v48, 0.0 }
 0x6a6   :  { %v3599_v18 = vpop.f32.mrf.mxu1 }
 0x6a7   :  { %v3822_v13 = vmax.f32 %v3763_v34, %v3764_v32  ;;  %v3765_v2 = vadd.f32 %v3599_v18, %v8216_v23  ;;  %v3901_v47 = vpack.c.bf16 %v3885_v4, %v3885_v4 }
 0x6a9   :  { %v3850_v37 = vmax.f32 %v3818_v59, %v3822_v13  ;;  %3638 = vmatmul.bf16.gmra.mxu1 %v7458_v62  ;;  %3727 = vmatmul.bf16.gmra.mxu3 %v7458_v62  ;;  %v4033_v48 = vunpack.c.l.b16 %v3901_v47  ;;  %v8501_v13 = vpop.f32.mrf.mxu0  ;;  %v8505_v20 = vpop.f32.mrf.mxu2 }
 0x6ab   :  { %v3870_v12 = vadd.f32 %v8487_v14, %v3850_v37 }
 0x6ac   :  { %v3688_v21 = vpop.f32.mrf.mxu3 }
 0x6ad   :  { %v3886_v63 = vmax.f32 %v3870_v12, 0.0  ;;  %v3766_v17 = vadd.f32 %v3688_v21, %v8228_v26 }
 0x6ae   :  { %v3601_v34 = vpop.f32.mrf.mxu1 }
 0x6af   :  { %v3902_v27 = vpack.c.bf16 %v3886_v63, %v3886_v63  ;;  %v3823_v23 = vmax.f32 %v3765_v2, %v3766_v17  ;;  %v3767_v32 = vadd.f32 %v3601_v34, %v8232_v31  ;;  %v5723_v31 = vld [vmem:[%s8781_s5 + $0x50] sm:$0xff]  ;;  %v8980_v63 = vld [vmem:[#allocation45_spill] sm:$0xff]  ;;  %v8981_v17 = vld [vmem:[#allocation43_spill] sm:$0xff]  ;;  %v3418_v34 = vadd.f32 %v8458_v61, %v8236_v3 }
 0x6b0   :  { %4015 = vmatpush.bf16.msra.mxu2 %v5723_v31 }
 0x6b1   :  { %v4034_v59 = vunpack.c.l.b16 %v3902_v27  ;;  %v3851_v18 = vmax.f32 %v3819_v39, %v3823_v23  ;;  %v5733_v39 = vld [vmem:[%s8781_s5 + $0xa0] sm:$0xff]  ;;  %v3419_v27 = vadd.f32 %v8460_v25, %v8259_v11  ;;  %v8982_v23 = vld [vmem:[#allocation37_spill] sm:$0xff]  ;;  %v8534_v31 = vpop.f32.mrf.mxu2  ;;  %v8986_v25 = vld [vmem:[#allocation35_spill] sm:$0xff] }
 0x6b2   :  { %4188 = vmatpush.bf16.msra.mxu0 %v5733_v39 }
 0x6b3   :  { %v8503_v62 = vpack.c.b16 %v4034_v59, %v4033_v48  ;;  %v3871_v4 = vadd.f32 %v8487_v14, %v3851_v18  ;;  %v8984_v48 = vld [vmem:[#allocation40_spill] sm:$0xff]  ;;  %v8985_v59 = vld [vmem:[#allocation39_spill] sm:$0xff] }
 0x6b4   :  { %v3690_v37 = vpop.f32.mrf.mxu3  ;;  %v1798_v18 = vadd.f32 %v8985_v59, %v8984_v48 }
 0x6b5   :  { %v3768_v12 = vadd.f32 %v3690_v37, %v8238_v15  ;;  %v3887_v47 = vmax.f32 %v3871_v4, 0.0  ;;  %v1808_v15 = vadd.f32 %v8981_v17, %v8980_v63  ;;  %v8528_v4 = vpop.f32.mrf.mxu0 }
 0x6b6   :  { %v3604_v26 = vpop.f32.mrf.mxu1 }
 0x6b7   :  { %v3824_v21 = vmax.f32 %v3767_v32, %v3768_v12  ;;  %v8530_v12 = vadd.f32 %v3604_v26, %v3418_v34  ;;  %v3903_v61 = vpack.c.bf16 %v3887_v47, %v3887_v47  ;;  %v3420_v34 = vadd.f32 %v8464_v42, %v8262_v55  ;;  %v8988_v55 = vld [vmem:[#allocation44_spill] sm:$0xff]  ;;  %v8989_v42 = vld [vmem:[#allocation9_spill] sm:$0xff] }
 0x6b8   :  { %v3421_v47 = vadd.f32 %v8467_v24, %v8271_v49  ;;  %v2007_v49 = vadd.f32 %v8243_v58, %v8988_v55  ;;  %v8990_v24 = vld [vmem:[#allocation15_spill] sm:$0xff] }
 0x6b9   :  { %v3852_v2 = vmax.f32 %v3820_v45, %v3824_v21  ;;  %3643 = vmatmul.bf16.gmra.mxu1 %v7502_v5  ;;  %3732 = vmatmul.bf16.gmra.mxu3 %v7502_v5  ;;  %v8983_v5 = vld [vmem:[#allocation7_spill] sm:$0xff]  ;;  %v4035_v48 = vunpack.c.l.b16 %v3903_v61  ;;  %v8555_v61 = vpop.f32.mrf.mxu2 }
 0x6ba   :  { %v1310_v32 = vadd.f32 %v8983_v5, %v8982_v23  ;;  %v2055_v55 = vmax.f32 %v2007_v49, 0.0  ;;  %v5721_v49 = vld [vmem:[%s8781_s5 + $0x40] sm:$0xff] }
 0x6bb   :  { %v3872_v45 = vadd.f32 %v8487_v14, %v3852_v2  ;;  %v8987_v2 = vld [vmem:[#allocation3_spill] sm:$0xff] }
 0x6bc   :  { %v3693_v37 = vpop.f32.mrf.mxu3  ;;  %v1300_v39 = vadd.f32 %v8987_v2, %v8986_v25  ;;  %v1908_v63 = vmax.f32 %v1310_v32, %v1808_v15  ;;  %v3422_v2 = vadd.f32 %v8479_v6, %v8274_v9  ;;  %v5722_v9 = vld [vmem:[%s8781_s5 + $0x48] sm:$0xff] }
 0x6bd   :  { %v8532_v21 = vadd.f32 %v3693_v37, %v3419_v27  ;;  %v3888_v3 = vmax.f32 %v3872_v45, 0.0  ;;  %v8550_v25 = vpop.f32.mrf.mxu0  ;;  %4016 = vmatpush.bf16.msra.mxu2 %v5722_v9  ;;  %v5720_v9 = vld [vmem:[%s8781_s5 + $0x38] sm:$0xff] }
 0x6be   :  { %v3606_v11 = vpop.f32.mrf.mxu1  ;;  %v1904_v5 = vmax.f32 %v1300_v39, %v1798_v18  ;;  %v3423_v39 = vadd.f32 %v8482_v30, %v8283_v44  ;;  %v8996_v44 = vld [vmem:[#allocation5_spill] sm:$0xff] }
 0x6bf   :  { %v3825_v17 = vmax.f32 %v8530_v12, %v8532_v21  ;;  %v3904_v23 = vpack.c.bf16 %v3888_v3, %v3888_v3  ;;  %v8546_v37 = vadd.f32 %v3606_v11, %v3420_v34  ;;  %v1813_v11 = vadd.f32 %v8990_v24, %v8989_v42  ;;  %v8994_v34 = vld [vmem:[#allocation41_spill] sm:$0xff]  ;;  %v8995_v42 = vld [vmem:[#allocation36_spill] sm:$0xff] }
 0x6c0   :  { %v1956_v26 = vmax.f32 %v1904_v5, %v1908_v63  ;;  %v8992_v5 = vld [vmem:[#allocation11_spill] sm:$0xff]  ;;  %v1305_v30 = vadd.f32 %v8996_v44, %v8995_v42  ;;  %v5716_v12 = vld [vmem:[%s8781_s5 + $0x18] sm:$0xff] }
 0x6c1   :  { %v4036_v59 = vunpack.c.l.b16 %v3904_v23  ;;  %v8991_v23 = vld [vmem:[#allocation38_spill] sm:$0xff]  ;;  %4017 = vmatpush.bf16.msra.mxu2 %v5721_v49 }
 0x6c2   :  { %v2008_v3 = vadd.f32 %v8243_v58, %v1956_v26  ;;  %v8993_v26 = vld [vmem:[#allocation42_spill] sm:$0xff] }
 0x6c3   :  { %v8544_v27 = vpack.c.b16 %v4036_v59, %v4035_v48  ;;  %v1315_v48 = vadd.f32 %v8992_v5, %v8991_v23 }
 0x6c4   :  { %v3695_v45 = vpop.f32.mrf.mxu3  ;;  %v2056_v63 = vmax.f32 %v2008_v3, 0.0 }
 0x6c5   :  { %v8548_v15 = vadd.f32 %v3695_v45, %v3421_v47  ;;  %v1803_v47 = vadd.f32 %v8994_v34, %v8993_v26  ;;  %v1910_v3 = vmax.f32 %v1315_v48, %v1813_v11  ;;  %v3424_v26 = vadd.f32 %v8492_v7, %v8286_v1  ;;  %4089 = vmatpush.bf16.msrb.mxu2 %v5720_v9 }
 0x6c6   :  { %v3609_v32 = vpop.f32.mrf.mxu1  ;;  %v2104_v23 = vpack.c.bf16 %v2056_v63, %v2056_v63  ;;  %v3425_v11 = vadd.f32 %v8496_v29, %v8289_v40  ;;  %v8997_v40 = vld [vmem:[#allocation8_spill] sm:$0xff]  ;;  %v3428_v9 = vadd.f32 %v8528_v4, %v8300_v46 }
 0x6c7   :  { %v3826_v18 = vmax.f32 %v8546_v37, %v8548_v15  ;;  %v8571_v45 = vadd.f32 %v3609_v32, %v3422_v2  ;;  %v1906_v5 = vmax.f32 %v1305_v30, %v1803_v47  ;;  %v8582_v32 = vpop.f32.mrf.mxu0  ;;  %v2103_v2 = vpack.c.bf16 %v2055_v55, %v2055_v55  ;;  %v5714_v37 = vld [vmem:[%s8781_s5 + $0x8] sm:$0xff] }
 0x6c8   :  { %v3488_v48 = vunpack.c.l.b16 %v2104_v23  ;;  %v2009_v29 = vadd.f32 %v8243_v58, %v8997_v40  ;;  %v3427_v23 = vadd.f32 %v8505_v20, %v8297_v41  ;;  %v5717_v20 = vld [vmem:[%s8781_s5 + $0x20] sm:$0xff] }
 0x6c9   :  { %3648 = vmatmul.bf16.gmra.mxu1 %v8276_v19  ;;  %3737 = vmatmul.bf16.gmra.mxu3 %v8276_v19  ;;  %v3487_v55 = vunpack.c.l.b16 %v2103_v2  ;;  %v5732_v2 = vld [vmem:[%s8781_s5 + $0x98] sm:$0xff] }
 0x6ca   :  { %4189 = vmatpush.bf16.msra.mxu0 %v5732_v2 }
 0x6cb   :  { %v3491_v1 = vpack.c.b16 %v3488_v48, %v3487_v55 }
 0x6cc   :  { %v3698_v59 = vpop.f32.mrf.mxu3 }
 0x6cd   :  { %v8573_v19 = vadd.f32 %v3698_v59, %v3423_v39  ;;  %v8587_v39 = vpop.f32.mrf.mxu2  ;;  %v1958_v59 = vmax.f32 %v1906_v5, %v1910_v3  ;;  %v3426_v3 = vadd.f32 %v8501_v13, %v8292_v38  ;;  %v5718_v38 = vld [vmem:[%s8781_s5 + $0x28] sm:$0xff] }
 0x6ce   :  { %v3611_v6 = vpop.f32.mrf.mxu1 }
 0x6cf   :  { %v3827_v24 = vmax.f32 %v8571_v45, %v8573_v19  ;;  %v8593_v34 = vadd.f32 %v3611_v6, %v3424_v26  ;;  %v2010_v7 = vadd.f32 %v8243_v58, %v1958_v59  ;;  %v5719_v6 = vld [vmem:[%s8781_s5 + $0x30] sm:$0xff]  ;;  %v8608_v30 = vpop.f32.mrf.mxu0 }
 0x6d0   :  { %4090 = vmatpush.bf16.msrb.mxu2 %v5719_v6  ;;  %v5731_v45 = vld [vmem:[%s8781_s5 + $0x90] sm:$0xff] }
 0x6d1   :  { %v2058_v5 = vmax.f32 %v2010_v7, 0.0  ;;  %4190 = vmatpush.bf16.msra.mxu0 %v5731_v45 }
 0x6d3   :  { %v2106_v41 = vpack.c.bf16 %v2058_v5, %v2058_v5 }
 0x6d4   :  { %v3700_v63 = vpop.f32.mrf.mxu3  ;;  %4091 = vmatpush.bf16.msrb.mxu2 %v5718_v38 }
 0x6d5   :  { %v8595_v47 = vadd.f32 %v3700_v63, %v3425_v11  ;;  %v8617_v58 = vpop.f32.mrf.mxu2  ;;  %v2057_v11 = vmax.f32 %v2009_v29, 0.0 }
 0x6d6   :  { %v3614_v42 = vpop.f32.mrf.mxu1 }
 0x6d7   :  { %v3828_v44 = vmax.f32 %v8593_v34, %v8595_v47  ;;  %v3777_v59 = vadd.f32 %v3614_v42, %v3426_v3  ;;  %v2105_v55 = vpack.c.bf16 %v2057_v11, %v2057_v11  ;;  %v3429_v42 = vadd.f32 %v8534_v31, %v8303_v22  ;;  %v8632_v40 = vpop.f32.mrf.mxu0  ;;  %v5715_v22 = vld [vmem:[%s8781_s5 + $0x10] sm:$0xff] }
 0x6d8   :  { %4092 = vmatpush.bf16.msrb.mxu2 %v5717_v20 }
 0x6d9   :  { %3653 = vmatmul.bf16.gmra.mxu1 %v3491_v1  ;;  %3742 = vmatmul.bf16.gmra.mxu3 %v3491_v1  ;;  %v3490_v1 = vunpack.c.l.b16 %v2106_v41 }
 0x6dc   :  { %v3703_v49 = vpop.f32.mrf.mxu3  ;;  %4093 = vmatpush.bf16.msrb.mxu2 %v5716_v12 }
 0x6dd   :  { %v3778_v26 = vadd.f32 %v3703_v49, %v3427_v23  ;;  %v3489_v23 = vunpack.c.l.b16 %v2105_v55  ;;  %v3364_v21 = vpop.f32.mrf.mxu2  ;;  %v3430_v49 = vadd.f32 %v8550_v25, %v8306_v60  ;;  %v5713_v60 = vld [vmem:[%s8781_s5] sm:$0xff] }
 0x6de   :  { %v3616_v13 = vpop.f32.mrf.mxu1 }
 0x6df   :  { %v3829_v48 = vmax.f32 %v3777_v59, %v3778_v26  ;;  %v3779_v6 = vadd.f32 %v3616_v13, %v3428_v9  ;;  %v3492_v4 = vpack.c.b16 %v3490_v1, %v3489_v23  ;;  %v8998_v59 = vld [vmem:[#allocation2_spill] sm:$0xff]  ;;  %v8999_v1 = vld [vmem:[#allocation19_spill] sm:$0xff] }
 0x6e0   :  { %v3431_v26 = vadd.f32 %v8555_v61, %v8998_v59  ;;  %4094 = vmatpush.bf16.msrb.mxu2 %v5715_v22 }
 0x6e1   :  { %v3853_v63 = vmax.f32 %v3825_v17, %v3829_v48 }
 0x6e3   :  { %v3873_v29 = vadd.f32 %v8487_v14, %v3853_v63 }
 0x6e4   :  { %v3705_v7 = vpop.f32.mrf.mxu3  ;;  %4095 = vmatpush.bf16.msrb.mxu2 %v5714_v37 }
 0x6e5   :  { %v3780_v3 = vadd.f32 %v3705_v7, %v3429_v42  ;;  %v3889_v31 = vmax.f32 %v3873_v29, 0.0  ;;  %v3367_v25 = vpop.f32.mrf.mxu2  ;;  %v3432_v7 = vadd.f32 %v8582_v32, %v8999_v1  ;;  %v9000_v29 = vld [vmem:[#allocation4_spill] sm:$0xff] }
 0x6e6   :  { %v3619_v17 = vpop.f32.mrf.mxu1 }
 0x6e7   :  { %v3830_v46 = vmax.f32 %v3779_v6, %v3780_v3  ;;  %v3905_v38 = vpack.c.bf16 %v3889_v31, %v3889_v31  ;;  %v3781_v48 = vadd.f32 %v3619_v17, %v3430_v49  ;;  %v3433_v6 = vadd.f32 %v8587_v39, %v9000_v29 }
 0x6e8   :  { %4096 = vmatpush.bf16.msrb.mxu2 %v5713_v60  ;;  %v3434_v31 = vadd.f32 %v8608_v30, %v8320_v51 }
 0x6e9   :  { %v3854_v5 = vmax.f32 %v3826_v18, %v3830_v46  ;;  %3658 = vmatmul.bf16.gmra.mxu1 %v3492_v4  ;;  %3747 = vmatmul.bf16.gmra.mxu3 %v3492_v4  ;;  %v3278_v18 = vpop.f32.mrf.mxu0  ;;  %v3954_v61 = vunpack.c.l.b16 %v3905_v38 }
 0x6eb   :  { %v3874_v2 = vadd.f32 %v8487_v14, %v3854_v5  ;;  %v3435_v5 = vadd.f32 %v8617_v58, %v8325_v52 }
 0x6ec   :  { %v3708_v11 = vpop.f32.mrf.mxu3 }
 0x6ed   :  { %v3890_v13 = vmax.f32 %v3874_v2, 0.0  ;;  %v3782_v41 = vadd.f32 %v3708_v11, %v3431_v26  ;;  %v3369_v39 = vpop.f32.mrf.mxu2 }
 0x6ee   :  { %v3621_v15 = vpop.f32.mrf.mxu1 }
 0x6ef   :  { %v3906_v20 = vpack.c.bf16 %v3890_v13, %v3890_v13  ;;  %v3831_v63 = vmax.f32 %v3781_v48, %v3782_v41  ;;  %v3783_v12 = vadd.f32 %v3621_v15, %v3432_v7  ;;  %v9001_v41 = vld [vmem:[#allocation10_spill] sm:$0xff]  ;;  %v3437_v15 = vadd.f32 %v3364_v21, %v8331_v43  ;;  %v5730_v43 = vld [vmem:[%s8781_s5 + $0x88] sm:$0xff] }
 0x6f0   :  { %v3436_v37 = vadd.f32 %v8632_v40, %v9001_v41  ;;  %4191 = vmatpush.bf16.msra.mxu0 %v5730_v43  ;;  %v9006_v43 = vld [vmem:[#allocation21_spill] sm:$0xff] }
 0x6f1   :  { %v3955_v55 = vunpack.c.l.b16 %v3906_v20  ;;  %v3855_v9 = vmax.f32 %v3827_v24, %v3831_v63  ;;  %v3280_v19 = vpop.f32.mrf.mxu0 }
 0x6f3   :  { %v3958_v42 = vpack.c.b16 %v3955_v55, %v3954_v61  ;;  %v3875_v23 = vadd.f32 %v8487_v14, %v3855_v9  ;;  %v9002_v61 = vld [vmem:[#allocation16_spill] sm:$0xff]  ;;  %v3439_v9 = vadd.f32 %v3367_v25, %v8339_v35  ;;  %v3441_v35 = vadd.f32 %v3369_v39, %v8345_v57 }
 0x6f4   :  { %v3710_v3 = vpop.f32.mrf.mxu3  ;;  %v3438_v55 = vadd.f32 %v3278_v18, %v9002_v61  ;;  %v3440_v18 = vadd.f32 %v3280_v19, %v8342_v8 }
 0x6f5   :  { %v3784_v17 = vadd.f32 %v3710_v3, %v3433_v6  ;;  %4018 = vmatmul.bf16.vlgmr.msra.gmra.mxu2 %v3958_v42  ;;  %v3891_v32 = vmax.f32 %v3875_v23, 0.0  ;;  %v3372_v30 = vpop.f32.mrf.mxu2  ;;  %v5729_v3 = vld [vmem:[%s8781_s5 + $0x80] sm:$0xff] }
 0x6f6   :  { %v3624_v46 = vpop.f32.mrf.mxu1  ;;  %4192 = vmatpush.bf16.msra.mxu0 %v5729_v3 }
 0x6f7   :  { %v3832_v4 = vmax.f32 %v3783_v12, %v3784_v17  ;;  %v3785_v49 = vadd.f32 %v3624_v46, %v3434_v31  ;;  %v3907_v11 = vpack.c.bf16 %v3891_v32, %v3891_v32  ;;  %v9003_v32 = vld [vmem:[#allocation20_spill] sm:$0xff] }
 0x6f9   :  { %v3856_v24 = vmax.f32 %v3828_v44, %v3832_v4  ;;  %v3956_v47 = vunpack.c.l.b16 %v3907_v11  ;;  %v3283_v48 = vpop.f32.mrf.mxu0 }
 0x6fb   :  { %v3876_v22 = vadd.f32 %v8487_v14, %v3856_v24  ;;  %v3442_v24 = vadd.f32 %v3283_v48, %v8351_v0 }
 0x6fc   :  { %v3713_v2 = vpop.f32.mrf.mxu3 }
 0x6fd   :  { %v3786_v59 = vadd.f32 %v3713_v2, %v3435_v5  ;;  %v3892_v26 = vmax.f32 %v3876_v22, 0.0  ;;  %v3374_v40 = vpop.f32.mrf.mxu2  ;;  %v3443_v22 = vadd.f32 %v3372_v30, %v9003_v32  ;;  %v9007_v32 = vld [vmem:[#allocation13_spill] sm:$0xff] }
 0x6fe   :  { %v3626_v38 = vpop.f32.mrf.mxu1 }
 0x6ff   :  { %v3833_v13 = vmax.f32 %v3785_v49, %v3786_v59  ;;  %v3908_v34 = vpack.c.bf16 %v3892_v26, %v3892_v26  ;;  %v3787_v52 = vadd.f32 %v3626_v38, %v3436_v37  ;;  %v9004_v59 = vld [vmem:[#allocation6_spill] sm:$0xff] }
 0x701   :  { %v3957_v44 = vunpack.c.l.b16 %v3908_v34  ;;  %v3285_v1 = vpop.f32.mrf.mxu0 }
 0x702   :  { %v3444_v26 = vadd.f32 %v3285_v1, %v9004_v59 }
 0x703   :  { %v3959_v51 = vpack.c.b16 %v3957_v44, %v3956_v47 }
 0x704   :  { %v3715_v20 = vpop.f32.mrf.mxu3 }
 0x705   :  { %v3788_v58 = vadd.f32 %v3715_v20, %v3437_v15  ;;  %4023 = vmatmul.bf16.gmra.mxu2 %v3959_v51  ;;  %v3377_v45 = vpop.f32.mrf.mxu2 }
 0x706   :  { %v3629_v63 = vpop.f32.mrf.mxu1  ;;  %v3447_v30 = vadd.f32 %v3377_v45, %v8370_v36 }
 0x707   :  { %v3834_v60 = vmax.f32 %v3787_v52, %v3788_v58  ;;  %v3789_v7 = vadd.f32 %v3629_v63, %v3438_v55 }
 0x709   :  { %v3288_v46 = vpop.f32.mrf.mxu0 }
 0x70c   :  { %v3718_v42 = vpop.f32.mrf.mxu3 }
 0x70d   :  { %v3790_v29 = vadd.f32 %v3718_v42, %v3439_v9  ;;  %v3379_v49 = vpop.f32.mrf.mxu2 }
 0x70e   :  { %v3631_v21 = vpop.f32.mrf.mxu1 }
 0x70f   :  { %v3835_v6 = vmax.f32 %v3789_v7, %v3790_v29  ;;  %v3791_v23 = vadd.f32 %v3631_v21, %v3440_v18 }
 0x711   :  { %v3290_v57 = vpop.f32.mrf.mxu0 }
 0x712   :  { %v3448_v29 = vadd.f32 %v3290_v57, %v8373_v10  ;;  %v5743_v10 = vld [vmem:[%s8781_s5 + $0xf0] sm:$0xff]  ;;  %v5742_v57 = vld [vmem:[%s8781_s5 + $0xe8] sm:$0xff] }
 0x714   :  { %v3720_v25 = vpop.f32.mrf.mxu3 }
 0x715   :  { %v3792_v12 = vadd.f32 %v3720_v25, %v3441_v35  ;;  %4097 = vmatmul.bf16.vlgmr.msrb.gmra.mxu2 %v8503_v62  ;;  %v3445_v62 = vadd.f32 %v3374_v40, %v8362_v16  ;;  %v3382_v20 = vpop.f32.mrf.mxu2  ;;  %v3449_v40 = vadd.f32 %v3379_v49, %v9006_v43  ;;  %v5744_v25 = vld [vmem:[%s8781_s5 + $0xf8] sm:$0xff] }
 0x716   :  { %v3634_v17 = vpop.f32.mrf.mxu1  ;;  %4285 = vmatpush.bf16.msra.mxu2 %v5744_v25  ;;  %v9012_v25 = vld [vmem:[#allocation18_spill] sm:$0xff] }
 0x717   :  { %v3836_v4 = vmax.f32 %v3791_v23, %v3792_v12  ;;  %v3793_v5 = vadd.f32 %v3634_v17, %v3442_v24 }
 0x719   :  { %v3293_v37 = vpop.f32.mrf.mxu0 }
 0x71a   :  { %v3450_v24 = vadd.f32 %v3293_v37, %v8382_v50  ;;  %4286 = vmatpush.bf16.msra.mxu2 %v5743_v10  ;;  %v5740_v37 = vld [vmem:[%s8781_s5 + $0xd8] sm:$0xff] }
 0x71c   :  { %v3723_v31 = vpop.f32.mrf.mxu3 }
 0x71d   :  { %v3794_v2 = vadd.f32 %v3723_v31, %v3443_v22  ;;  %v3384_v23 = vpop.f32.mrf.mxu2  ;;  %v3451_v22 = vadd.f32 %v3382_v20, %v9007_v32  ;;  %v9013_v32 = vld [vmem:[#allocation24_spill] sm:$0xff] }
 0x71e   :  { %v3636_v8 = vpop.f32.mrf.mxu1  ;;  %4287 = vmatpush.bf16.msra.mxu2 %v5742_v57 }
 0x71f   :  { %v3837_v19 = vmax.f32 %v3793_v5, %v3794_v2  ;;  %v3795_v34 = vadd.f32 %v3636_v8, %v3444_v26 }
 0x721   :  { %v3857_v39 = vmax.f32 %v3833_v13, %v3837_v19  ;;  %v9005_v13 = vld [vmem:[#allocation12_spill] sm:$0xff]  ;;  %v3295_v3 = vpop.f32.mrf.mxu0 }
 0x722   :  { %v3446_v51 = vadd.f32 %v3288_v46, %v9005_v13 }
 0x723   :  { %v3877_v38 = vadd.f32 %v8487_v14, %v3857_v39 }
 0x724   :  { %v3725_v11 = vpop.f32.mrf.mxu3 }
 0x725   :  { %v3796_v47 = vadd.f32 %v3725_v11, %v3445_v62  ;;  %4102 = vmatmul.bf16.gmra.mxu2 %v8544_v27  ;;  %v3893_v48 = vmax.f32 %v3877_v38, 0.0  ;;  %v3387_v26 = vpop.f32.mrf.mxu2  ;;  %v5741_v11 = vld [vmem:[%s8781_s5 + $0xe0] sm:$0xff]  ;;  %v9008_v38 = vld [vmem:[#allocation17_spill] sm:$0xff] }
 0x726   :  { %v3639_v0 = vpop.f32.mrf.mxu1  ;;  %4288 = vmatpush.bf16.msra.mxu2 %v5741_v11 }
 0x727   :  { %v3838_v44 = vmax.f32 %v3795_v34, %v3796_v47  ;;  %v3909_v52 = vpack.c.bf16 %v3893_v48, %v3893_v48  ;;  %v3797_v63 = vadd.f32 %v3639_v0, %v3446_v51  ;;  %v3452_v34 = vadd.f32 %v3295_v3, %v9008_v38 }
 0x728   :  { %v3453_v47 = vadd.f32 %v3384_v23, %v8393_v33  ;;  %v9009_v33 = vld [vmem:[#allocation23_spill] sm:$0xff] }
 0x729   :  { %v3858_v41 = vmax.f32 %v3834_v60, %v3838_v44  ;;  %v4129_v42 = vunpack.c.l.b16 %v3909_v52  ;;  %v3298_v49 = vpop.f32.mrf.mxu0  ;;  %v3455_v52 = vadd.f32 %v3387_v26, %v8401_v53 }
 0x72a   :  { %4289 = vmatpush.bf16.msra.mxu2 %v5740_v37 }
 0x72b   :  { %v3878_v15 = vadd.f32 %v8487_v14, %v3858_v41 }
 0x72c   :  { %v3728_v16 = vpop.f32.mrf.mxu3 }
 0x72d   :  { %v3894_v58 = vmax.f32 %v3878_v15, 0.0  ;;  %v3798_v61 = vadd.f32 %v3728_v16, %v3447_v30  ;;  %v5739_v30 = vld [vmem:[%s8781_s5 + $0xd0] sm:$0xff]  ;;  %v3389_v20 = vpop.f32.mrf.mxu2  ;;  %v3454_v16 = vadd.f32 %v3298_v49, %v9009_v33 }
 0x72e   :  { %v3641_v55 = vpop.f32.mrf.mxu1  ;;  %4290 = vmatpush.bf16.msra.mxu2 %v5739_v30 }
 0x72f   :  { %v3910_v9 = vpack.c.bf16 %v3894_v58, %v3894_v58  ;;  %v3839_v27 = vmax.f32 %v3797_v63, %v3798_v61  ;;  %v3799_v18 = vadd.f32 %v3641_v55, %v3448_v29  ;;  %v5738_v55 = vld [vmem:[%s8781_s5 + $0xc8] sm:$0xff] }
 0x731   :  { %v4130_v1 = vunpack.c.l.b16 %v3910_v9  ;;  %v3859_v7 = vmax.f32 %v3835_v6, %v3839_v27  ;;  %v3300_v51 = vpop.f32.mrf.mxu0 }
 0x732   :  { %4291 = vmatpush.bf16.msra.mxu2 %v5738_v55 }
 0x733   :  { %v4133_v60 = vpack.c.b16 %v4130_v1, %v4129_v42  ;;  %v3879_v36 = vadd.f32 %v8487_v14, %v3859_v7  ;;  %v5737_v42 = vld [vmem:[%s8781_s5 + $0xc0] sm:$0xff]  ;;  %v3456_v7 = vadd.f32 %v3300_v51, %v8404_v54 }
 0x734   :  { %v3730_v21 = vpop.f32.mrf.mxu3 }
 0x735   :  { %v3800_v35 = vadd.f32 %v3730_v21, %v3449_v40  ;;  %4193 = vmatmul.bf16.vlgmr.msra.gmra.mxu0 %v4133_v60  ;;  %v3895_v46 = vmax.f32 %v3879_v36, 0.0  ;;  %v9010_v60 = vld [vmem:[#allocation22_spill] sm:$0xff]  ;;  %v3392_v29 = vpop.f32.mrf.mxu2 }
 0x736   :  { %v3644_v12 = vpop.f32.mrf.mxu1  ;;  %v3457_v53 = vadd.f32 %v3389_v20, %v9010_v60  ;;  %4292 = vmatpush.bf16.msra.mxu2 %v5737_v42  ;;  %v3459_v23 = vadd.f32 %v3392_v29, %v9012_v25 }
 0x737   :  { %v3840_v17 = vmax.f32 %v3799_v18, %v3800_v35  ;;  %v3801_v5 = vadd.f32 %v3644_v12, %v3450_v24  ;;  %v3911_v19 = vpack.c.bf16 %v3895_v46, %v3895_v46  ;;  %v9011_v18 = vld [vmem:[#allocation14_spill] sm:$0xff] }
 0x739   :  { %v3860_v6 = vmax.f32 %v3836_v4, %v3840_v17  ;;  %v4131_v62 = vunpack.c.l.b16 %v3911_v19  ;;  %v3303_v1 = vpop.f32.mrf.mxu0 }
 0x73a   :  { %v3458_v35 = vadd.f32 %v3303_v1, %v9011_v18  ;;  %v4328_v18 = vld [vmem:[%s8785_s7 + $0x18] sm:$0x1] }
 0x73b   :  { %v3880_v45 = vadd.f32 %v8487_v14, %v3860_v6 }
 0x73c   :  { %v3733_v31 = vpop.f32.mrf.mxu3 }
 0x73d   :  { %v3802_v2 = vadd.f32 %v3733_v31, %v3451_v22  ;;  %v3896_v8 = vmax.f32 %v3880_v45, 0.0  ;;  %v3394_v46 = vpop.f32.mrf.mxu2  ;;  %v9014_v31 = vld [vmem:[#allocation25_spill] sm:$0xff] }
 0x73e   :  { %v3646_v39 = vpop.f32.mrf.mxu1 }
 0x73f   :  { %v3841_v4 = vmax.f32 %v3801_v5, %v3802_v2  ;;  %v3912_v59 = vpack.c.bf16 %v3896_v8, %v3896_v8  ;;  %v3803_v48 = vadd.f32 %v3646_v39, %v3452_v34  ;;  %v3461_v5 = vadd.f32 %v3394_v46, %v9014_v31  ;;  %v5746_v46 = vld [vmem:[%s8785_s7 + $0x8] sm:$0xff] }
 0x741   :  { %v4132_v50 = vunpack.c.l.b16 %v3912_v59  ;;  %v3305_v17 = vpop.f32.mrf.mxu0 }
 0x742   :  { %v3460_v22 = vadd.f32 %v3305_v17, %v9013_v32 }
 0x743   :  { %v4134_v0 = vpack.c.b16 %v4132_v50, %v4131_v62 }
 0x744   :  { %v3735_v44 = vpop.f32.mrf.mxu3 }
 0x745   :  { %v3804_v41 = vadd.f32 %v3735_v44, %v3453_v47  ;;  %4198 = vmatmul.bf16.gmra.mxu0 %v4134_v0  ;;  %v3397_v59 = vpop.f32.mrf.mxu2 }
 0x746   :  { %v3649_v15 = vpop.f32.mrf.mxu1 }
 0x747   :  { %v3842_v13 = vmax.f32 %v3803_v48, %v3804_v41  ;;  %v3805_v63 = vadd.f32 %v3649_v15, %v3454_v16 }
 0x749   :  { %v3308_v39 = vpop.f32.mrf.mxu0 }
 0x74a   :  { %v3462_v38 = vadd.f32 %v3308_v39, %v8430_v56 }
 0x74c   :  { %v3738_v58 = vpop.f32.mrf.mxu3 }
 0x74d   :  { %v3806_v61 = vadd.f32 %v3738_v58, %v3455_v52  ;;  %v3399_v33 = vpop.f32.mrf.mxu2  ;;  %v9015_v52 = vld [vmem:[#allocation26_spill] sm:$0xff] }
 0x74e   :  { %v3651_v9 = vpop.f32.mrf.mxu1 }
 0x74f   :  { %v3843_v27 = vmax.f32 %v3805_v63, %v3806_v61  ;;  %v3807_v40 = vadd.f32 %v3651_v9, %v3456_v7  ;;  %v9016_v63 = vld [vmem:[#allocation27_spill] sm:$0xff] }
 0x750   :  { %v3465_v56 = vadd.f32 %v3399_v33, %v9016_v63 }
 0x751   :  { %v3310_v15 = vpop.f32.mrf.mxu0 }
 0x752   :  { %v3464_v58 = vadd.f32 %v3310_v15, %v9015_v52  ;;  %v5753_v52 = vld [vmem:[%s8784_s8] ss:$0 sm:$0xff] }
 0x754   :  { %v3740_v43 = vpop.f32.mrf.mxu3 }
 0x755   :  { %v3808_v21 = vadd.f32 %v3740_v43, %v3457_v53 }
 0x756   :  { %v3654_v3 = vpop.f32.mrf.mxu1 }
 0x757   :  { %v3844_v36 = vmax.f32 %v3807_v40, %v3808_v21  ;;  %v3809_v10 = vadd.f32 %v3654_v3, %v3458_v35  ;;  %v4346_v35 = vunpack.c.l.b16 %v4328_v18 }
 0x759   :  { %v4350_v25 = vpack.c.b16 %v4346_v35, %v4346_v35 }
 0x75c   :  { %v3743_v12 = vpop.f32.mrf.mxu3 }
 0x75d   :  { %v3810_v6 = vadd.f32 %v3743_v12, %v3459_v23  ;;  %v4363_v23 = vsel %vm4361_vm2, %v4350_v25, 0 }
 0x75e   :  { %v3656_v45 = vpop.f32.mrf.mxu1  ;;  %4369 = vmatpush.bf16.msrb.mxu0 %v4363_v23 }
 0x75f   :  { %v3845_v54 = vmax.f32 %v3809_v10, %v3810_v6  ;;  %v3811_v19 = vadd.f32 %v3656_v45, %v3460_v22  ;;  %v5745_v45 = vld [vmem:[%s8785_s7] sm:$0xff] }
 0x761   :  { %v3861_v24 = vmax.f32 %v3841_v4, %v3845_v54  ;;  %v3463_v4 = vadd.f32 %v3397_v59, %v8435_v28 }
 0x763   :  { %v3881_v8 = vadd.f32 %v8487_v14, %v3861_v24 }
 0x764   :  { %v3745_v2 = vpop.f32.mrf.mxu3 }
 0x765   :  { %v3812_v57 = vadd.f32 %v3745_v2, %v3461_v5  ;;  %v3897_v62 = vmax.f32 %v3881_v8, 0.0 }
 0x766   :  { %v3659_v26 = vpop.f32.mrf.mxu1 }
 0x767   :  { %v3846_v49 = vmax.f32 %v3811_v19, %v3812_v57  ;;  %v3913_v47 = vpack.c.bf16 %v3897_v62, %v3897_v62  ;;  %v3813_v44 = vadd.f32 %v3659_v26, %v3462_v38  ;;  %v5752_v57 = vld [vmem:[%s8783_s6] ss:$0 sm:$0xff] }
 0x769   :  { %v3862_v50 = vmax.f32 %v3842_v13, %v3846_v49  ;;  %v4229_v51 = vunpack.c.l.b16 %v3913_v47 }
 0x76b   :  { %v3882_v11 = vadd.f32 %v8487_v14, %v3862_v50 }
 0x76c   :  { %v3748_v34 = vpop.f32.mrf.mxu3 }
 0x76d   :  { %v3898_v0 = vmax.f32 %v3882_v11, 0.0  ;;  %v3814_v48 = vadd.f32 %v3748_v34, %v3463_v4 }
 0x76e   :  { %v3661_v16 = vpop.f32.mrf.mxu1 }
 0x76f   :  { %v3914_v41 = vpack.c.bf16 %v3898_v0, %v3898_v0  ;;  %v3847_v37 = vmax.f32 %v3813_v44, %v3814_v48  ;;  %v3815_v55 = vadd.f32 %v3661_v16, %v3464_v58 }
 0x771   :  { %v4230_v30 = vunpack.c.l.b16 %v3914_v41  ;;  %v3863_v20 = vmax.f32 %v3843_v27, %v3847_v37 }
 0x773   :  { %v4233_v13 = vpack.c.b16 %v4230_v30, %v4229_v51  ;;  %v3883_v28 = vadd.f32 %v8487_v14, %v3863_v20 }
 0x774   :  { %v3750_v61 = vpop.f32.mrf.mxu3 }
 0x775   :  { %v3816_v9 = vadd.f32 %v3750_v61, %v3465_v56  ;;  %4293 = vmatmul.bf16.vlgmr.msra.gmra.mxu2 %v4233_v13  ;;  %v3899_v7 = vmax.f32 %v3883_v28, 0.0 }
 0x777   :  { %v3848_v42 = vmax.f32 %v3815_v55, %v3816_v9  ;;  %v3915_v27 = vpack.c.bf16 %v3899_v7, %v3899_v7 }
 0x778   :  { %v4019_v3 = vpop.f32.mrf.mxu2 }
 0x779   :  { %v3864_v1 = vmax.f32 %v3844_v36, %v3848_v42  ;;  %v4231_v43 = vunpack.c.l.b16 %v3915_v27 }
 0x77b   :  { %v3884_v60 = vadd.f32 %v8487_v14, %v3864_v1  ;;  %v5747_v14 = vld [vmem:[%s8785_s7 + $0x10] sm:$0xff] }
 0x77c   :  { %4370 = vmatpush.bf16.msrb.mxu0 %v5747_v14 }
 0x77d   :  { %v3900_v53 = vmax.f32 %v3884_v60, 0.0 }
 0x77f   :  { %v3916_v29 = vpack.c.bf16 %v3900_v53, %v3900_v53 }
 0x780   :  { %v4021_v36 = vpop.f32.mrf.mxu2  ;;  %4371 = vmatpush.bf16.msrb.mxu0 %v5746_v46 }
 0x781   :  { %v4232_v40 = vunpack.c.l.b16 %v3916_v29 }
 0x783   :  { %v4234_v21 = vpack.c.b16 %v4232_v40, %v4231_v43 }
 0x784   :  { %4372 = vmatpush.bf16.msrb.mxu0 %v5745_v45 }
 0x785   :  { %4298 = vmatmul.bf16.gmra.mxu2 %v4234_v21 }
 0x788   :  { %v4024_v12 = vpop.f32.mrf.mxu2 }
 0x790   :  { %v4026_v17 = vpop.f32.mrf.mxu2 }
 0x798   :  { %v4098_v10 = vpop.f32.mrf.mxu2 }
 0x799   :  { %v4099_v5 = vadd.f32 %v4098_v10, %v4019_v3 }
 0x7a0   :  { %v4100_v6 = vpop.f32.mrf.mxu2 }
 0x7a1   :  { %v4101_v8 = vadd.f32 %v4100_v6, %v4021_v36 }
 0x7a8   :  { %v4103_v54 = vpop.f32.mrf.mxu2 }
 0x7a9   :  { %v4104_v47 = vadd.f32 %v4103_v54, %v4024_v12 }
 0x7b0   :  { %v4105_v32 = vpop.f32.mrf.mxu2 }
 0x7b1   :  { %v4106_v48 = vadd.f32 %v4105_v32, %v4026_v17 }
 0x7b2   :  { %v4194_v24 = vpop.f32.mrf.mxu0 }
 0x7b3   :  { %v4204_v2 = vadd.f32 %v4194_v24, %v4099_v5 }
 0x7ba   :  { %v4196_v22 = vpop.f32.mrf.mxu0 }
 0x7bb   :  { %v4205_v39 = vadd.f32 %v4196_v22, %v4101_v8 }
 0x7c2   :  { %v4199_v62 = vpop.f32.mrf.mxu0 }
 0x7c3   :  { %v4206_v0 = vadd.f32 %v4199_v62, %v4104_v47 }
 0x7ca   :  { %v4201_v44 = vpop.f32.mrf.mxu0 }
 0x7cb   :  { %v4207_v37 = vadd.f32 %v4201_v44, %v4106_v48 }
 0x7f8   :  { %v4294_v31 = vpop.f32.mrf.mxu2 }
 0x7f9   :  { %v4304_v19 = vadd.f32 %v4294_v31, %v4204_v2 }
 0x7fb   :  { %v4312_v59 = vadd.f32 %v5752_v57, %v4304_v19 }
 0x7fd   :  { %v4316_v11 = vmax.f32 %v4312_v59, 0.0 }
 0x800   :  { %v4296_v49 = vpop.f32.mrf.mxu2 }
 0x801   :  { %v4305_v26 = vadd.f32 %v4296_v49, %v4205_v39 }
 0x803   :  { %v4313_v50 = vadd.f32 %v5752_v57, %v4305_v26 }
 0x805   :  { %v4317_v38 = vmax.f32 %v4313_v50, 0.0 }
 0x807   :  { %v4320_v4 = vpack.c.bf16 %v4317_v38, %v4316_v11 }
 0x808   :  { %v4299_v34 = vpop.f32.mrf.mxu2 }
 0x809   :  { %5517 = vmatmul.msk.bf16.vlgmr.msrb.gmra.mxu0 %vm4354_vm3, %v4320_v4  ;;  %v4306_v41 = vadd.f32 %v4299_v34, %v4206_v0 }
 0x80b   :  { %v4314_v51 = vadd.f32 %v5752_v57, %v4306_v41 }
 0x80d   :  { %v4318_v33 = vmax.f32 %v4314_v51, 0.0 }
 0x810   :  { %v4301_v15 = vpop.f32.mrf.mxu2 }
 0x811   :  { %v4307_v30 = vadd.f32 %v4301_v15, %v4207_v37 }
 0x813   :  { %v4315_v20 = vadd.f32 %v5752_v57, %v4307_v30 }
 0x815   :  { %v4319_v16 = vmax.f32 %v4315_v20, 0.0 }
 0x817   :  { %v4321_v13 = vpack.c.bf16 %v4319_v16, %v4318_v33 }
 0x819   :  { %5518 = vmatmul.msk.bf16.gmra.mxu0 %vm4354_vm3, %v4321_v13 }
 0x886   :  { %v4374_v58 = vpop.f32.mrf.mxu0 }
 0x887   :  { %v4375_v63 = vadd.f32 %v5753_v52, %v4374_v58 }
 0x889   :  { %4385 = vst.msk [vmem:[%s8786_s9] sm:$0xff] %vm4384_vm4, %v4375_v63 }
 0x88e   :  { %v4376_v56 = vpop.f32.mrf.mxu0 }
 0x88f   :  { %v4377_v61 = vadd.f32 %v5753_v52, %v4376_v56 }
 0x891   :  { %4386 = vst.msk [vmem:[%s8786_s9 + $0x8] sm:$0xff] %vm4384_vm4, %v4377_v61 }
 0x896   :  { %v4379_v28 = vpop.f32.mrf.mxu0 }
 0x897   :  { %v4380_v55 = vadd.f32 %v5753_v52, %v4379_v28 }
 0x899   :  { %4387 = vst.msk [vmem:[%s8786_s9 + $0x10] sm:$0xff] %vm4384_vm4, %v4380_v55 }
 0x89e   :  { %v4381_v9 = vpop.f32.mrf.mxu0 }
 0x89f   :  { %v4382_v42 = vadd.f32 %v5753_v52, %v4381_v9 }
 0x8a1   :  { %4388 = vst.msk [vmem:[%s8786_s9 + $0x18] sm:$0xff] %vm4384_vm4, %v4382_v42 }

</bundles_post_ra>
